<compile_context>
chip_gen: v7x
topology: tpu7x:2x2x1
jax: 0.10.0
libtpu: 0.0.40
codegen_flags: <defaults>
</compile_context>

<pallas_src>
import functools

import jax
import jax.numpy as jnp
from jax import lax
from jax.experimental import pallas as pl
from jax.experimental.pallas import tpu as pltpu

# f32 matmuls everywhere (faithful to the f32 PyTorch reference).
jax.config.update("jax_default_matmul_precision", "highest")

# sigmoid-constraint bounds (net_pars, bi-exp, fitS0=True)
DMIN, DMAX = 0.0, 0.005      # Dt
FMIN, FMAX = 0.0, 0.7        # Fp
DPMIN, DPMAX = 0.005, 0.2    # Dp
F0MIN, F0MAX = 0.0, 2.0      # f0 (S0)
BN_EPS = 1e-5
N_ENC = 4                    # parallel encoders: Fp, Dp, Dt, f0


def _elu(x):
    # nn.ELU(alpha=1.0); clamp the exp argument so the dead branch can't overflow.
    return jnp.where(x > 0, x, jnp.exp(jnp.minimum(x, 0.0)) - 1.0)


def _sigmoid(x):
    return 1.0 / (1.0 + jnp.exp(-x))


def ivim_net_kernel(xT_ref, bval_ref,
                    w1_ref, b1_ref, w2_ref, b2_ref, w3_ref, b3_ref,
                    xrec_ref, par_ref):
    """Transposed layout: batch on lanes.

    xT_ref:   (nb, TILE_B)      input signals (transposed)
    bval_ref: (nb, 1)           b-values as a column
    w1_ref:   (4*nb, nb)        stacked, BN-folded layer-1 weights (transposed)
    w2_ref:   (4*nb, 4*nb)      block-diagonal, BN-folded layer-2 weights
    w3_ref:   (4, 4*nb)         block-structured head weights
    b*_ref:   matching column biases
    xrec_ref: (nb, TILE_B)      reconstructed signal (transposed)
    par_ref:  (4, TILE_B)       rows: [Dt, Fp/(f0+Fp), Dp, f0+Fp]
    """
    xT = xT_ref[...]                     # (nb, TB)
    bvals = bval_ref[...]                # (nb, 1)
    dot = functools.partial(jnp.dot, preferred_element_type=jnp.float32,
                            precision=lax.Precision.HIGHEST)

    # Fused encoders: Linear+BN (folded) -> ELU, twice, then the 4 heads.
    # Dropout is identity in eval mode.
    h = dot(w1_ref[...], xT) + b1_ref[...]        # (4nb, TB)
    h = _elu(h)
    h = dot(w2_ref[...], h) + b2_ref[...]         # (4nb, TB)
    h = _elu(h)
    p = dot(w3_ref[...], h) + b3_ref[...]         # (4, TB): rows = encoder 0..3

    # sigmoid constraints (con == 'sigmoid', parallel, fitS0=True)
    Fp = FMIN + _sigmoid(p[0:1, :]) * (FMAX - FMIN)
    Dp = DPMIN + _sigmoid(p[1:2, :]) * (DPMAX - DPMIN)
    Dt = DMIN + _sigmoid(p[2:3, :]) * (DMAX - DMIN)
    f0 = F0MIN + _sigmoid(p[3:4, :]) * (F0MAX - F0MIN)

    # bi-exponential IVIM signal (transposed): Fp*exp(-b*Dp) + f0*exp(-b*Dt)
    xrec_ref[...] = Fp * jnp.exp(-bvals * Dp) + f0 * jnp.exp(-bvals * Dt)

    # return tuple semantics: (X, Dt, Fp/(f0+Fp), Dp, f0+Fp) -- one dense store.
    s0 = f0 + Fp
    par_ref[...] = jnp.concatenate([Dt, Fp / s0, Dp, s0], axis=0)


def fuse_params(raw_params, eps=BN_EPS):
    """Fold eval-mode BatchNorm into the Linears and fuse the 4 encoders into
    block-structured, transposed weight matrices (done once, outside the kernel)."""
    (w1, b1, g1, be1, rm1, rv1,
     w2, b2, g2, be2, rm2, rv2,
     w3, b3) = raw_params
    n_enc, nb, _ = w1.shape

    s1 = g1 / jnp.sqrt(rv1 + eps)                 # (4,1,nb) scale on output features
    w1f = w1 * s1
    b1f = (b1 - rm1) * s1 + be1
    s2 = g2 / jnp.sqrt(rv2 + eps)
    w2f = w2 * s2
    b2f = (b2 - rm2) * s2 + be2

    # Transposed / stacked layouts for the lanes-on-batch kernel.
    w1T = jnp.transpose(w1f, (0, 2, 1)).reshape(n_enc * nb, nb)        # (4nb, nb)
    b1T = jnp.transpose(b1f, (0, 2, 1)).reshape(n_enc * nb, 1)         # (4nb, 1)
    w2T = jax.scipy.linalg.block_diag(*[w2f[e].T for e in range(n_enc)])   # (4nb, 4nb)
    b2T = jnp.transpose(b2f, (0, 2, 1)).reshape(n_enc * nb, 1)         # (4nb, 1)
    w3T = jax.scipy.linalg.block_diag(*[w3[e].T for e in range(n_enc)])    # (4, 4nb)
    b3T = b3.reshape(n_enc, 1)                                         # (4, 1)
    return (w1T.astype(jnp.float32), b1T.astype(jnp.float32),
            w2T.astype(jnp.float32), b2T.astype(jnp.float32),
            w3T.astype(jnp.float32), b3T.astype(jnp.float32))


def ivim_net_forward(x, bvalues, fused_params, *, tile_b=512):
    """x: (B, nb) f32; bvalues: (nb,) f32; fused_params from fuse_params().

    Returns (X_reconstruction (B,nb), Dt (B,1), Fp/(f0+Fp) (B,1), Dp (B,1), f0+Fp (B,1)).
    """
    B, nb = x.shape
    n_tiles = -(-B // tile_b)
    B_pad = n_tiles * tile_b

    xT = jnp.transpose(x.astype(jnp.float32))                  # (nb, B)
    if B_pad != B:
        xT = jnp.pad(xT, ((0, 0), (0, B_pad - B)))
    bcol = bvalues.reshape(nb, 1).astype(jnp.float32)

    w1T, b1T, w2T, b2T, w3T, b3T = fused_params
    ne4 = w1T.shape[0]                                          # 4*nb

    # Advisory cost estimate (math FLOPs of the fused matmuls + reconstruction).
    flops = 2 * B_pad * (ne4 * nb + ne4 * ne4 + ne4 * N_ENC) + 8 * B_pad * nb
    transcendentals = B_pad * (2 * ne4 + N_ENC + 2 * nb)
    bytes_accessed = 4 * (2 * B_pad * nb + N_ENC * B_pad) + 4 * (
        w1T.size + b1T.size + w2T.size + b2T.size + w3T.size + b3T.size + nb)

    xrecT, parT = pl.pallas_call(
        ivim_net_kernel,
        out_shape=(jax.ShapeDtypeStruct((nb, B_pad), jnp.float32),
                   jax.ShapeDtypeStruct((N_ENC, B_pad), jnp.float32)),
        grid=(n_tiles,),
        in_specs=[
            pl.BlockSpec((nb, tile_b), lambda i: (0, i)),       # x tile (streamed)
            pl.BlockSpec((nb, 1), lambda i: (0, 0)),            # b-values (resident)
            pl.BlockSpec((ne4, nb), lambda i: (0, 0)),          # fused W1 (resident)
            pl.BlockSpec((ne4, 1), lambda i: (0, 0)),
            pl.BlockSpec((ne4, ne4), lambda i: (0, 0)),         # block-diag W2
            pl.BlockSpec((ne4, 1), lambda i: (0, 0)),
            pl.BlockSpec((N_ENC, ne4), lambda i: (0, 0)),       # heads W3
            pl.BlockSpec((N_ENC, 1), lambda i: (0, 0)),
        ],
        out_specs=(
            pl.BlockSpec((nb, tile_b), lambda i: (0, i)),
            pl.BlockSpec((N_ENC, tile_b), lambda i: (0, i)),
        ),
        compiler_params=pltpu.CompilerParams(
            dimension_semantics=("parallel",),
            vmem_limit_bytes=32 * 1024 * 1024,
        ),
        cost_estimate=pl.CostEstimate(
            flops=int(flops),
            transcendentals=int(transcendentals),
            bytes_accessed=int(bytes_accessed)),
    )(xT, bcol, w1T, b1T, w2T, b2T, w3T, b3T)

    X_rec = jnp.transpose(xrecT)[:B]                            # (B, nb)
    Dt = parT[0, :B][:, None]
    Fp_frac = parT[1, :B][:, None]
    Dp = parT[2, :B][:, None]
    S0 = parT[3, :B][:, None]
    return X_rec, Dt, Fp_frac, Dp, S0


def init_params(key, nb):
    """Deterministic synthetic parameters for the 4 parallel encoders (stacked on axis 0).
    BN stats are made non-trivial so the BN-folding path is actually exercised."""
    ks = jax.random.split(key, 14)
    scale = 1.0 / jnp.sqrt(jnp.float32(nb))
    w1 = jax.random.normal(ks[0], (N_ENC, nb, nb), jnp.float32) * scale
    b1 = jax.random.normal(ks[1], (N_ENC, 1, nb), jnp.float32) * 0.01
    w2 = jax.random.normal(ks[2], (N_ENC, nb, nb), jnp.float32) * scale
    b2 = jax.random.normal(ks[3], (N_ENC, 1, nb), jnp.float32) * 0.01
    w3 = jax.random.normal(ks[4], (N_ENC, nb, 1), jnp.float32) * scale
    b3 = jax.random.normal(ks[5], (N_ENC, 1, 1), jnp.float32) * 0.01
    g1 = 1.0 + 0.1 * jax.random.normal(ks[6], (N_ENC, 1, nb), jnp.float32)
    be1 = 0.1 * jax.random.normal(ks[7], (N_ENC, 1, nb), jnp.float32)
    rm1 = 0.1 * jax.random.normal(ks[8], (N_ENC, 1, nb), jnp.float32)
    rv1 = 1.0 + 0.2 * jnp.abs(jax.random.normal(ks[9], (N_ENC, 1, nb), jnp.float32))
    g2 = 1.0 + 0.1 * jax.random.normal(ks[10], (N_ENC, 1, nb), jnp.float32)
    be2 = 0.1 * jax.random.normal(ks[11], (N_ENC, 1, nb), jnp.float32)
    rm2 = 0.1 * jax.random.normal(ks[12], (N_ENC, 1, nb), jnp.float32)
    rv2 = 1.0 + 0.2 * jnp.abs(jax.random.normal(ks[13], (N_ENC, 1, nb), jnp.float32))
    return (w1, b1, g1, be1, rm1, rv1,
            w2, b2, g2, be2, rm2, rv2,
            w3, b3)


def ivim_net_reference(x, bvalues, raw_params):
    """Pure-JAX reference (eval-mode BN, unfused encoders) for correctness checking."""
    (w1, b1, g1, be1, rm1, rv1,
     w2, b2, g2, be2, rm2, rv2,
     w3, b3) = raw_params
    ps = []
    for e in range(N_ENC):
        h = x @ w1[e] + b1[e]
        h = (h - rm1[e]) / jnp.sqrt(rv1[e] + BN_EPS) * g1[e] + be1[e]
        h = _elu(h)
        h = h @ w2[e] + b2[e]
        h = (h - rm2[e]) / jnp.sqrt(rv2[e] + BN_EPS) * g2[e] + be2[e]
        h = _elu(h)
        ps.append(h @ w3[e] + b3[e])                            # (B, 1)
    Fp = FMIN + _sigmoid(ps[0]) * (FMAX - FMIN)
    Dp = DPMIN + _sigmoid(ps[1]) * (DPMAX - DPMIN)
    Dt = DMIN + _sigmoid(ps[2]) * (DMAX - DMIN)
    f0 = F0MIN + _sigmoid(ps[3]) * (F0MAX - F0MIN)
    brow = bvalues[None, :]
    X_rec = Fp * jnp.exp(-brow * Dp) + f0 * jnp.exp(-brow * Dt)
    return X_rec, Dt, Fp / (f0 + Fp), Dp, f0 + Fp


if __name__ == "__main__":
    key = jax.random.PRNGKey(0)
    k_x, k_p = jax.random.split(key)

    # 16 b-values (defines network width); modest voxel batch that still exercises
    # the batch grid (2 tiles of 512) and the padding path (1000 -> 1024).
    bvalues = jnp.array([0, 5, 10, 20, 30, 40, 60, 80,
                         100, 150, 200, 300, 400, 500, 700, 1000], dtype=jnp.float32)
    nb = bvalues.shape[0]
    B = 1000

    x = jax.random.uniform(k_x, (B, nb), jnp.float32, minval=0.1, maxval=1.2)
    raw_params = init_params(k_p, nb)
    fused_params = fuse_params(raw_params)

    outs = ivim_net_forward(x, bvalues, fused_params, tile_b=512)
    jax.block_until_ready(outs)

    X_rec, Dt, Fp_frac, Dp, S0 = outs
    assert X_rec.shape == (B, nb) and Dt.shape == (B, 1) and Fp_frac.shape == (B, 1)
    assert Dp.shape == (B, 1) and S0.shape == (B, 1)

    ref = ivim_net_reference(x, bvalues, raw_params)
    for got, want in zip(outs, ref):
        err = float(jnp.max(jnp.abs(got - want)))
        assert jnp.allclose(got, want, atol=1e-2, rtol=1e-2), f"max abs err {err}"

    print("KERNEL_OK")
</pallas_src>

<mosaic_0001>
module attributes {stable_mosaic.version = 11 : i64} {
  func.func @ivim_net_kernel(%arg0: i32, %arg1: memref<16x512xf32, #tpu.memory_space<vmem>>, %arg2: memref<16x1xf32, #tpu.memory_space<vmem>>, %arg3: memref<64x16xf32, #tpu.memory_space<vmem>>, %arg4: memref<64x1xf32, #tpu.memory_space<vmem>>, %arg5: memref<64x64xf32, #tpu.memory_space<vmem>>, %arg6: memref<64x1xf32, #tpu.memory_space<vmem>>, %arg7: memref<4x64xf32, #tpu.memory_space<vmem>>, %arg8: memref<4x1xf32, #tpu.memory_space<vmem>>, %arg9: memref<16x512xf32, #tpu.memory_space<vmem>>, %arg10: memref<4x512xf32, #tpu.memory_space<vmem>>) attributes {dimension_semantics = [#tpu.dimension_semantics<parallel>], iteration_bounds = array<i64: 2>, scalar_prefetch = 0 : i64, scratch_operands = 0 : i64, tpu.core_type = #tpu.core_type<tc>, window_params = [{transform_indices = @transform_0, window_bounds = array<i64: 16, 512>}, {pipeline_mode = #tpu.pipeline_mode<synchronous>, transform_indices = @transform_1, window_bounds = array<i64: 16, 1>}, {pipeline_mode = #tpu.pipeline_mode<synchronous>, transform_indices = @transform_2, window_bounds = array<i64: 64, 16>}, {pipeline_mode = #tpu.pipeline_mode<synchronous>, transform_indices = @transform_3, window_bounds = array<i64: 64, 1>}, {pipeline_mode = #tpu.pipeline_mode<synchronous>, transform_indices = @transform_4, window_bounds = array<i64: 64, 64>}, {pipeline_mode = #tpu.pipeline_mode<synchronous>, transform_indices = @transform_5, window_bounds = array<i64: 64, 1>}, {pipeline_mode = #tpu.pipeline_mode<synchronous>, transform_indices = @transform_6, window_bounds = array<i64: 4, 64>}, {pipeline_mode = #tpu.pipeline_mode<synchronous>, transform_indices = @transform_7, window_bounds = array<i64: 4, 1>}, {transform_indices = @transform_8, window_bounds = array<i64: 16, 512>}, {transform_indices = @transform_9, window_bounds = array<i64: 4, 512>}]} {
    %c0 = arith.constant 0 : index
    %c0_0 = arith.constant 0 : index
    %0 = vector.load %arg1[%c0, %c0_0] : memref<16x512xf32, #tpu.memory_space<vmem>>, vector<16x512xf32>
    %c0_1 = arith.constant 0 : index
    %c0_2 = arith.constant 0 : index
    %1 = vector.load %arg2[%c0_1, %c0_2] : memref<16x1xf32, #tpu.memory_space<vmem>>, vector<16x1xf32>
    %c0_3 = arith.constant 0 : index
    %c0_4 = arith.constant 0 : index
    %2 = vector.load %arg3[%c0_3, %c0_4] : memref<64x16xf32, #tpu.memory_space<vmem>>, vector<64x16xf32>
    %cst = arith.constant dense<0.000000e+00> : vector<64x512xf32>
    %3 = tpu.matmul %2, %0, %cst {dimension_numbers = #tpu.dot_dimension_numbers<[1], [0], [0], [1], [0, 0, 1, 1], [], []>, precision = #tpu.contract_precision<fp32>} : vector<64x16xf32>, vector<16x512xf32>, vector<64x512xf32> -> vector<64x512xf32>
    %c0_5 = arith.constant 0 : index
    %c0_6 = arith.constant 0 : index
    %4 = vector.load %arg4[%c0_5, %c0_6] : memref<64x1xf32, #tpu.memory_space<vmem>>, vector<64x1xf32>
    %5 = vector.broadcast %4 : vector<64x1xf32> to vector<64x512xf32>
    %6 = arith.addf %3, %5 : vector<64x512xf32>
    %cst_7 = arith.constant 0.000000e+00 : f32
    %7 = vector.broadcast %cst_7 : f32 to vector<64x512xf32>
    %8 = arith.cmpf ogt, %6, %7 : vector<64x512xf32>
    %cst_8 = arith.constant 0.000000e+00 : f32
    %9 = vector.broadcast %cst_8 : f32 to vector<64x512xf32>
    %10 = arith.minimumf %6, %9 : vector<64x512xf32>
    %11 = math.exp %10 : vector<64x512xf32>
    %cst_9 = arith.constant 1.000000e+00 : f32
    %12 = vector.broadcast %cst_9 : f32 to vector<64x512xf32>
    %13 = arith.subf %11, %12 : vector<64x512xf32>
    %14 = arith.select %8, %6, %13 : vector<64x512xi1>, vector<64x512xf32>
    %c0_10 = arith.constant 0 : index
    %c0_11 = arith.constant 0 : index
    %15 = vector.load %arg5[%c0_10, %c0_11] : memref<64x64xf32, #tpu.memory_space<vmem>>, vector<64x64xf32>
    %cst_12 = arith.constant dense<0.000000e+00> : vector<64x512xf32>
    %16 = tpu.matmul %15, %14, %cst_12 {dimension_numbers = #tpu.dot_dimension_numbers<[1], [0], [0], [1], [0, 0, 1, 1], [], []>, precision = #tpu.contract_precision<fp32>} : vector<64x64xf32>, vector<64x512xf32>, vector<64x512xf32> -> vector<64x512xf32>
    %c0_13 = arith.constant 0 : index
    %c0_14 = arith.constant 0 : index
    %17 = vector.load %arg6[%c0_13, %c0_14] : memref<64x1xf32, #tpu.memory_space<vmem>>, vector<64x1xf32>
    %18 = vector.broadcast %17 : vector<64x1xf32> to vector<64x512xf32>
    %19 = arith.addf %16, %18 : vector<64x512xf32>
    %cst_15 = arith.constant 0.000000e+00 : f32
    %20 = vector.broadcast %cst_15 : f32 to vector<64x512xf32>
    %21 = arith.cmpf ogt, %19, %20 : vector<64x512xf32>
    %cst_16 = arith.constant 0.000000e+00 : f32
    %22 = vector.broadcast %cst_16 : f32 to vector<64x512xf32>
    %23 = arith.minimumf %19, %22 : vector<64x512xf32>
    %24 = math.exp %23 : vector<64x512xf32>
    %cst_17 = arith.constant 1.000000e+00 : f32
    %25 = vector.broadcast %cst_17 : f32 to vector<64x512xf32>
    %26 = arith.subf %24, %25 : vector<64x512xf32>
    %27 = arith.select %21, %19, %26 : vector<64x512xi1>, vector<64x512xf32>
    %c0_18 = arith.constant 0 : index
    %c0_19 = arith.constant 0 : index
    %28 = vector.load %arg7[%c0_18, %c0_19] : memref<4x64xf32, #tpu.memory_space<vmem>>, vector<4x64xf32>
    %cst_20 = arith.constant dense<0.000000e+00> : vector<4x512xf32>
    %29 = tpu.matmul %28, %27, %cst_20 {dimension_numbers = #tpu.dot_dimension_numbers<[1], [0], [0], [1], [0, 0, 1, 1], [], []>, precision = #tpu.contract_precision<fp32>} : vector<4x64xf32>, vector<64x512xf32>, vector<4x512xf32> -> vector<4x512xf32>
    %c0_21 = arith.constant 0 : index
    %c0_22 = arith.constant 0 : index
    %30 = vector.load %arg8[%c0_21, %c0_22] : memref<4x1xf32, #tpu.memory_space<vmem>>, vector<4x1xf32>
    %31 = vector.broadcast %30 : vector<4x1xf32> to vector<4x512xf32>
    %32 = arith.addf %29, %31 : vector<4x512xf32>
    %33 = vector.extract_strided_slice %32 {offsets = [0, 0], sizes = [1, 512], strides = [1, 1]} : vector<4x512xf32> to vector<1x512xf32>
    %cst_23 = arith.constant 0.000000e+00 : f32
    %34 = vector.broadcast %cst_23 : f32 to vector<1x512xf32>
    %35 = arith.subf %34, %33 : vector<1x512xf32>
    %36 = math.exp %35 : vector<1x512xf32>
    %cst_24 = arith.constant 1.000000e+00 : f32
    %37 = vector.broadcast %cst_24 : f32 to vector<1x512xf32>
    %38 = arith.addf %37, %36 : vector<1x512xf32>
    %cst_25 = arith.constant 1.000000e+00 : f32
    %39 = vector.broadcast %cst_25 : f32 to vector<1x512xf32>
    %40 = arith.divf %39, %38 : vector<1x512xf32>
    %cst_26 = arith.constant 0.699999988 : f32
    %41 = vector.broadcast %cst_26 : f32 to vector<1x512xf32>
    %42 = arith.mulf %40, %41 : vector<1x512xf32>
    %cst_27 = arith.constant 0.000000e+00 : f32
    %43 = vector.broadcast %cst_27 : f32 to vector<1x512xf32>
    %44 = arith.addf %43, %42 : vector<1x512xf32>
    %45 = vector.extract_strided_slice %32 {offsets = [1, 0], sizes = [1, 512], strides = [1, 1]} : vector<4x512xf32> to vector<1x512xf32>
    %cst_28 = arith.constant 0.000000e+00 : f32
    %46 = vector.broadcast %cst_28 : f32 to vector<1x512xf32>
    %47 = arith.subf %46, %45 : vector<1x512xf32>
    %48 = math.exp %47 : vector<1x512xf32>
    %cst_29 = arith.constant 1.000000e+00 : f32
    %49 = vector.broadcast %cst_29 : f32 to vector<1x512xf32>
    %50 = arith.addf %49, %48 : vector<1x512xf32>
    %cst_30 = arith.constant 1.000000e+00 : f32
    %51 = vector.broadcast %cst_30 : f32 to vector<1x512xf32>
    %52 = arith.divf %51, %50 : vector<1x512xf32>
    %cst_31 = arith.constant 1.950000e-01 : f32
    %53 = vector.broadcast %cst_31 : f32 to vector<1x512xf32>
    %54 = arith.mulf %52, %53 : vector<1x512xf32>
    %cst_32 = arith.constant 5.000000e-03 : f32
    %55 = vector.broadcast %cst_32 : f32 to vector<1x512xf32>
    %56 = arith.addf %55, %54 : vector<1x512xf32>
    %57 = vector.extract_strided_slice %32 {offsets = [2, 0], sizes = [1, 512], strides = [1, 1]} : vector<4x512xf32> to vector<1x512xf32>
    %cst_33 = arith.constant 0.000000e+00 : f32
    %58 = vector.broadcast %cst_33 : f32 to vector<1x512xf32>
    %59 = arith.subf %58, %57 : vector<1x512xf32>
    %60 = math.exp %59 : vector<1x512xf32>
    %cst_34 = arith.constant 1.000000e+00 : f32
    %61 = vector.broadcast %cst_34 : f32 to vector<1x512xf32>
    %62 = arith.addf %61, %60 : vector<1x512xf32>
    %cst_35 = arith.constant 1.000000e+00 : f32
    %63 = vector.broadcast %cst_35 : f32 to vector<1x512xf32>
    %64 = arith.divf %63, %62 : vector<1x512xf32>
    %cst_36 = arith.constant 5.000000e-03 : f32
    %65 = vector.broadcast %cst_36 : f32 to vector<1x512xf32>
    %66 = arith.mulf %64, %65 : vector<1x512xf32>
    %cst_37 = arith.constant 0.000000e+00 : f32
    %67 = vector.broadcast %cst_37 : f32 to vector<1x512xf32>
    %68 = arith.addf %67, %66 : vector<1x512xf32>
    %69 = vector.extract_strided_slice %32 {offsets = [3, 0], sizes = [1, 512], strides = [1, 1]} : vector<4x512xf32> to vector<1x512xf32>
    %cst_38 = arith.constant 0.000000e+00 : f32
    %70 = vector.broadcast %cst_38 : f32 to vector<1x512xf32>
    %71 = arith.subf %70, %69 : vector<1x512xf32>
    %72 = math.exp %71 : vector<1x512xf32>
    %cst_39 = arith.constant 1.000000e+00 : f32
    %73 = vector.broadcast %cst_39 : f32 to vector<1x512xf32>
    %74 = arith.addf %73, %72 : vector<1x512xf32>
    %cst_40 = arith.constant 1.000000e+00 : f32
    %75 = vector.broadcast %cst_40 : f32 to vector<1x512xf32>
    %76 = arith.divf %75, %74 : vector<1x512xf32>
    %cst_41 = arith.constant 2.000000e+00 : f32
    %77 = vector.broadcast %cst_41 : f32 to vector<1x512xf32>
    %78 = arith.mulf %76, %77 : vector<1x512xf32>
    %cst_42 = arith.constant 0.000000e+00 : f32
    %79 = vector.broadcast %cst_42 : f32 to vector<1x512xf32>
    %80 = arith.addf %79, %78 : vector<1x512xf32>
    %cst_43 = arith.constant 0.000000e+00 : f32
    %81 = vector.broadcast %cst_43 : f32 to vector<16x1xf32>
    %82 = arith.subf %81, %1 : vector<16x1xf32>
    %83 = vector.broadcast %82 : vector<16x1xf32> to vector<16x512xf32>
    %84 = vector.broadcast %56 : vector<1x512xf32> to vector<16x512xf32>
    %85 = arith.mulf %83, %84 : vector<16x512xf32>
    %86 = math.exp %85 : vector<16x512xf32>
    %87 = vector.broadcast %44 : vector<1x512xf32> to vector<16x512xf32>
    %88 = arith.mulf %87, %86 : vector<16x512xf32>
    %cst_44 = arith.constant 0.000000e+00 : f32
    %89 = vector.broadcast %cst_44 : f32 to vector<16x1xf32>
    %90 = arith.subf %89, %1 : vector<16x1xf32>
    %91 = vector.broadcast %90 : vector<16x1xf32> to vector<16x512xf32>
    %92 = vector.broadcast %68 : vector<1x512xf32> to vector<16x512xf32>
    %93 = arith.mulf %91, %92 : vector<16x512xf32>
    %94 = math.exp %93 : vector<16x512xf32>
    %95 = vector.broadcast %80 : vector<1x512xf32> to vector<16x512xf32>
    %96 = arith.mulf %95, %94 : vector<16x512xf32>
    %97 = arith.addf %88, %96 : vector<16x512xf32>
    %c0_45 = arith.constant 0 : index
    %c0_46 = arith.constant 0 : index
    %98 = vector.load %arg9[%c0_45, %c0_46] : memref<16x512xf32, #tpu.memory_space<vmem>>, vector<16x512xf32>
    tpu.vector_store %arg9[%c0_45, %c0_46], %97 {strides = array<i32>} : memref<16x512xf32, #tpu.memory_space<vmem>>, vector<16x512xf32>,
    %99 = arith.addf %80, %44 : vector<1x512xf32>
    %100 = arith.divf %44, %99 : vector<1x512xf32>
    %101 = tpu.concatenate %68, %100, %56, %99 in 0 : vector<1x512xf32>, vector<1x512xf32>, vector<1x512xf32>, vector<1x512xf32> -> vector<4x512xf32>
    %c0_47 = arith.constant 0 : index
    %c0_48 = arith.constant 0 : index
    %102 = vector.load %arg10[%c0_47, %c0_48] : memref<4x512xf32, #tpu.memory_space<vmem>>, vector<4x512xf32>
    tpu.vector_store %arg10[%c0_47, %c0_48], %101 {strides = array<i32>} : memref<4x512xf32, #tpu.memory_space<vmem>>, vector<4x512xf32>,
    return
  }
  func.func @transform_0(%arg0: i32) -> (i32, i32) {
    %c0_i32 = arith.constant 0 : i32
    %c0_i32_0 = arith.constant 0 : i32
    return %c0_i32, %arg0 : i32, i32
  }
  func.func @transform_1(%arg0: i32) -> (i32, i32) {
    %c0_i32 = arith.constant 0 : i32
    %c0_i32_0 = arith.constant 0 : i32
    %c0_i32_1 = arith.constant 0 : i32
    return %c0_i32, %c0_i32_0 : i32, i32
  }
  func.func @transform_2(%arg0: i32) -> (i32, i32) {
    %c0_i32 = arith.constant 0 : i32
    %c0_i32_0 = arith.constant 0 : i32
    %c0_i32_1 = arith.constant 0 : i32
    return %c0_i32, %c0_i32_0 : i32, i32
  }
  func.func @transform_3(%arg0: i32) -> (i32, i32) {
    %c0_i32 = arith.constant 0 : i32
    %c0_i32_0 = arith.constant 0 : i32
    %c0_i32_1 = arith.constant 0 : i32
    return %c0_i32, %c0_i32_0 : i32, i32
  }
  func.func @transform_4(%arg0: i32) -> (i32, i32) {
    %c0_i32 = arith.constant 0 : i32
    %c0_i32_0 = arith.constant 0 : i32
    %c0_i32_1 = arith.constant 0 : i32
    return %c0_i32, %c0_i32_0 : i32, i32
  }
  func.func @transform_5(%arg0: i32) -> (i32, i32) {
    %c0_i32 = arith.constant 0 : i32
    %c0_i32_0 = arith.constant 0 : i32
    %c0_i32_1 = arith.constant 0 : i32
    return %c0_i32, %c0_i32_0 : i32, i32
  }
  func.func @transform_6(%arg0: i32) -> (i32, i32) {
    %c0_i32 = arith.constant 0 : i32
    %c0_i32_0 = arith.constant 0 : i32
    %c0_i32_1 = arith.constant 0 : i32
    return %c0_i32, %c0_i32_0 : i32, i32
  }
  func.func @transform_7(%arg0: i32) -> (i32, i32) {
    %c0_i32 = arith.constant 0 : i32
    %c0_i32_0 = arith.constant 0 : i32
    %c0_i32_1 = arith.constant 0 : i32
    return %c0_i32, %c0_i32_0 : i32, i32
  }
  func.func @transform_8(%arg0: i32) -> (i32, i32) {
    %c0_i32 = arith.constant 0 : i32
    %c0_i32_0 = arith.constant 0 : i32
    return %c0_i32, %arg0 : i32, i32
  }
  func.func @transform_9(%arg0: i32) -> (i32, i32) {
    %c0_i32 = arith.constant 0 : i32
    %c0_i32_0 = arith.constant 0 : i32
    return %c0_i32, %arg0 : i32, i32
  }
}

</mosaic_0001>

<bundles_post_ra>
// kernel: tpu_custom_call.1
= control target key start
LH: loop header
LB: loop body
LE: loop exit
PB: predicated region body
PF: predicated region fallthrough
CT: control target
= control target key end

     0   :  { %15 = vsyncpa [#allocation4], 0  ;;  %s10556_s0 = inlined_call_operand.vmem [shape: f32[16,1024], index: 0, kind: input, shape index: {}]   ;;  %s10557_s1 = inlined_call_operand.vmem [shape: f32[16,1], index: 1, kind: input, shape index: {}]   ;;  %s10558_s2 = inlined_call_operand.vmem [shape: f32[64,16], index: 2, kind: input, shape index: {}]   ;;  %s10559_s3 = inlined_call_operand.vmem [shape: f32[64,1], index: 3, kind: input, shape index: {}]   ;;  %s10560_s4 = inlined_call_operand.vmem [shape: f32[64,64], index: 4, kind: input, shape index: {}]   ;;  %s10561_s5 = inlined_call_operand.vmem [shape: f32[64,1], index: 5, kind: input, shape index: {}]   ;;  %s10562_s6 = inlined_call_operand.vmem [shape: f32[4,64], index: 6, kind: input, shape index: {}]   ;;  %s10563_s7 = inlined_call_operand.vmem [shape: f32[4,1], index: 7, kind: input, shape index: {}]   ;;  %s10564_s8 = inlined_call_operand.hbm [shape: f32[16,1024], index: 8, kind: output, shape index: {0}]   ;;  %s10565_s9 = inlined_call_operand.hbm [shape: f32[4,1024], index: 9, kind: output, shape index: {1}]  }
   0x1   :  { %17 = vsyncpa [#allocation4 + $0x1], 0 }
   0x2   :  { %18 = vsyncpa [#allocation6], 0 }
   0x3   :  { %20 = vsyncpa [#allocation6 + $0x1], 0  ;;  %s7642_s30 = smov 0   ;;  %s7644_s10 = smov 0  }
   0x4   :  { %s7646_s11 = smov 0   ;;  %s7648_s12 = smov 0  }
   0x5 LB: > { %s7663_s13 = sadd.s32 4294967295, %s7583_s12   ;;  %s6329_s14 = sadd.s32 4294967294, %s7583_s12   ;;  %s7583_s12 = sphi %s7648_s12, %s11077_s12   ;;  %s7579_s11 = sphi %s7646_s11, %s11076_s11   ;;  %s7575_s10 = sphi %s7644_s10, %s11075_s10   ;;  %s7571_s30 = sphi %s7642_s30, %s11074_s30  }
   0x6   : > { %s7667_s15 = sadd.s32 1, %s7583_s12   ;;  %s33_s16 = sadd.s32 1, %s7579_s11 }
   0x7   : > { %s30_s17 = ssub.s32 %s7583_s12, %s7667_s15  ;;  %p40_p0 = scmp.ne.s32.totalorder %s7579_s11, %s7575_s10 }
   0x8   : > { %p31_p1 = scmp.eq.s32.totalorder %s30_s17, 0  ;;  %p41_p2 = scmp.eq.s32.totalorder %s7583_s12, 0 }
   0x9   : > { %p217_p3 = scmp.eq.s32.totalorder %s7663_s13, 1  ;;  %p222_p4 = scmp.ne.s32.totalorder %s7575_s10, %s7571_s30 }
   0xa   : > { %s7679_s18 = scalar_select %p31_p1, %s7579_s11, %s33_s16  }
   0xb   : > { %p42_p5 = por %p41_p2, %p40_p0  ;;  %p7681_p6 = por %p217_p3, %p40_p0 }
   0xc   : > { %p223_p7 = scmp.eq.s32.totalorder %s6329_s14, 1  ;;  %p6331_p9 = scmp.ge.s32.totalorder %s7583_s12, 2 }
   0xe   : > { %p7685_p8 = por %p223_p7, %p222_p4  ;;  %286 = sbr.rel (%p6331_p9) target bundleno = 29 (0x1d), region = 44 }
  0x15   : > { %289 = sbr.rel (!%p42_p5) target bundleno = 29 (0x1d), region = 48  ;;  %s291_s21 = sand.u32 (%p42_p5), 1, %s7579_s11  }
  0x16   : > { %s6411_s22 = sshll.u32 (%p42_p5), %s7583_s12, 5  ;;  %s6332_s23 = sshll.u32 (%p42_p5), %s291_s21, 6 }
  0x17   : > { %s296_s26 = scalar_lea.vmem (%p42_p5), %s10556_s0, %s6411_s22  ;;  %s293_s27 = scalar_lea.vmem (%p42_p5), [#allocation2], %s6332_s23 }
  0x18   : > { %v309_v0 = vld [vmem:[%s296_s26] sm:$0xff] (%p42_p5)  ;;  %v311_v1 = vld [vmem:[%s296_s26 + $0x8] sm:$0xff] (%p42_p5)  ;;  %v313_v2 = vld [vmem:[%s296_s26 + $0x10] sm:$0xff] (%p42_p5) }
  0x19   : > { %310 = vst [vmem:[%s293_s27] sm:$0xff] (%p42_p5), %v309_v0  ;;  %312 = vst [vmem:[%s293_s27 + $0x8] sm:$0xff] (%p42_p5), %v311_v1  ;;  %v315_v3 = vld [vmem:[%s296_s26 + $0x18] sm:$0xff] (%p42_p5)  ;;  %v317_v4 = vld [vmem:[%s296_s26 + $0x40] sm:$0xff] (%p42_p5) }
  0x1a   : > { %314 = vst [vmem:[%s293_s27 + $0x10] sm:$0xff] (%p42_p5), %v313_v2  ;;  %v319_v5 = vld [vmem:[%s296_s26 + $0x48] sm:$0xff] (%p42_p5)  ;;  %316 = vst [vmem:[%s293_s27 + $0x18] sm:$0xff] (%p42_p5), %v315_v3  ;;  %v321_v6 = vld [vmem:[%s296_s26 + $0x50] sm:$0xff] (%p42_p5) }
  0x1b   : > { %318 = vst [vmem:[%s293_s27 + $0x20] sm:$0xff] (%p42_p5), %v317_v4  ;;  %320 = vst [vmem:[%s293_s27 + $0x28] sm:$0xff] (%p42_p5), %v319_v5  ;;  %v323_v7 = vld [vmem:[%s296_s26 + $0x58] sm:$0xff] (%p42_p5) }
  0x1c   : > { %322 = vst [vmem:[%s293_s27 + $0x30] sm:$0xff] %v321_v6  ;;  %324 = vst [vmem:[%s293_s27 + $0x38] sm:$0xff] %v323_v7 }
  0x1d PF: > { %p6335_p10 = scmp.ge.s32.totalorder %s7583_s12, 1  ;;  %p329_p11 = scmp.lt.s32.totalorder %s7583_s12, 3 }
  0x1f   : > { %p330_p12 = pnand %p6335_p10, %p329_p11 }
  0x21   : > { %333 = sbr.rel (%p330_p12) target bundleno = 1410 (0x582), region = 71 }
  0x28   : > { %s7700_s28 = sand.u32 1, %s7575_s10   ;;  %v389_v8 = vld [vmem:[%s10558_s2] sm:$0xff]  ;;  %vm445_vm0 = vcmask 130048   ;;  %v390_v9 = vld [vmem:[%s10558_s2 + $0x8] sm:$0xff]  ;;  %v391_v10 = vld [vmem:[%s10558_s2 + $0x10] sm:$0xff]  ;;  %v10566_v11 = vmov 0.0  }
  0x29   : > { %s6336_s23 = sshll.u32 %s7700_s28, 6  ;;  %538 = vmatprep.mubr.f32.mxu0 %v10566_v11  ;;  %1372 = vmatprep.mubr.f32.mxu1 %v10566_v11  ;;  %v447_v12 = vsel %vm445_vm0, %v389_v8, 0  ;;  %v450_v13 = vsel %vm445_vm0, %v390_v9, 0  ;;  %v7717_v14 = vsel %vm445_vm0, %v391_v10, 0  ;;  %v392_v15 = vld [vmem:[%s10558_s2 + $0x18] sm:$0xff]  ;;  %v393_v9 = vld [vmem:[%s10558_s2 + $0x20] sm:$0xff] }
  0x2a   : > { %v7722_v16 = vand.u32 4294901760, %v447_v12  ;;  %v7724_v17 = vand.u32 4294901760, %v450_v13  ;;  %v7727_v18 = vsel %vm445_vm0, %v392_v15, 0  ;;  %s338_s26 = scalar_lea.vmem [#allocation2], %s6336_s23  ;;  %v7732_v22 = vand.u32 4294901760, %v7717_v14  ;;  %s10422_s17 = scalar_lea.vmem [#allocation3], %s6336_s23 }
  0x2b   : > { %v380_v19 = vld [vmem:[%s338_s26 + $0x8] sm:$0xff]  ;;  %v382_v21 = vld [vmem:[%s338_s26 + $0x18] sm:$0xff]  ;;  %v7735_v23 = vand.u32 4294901760, %v7727_v18  ;;  %v379_v28 = vld [vmem:[%s338_s26] sm:$0xff]  ;;  %vm2386_vm1 = vcmask 523264   ;;  %s6215_s23 = sshll.u32 %s10422_s17, 4  ;;  %s10444_s23 = int_to_ptr.vmem [resolvable:$true] %s6215_s23 }
  0x2c   : > { %v384_v20 = vld [vmem:[%s338_s26 + $0x28] sm:$0xff]  ;;  %v470_v24 = vand.u32 4294901760, %v380_v19  ;;  %v386_v26 = vld [vmem:[%s338_s26 + $0x38] sm:$0xff]  ;;  %v1304_v27 = vand.u32 4294901760, %v382_v21  ;;  %v383_v29 = vld [vmem:[%s338_s26 + $0x20] sm:$0xff]  ;;  %v7738_v30 = vsub.f32 %v447_v12, %v7722_v16  ;;  %v472_v32 = vand.u32 4294901760, %v379_v28 }
  0x2d   : > { %v474_v25 = vand.u32 4294901760, %v384_v20  ;;  %v1308_v31 = vand.u32 4294901760, %v386_v26  ;;  %v476_v33 = vand.u32 4294901760, %v383_v29  ;;  %v381_v34 = vld [vmem:[%s338_s26 + $0x10] sm:$0xff]  ;;  %v7741_v36 = vsub.f32 %v450_v13, %v7724_v17  ;;  %s6412_s21 = sshll.u32 %s7663_s13, 9  ;;  %s7489_s29 = scalar_lea.vmem %s10444_s23, 1024 }
  0x2e   : > { %v385_v35 = vld [vmem:[%s338_s26 + $0x30] sm:$0xff]  ;;  %v7745_v38 = vsub.f32 %v380_v19, %v470_v24  ;;  %v7749_v40 = vsub.f32 %v382_v21, %v1304_v27  ;;  %v7757_v44 = vsub.f32 %v379_v28, %v472_v32  ;;  %v1306_v46 = vand.u32 4294901760, %v381_v34  ;;  %s10449_s25 = scalar_lea.hbm %s10564_s8, %s6412_s21  ;;  %p7490_p13 = scmp.ne.s32.totalorder %s10444_s23, %s7489_s29 }
  0x2f   : > { %v7743_v37 = vpack.c.bf16 %v474_v25, %v470_v24  ;;  %v7747_v39 = vsub.f32 %v384_v20, %v474_v25  ;;  %v7751_v41 = vpack.c.bf16 %v1308_v31, %v1304_v27  ;;  %v7753_v42 = vsub.f32 %v386_v26, %v1308_v31  ;;  %v394_v25 = vld [vmem:[%s10558_s2 + $0x28] sm:$0xff]  ;;  %v395_v28 = vld [vmem:[%s10558_s2 + $0x30] sm:$0xff]  ;;  %s7587_s14 = smov [#allocation3]  }
  0x30   : > { %v7755_v43 = vpack.c.bf16 %v476_v33, %v472_v32  ;;  %v7760_v45 = vsub.f32 %v383_v29, %v476_v33  ;;  %v1310_v47 = vand.u32 4294901760, %v385_v35  ;;  %v7763_v48 = vand.u32 4294901760, %v7738_v30  ;;  %v396_v29 = vld [vmem:[%s10558_s2 + $0x38] sm:$0xff]  ;;  %p7491_p0 = pnand %p7490_p13, %p7681_p6  ;;  %s7493_s16 = sshll.u32 %s7587_s14, 4  ;;  %s7494_s16 = int_to_ptr.vmem [resolvable:$false] %s7493_s16 }
  0x31   : > { %6415 = vmatprep.subr.bf16.mxu0 %v7743_v37  ;;  %6439 = vmatprep.subr.bf16.mxu1 %v7751_v41  ;;  %v7768_v49 = vand.u32 4294901760, %v7741_v36  ;;  %v629_v50 = vand.u32 4294901760, %v7745_v38  ;;  %v641_v51 = vand.u32 4294901760, %v7747_v39  ;;  %v1463_v52 = vand.u32 4294901760, %v7749_v40  ;;  %s7495_s21 = scalar_lea.vmem %s7494_s16, 2048  ;;  %p7496_p2 = scmp.lt.s32.totalorder %s10444_s23, %s7494_s16 }
  0x32   : > { %6417 = vmatpush1.bf16.msra.mxu0 %v7755_v43  ;;  %v7773_v53 = vpack.c.bf16 %v1310_v47, %v1306_v46  ;;  %v7775_v54 = vsub.f32 %v381_v34, %v1306_v46  ;;  %v7777_v55 = vsub.f32 %v385_v35, %v1310_v47  ;;  %v542_v56 = vsub.f32 %v7738_v30, %v7763_v48  ;;  %p7492_p1 = pneg %p7491_p0  ;;  %p7497_p3 = scmp.lt.s32.totalorder %s7495_s21, %s7489_s29 }
  0x33   : > { %v553_v57 = vsub.f32 %v7741_v36, %v7768_v49  ;;  %v630_v58 = vsub.f32 %v7745_v38, %v629_v50  ;;  %v642_v59 = vsub.f32 %v7747_v39, %v641_v51  ;;  %v1464_v60 = vsub.f32 %v7749_v40, %v1463_v52 }
  0x34   : > { %6441 = vmatpush1.bf16.msra.mxu1 %v7773_v53  ;;  %v543_v61 = vand.u32 4294901760, %v542_v56  ;;  %v1475_v62 = vand.u32 4294901760, %v7753_v42  ;;  %v635_v63 = vand.u32 4294901760, %v7757_v44  ;;  %v647_v0 = vand.u32 4294901760, %v7760_v45  ;;  %p7498_p4 = por %p7497_p3, %p7496_p2 }
  0x35   : > { %v554_v1 = vand.u32 4294901760, %v553_v57  ;;  %v631_v2 = vand.u32 4294901760, %v630_v58  ;;  %v643_v3 = vand.u32 4294901760, %v642_v59  ;;  %v1465_v4 = vand.u32 4294901760, %v1464_v60 }
  0x36   : > { %544 = vmatmul.mubr.f32.vlgmr.msra.gmra.mrb[0].mxu0 %v543_v61  ;;  %v1476_v5 = vsub.f32 %v7753_v42, %v1475_v62  ;;  %v636_v6 = vsub.f32 %v7757_v44, %v635_v63  ;;  %v648_v7 = vsub.f32 %v7760_v45, %v647_v0  ;;  %v1469_v8 = vand.u32 4294901760, %v7775_v54  ;;  %p7499_p5 = pnand %p7498_p4, %p7492_p1 }
  0x37   : > { %1378 = vmatmul.mubr.f32.vlgmr.msra.gmra.mrb[0].mxu1 %v543_v61  ;;  %549 = vmatprep.mubr.f32.mxu0 %v10566_v11  ;;  %v6418_v10 = vpack.c.bf16 %v643_v3, %v631_v2  ;;  %v1481_v12 = vand.u32 4294901760, %v7777_v55  ;;  %v7813_v13 = vsub.f32 %v7717_v14, %v7732_v22  ;;  %v7817_v15 = vsub.f32 %v7727_v18, %v7735_v23 }
  0x38   : > { %1383 = vmatprep.mubr.f32.mxu1 %v10566_v11  ;;  %v1477_v19 = vand.u32 4294901760, %v1476_v5  ;;  %v637_v20 = vand.u32 4294901760, %v636_v6  ;;  %v649_v21 = vand.u32 4294901760, %v648_v7  ;;  %v1470_v24 = vsub.f32 %v7775_v54, %v1469_v8 }
  0x39   : > { %6419 = vmatprep.subr.bf16.mxu0 %v6418_v10  ;;  %v1482_v26 = vsub.f32 %v7777_v55, %v1481_v12  ;;  %v7826_v14 = vand.u32 4294901760, %v7813_v13  ;;  %v7829_v18 = vand.u32 4294901760, %v7817_v15  ;;  %v459_v27 = vsel %vm445_vm0, %v393_v9, 0 }
  0x3a   : > { %555 = vmatmul.mubr.f32.gmra.mrb[2].mxu0 %v554_v1  ;;  %v6442_v31 = vpack.c.bf16 %v1477_v19, %v1465_v4  ;;  %v6420_v32 = vpack.c.bf16 %v649_v21, %v637_v20  ;;  %v1471_v33 = vand.u32 4294901760, %v1470_v24  ;;  %v7838_v34 = vand.u32 4294901760, %v459_v27 }
  0x3b   : > { %1389 = vmatmul.mubr.f32.gmra.mrb[2].mxu1 %v554_v1  ;;  %v1483_v35 = vand.u32 4294901760, %v1482_v26  ;;  %560 = vmatprep.mubr.f32.mxu0 %v10566_v11  ;;  %v564_v46 = vsub.f32 %v7813_v13, %v7826_v14  ;;  %v575_v47 = vsub.f32 %v7817_v15, %v7829_v18  ;;  %v462_v56 = vsel %vm445_vm0, %v394_v25, 0 }
  0x3c   : > { %6443 = vmatprep.subr.bf16.mxu1 %v6442_v31  ;;  %6421 = vmatpush1.bf16.msra.mxu0 %v6420_v32  ;;  %v7847_v57 = vsub.f32 %v459_v27, %v7838_v34  ;;  %v7849_v58 = vand.u32 4294901760, %v462_v56  ;;  %v465_v59 = vsel %vm445_vm0, %v395_v28, 0  ;;  %v468_v60 = vsel %vm445_vm0, %v396_v29, 0  ;;  %v401_v27 = vld [vmem:[%s10559_s3 + $0x20] sm:$0xff]  ;;  %v402_v28 = vld [vmem:[%s10559_s3 + $0x28] sm:$0xff]  ;;  %v404_v29 = vld [vmem:[%s10559_s3 + $0x38] sm:$0xff] }
  0x3d   : > { %v6444_v61 = vpack.c.bf16 %v1483_v35, %v1471_v33  ;;  %1394 = vmatprep.mubr.f32.mxu1 %v10566_v11  ;;  %v565_v1 = vand.u32 4294901760, %v564_v46  ;;  %v7854_v2 = vand.u32 4294901760, %v465_v59  ;;  %v6422_v5 = vpack.c.bf16 %v7747_v39, %v7745_v38  ;;  %v2339_v31 = vld [vmem:[%s10561_s5 + $0x8] sm:$0xff]  ;;  %v2341_v32 = vld [vmem:[%s10561_s5 + $0x18] sm:$0xff]  ;;  %v2342_v33 = vld [vmem:[%s10561_s5 + $0x20] sm:$0xff] }
  0x3e   : > { %v7857_v3 = vand.u32 4294901760, %v7847_v57  ;;  %v7860_v4 = vsub.f32 %v462_v56, %v7849_v58  ;;  %v576_v6 = vand.u32 4294901760, %v575_v47  ;;  %v7867_v9 = vand.u32 4294901760, %v468_v60  ;;  %v2343_v35 = vld [vmem:[%s10561_s5 + $0x28] sm:$0xff]  ;;  %v2344_v46 = vld [vmem:[%s10561_s5 + $0x30] sm:$0xff]  ;;  %v2345_v47 = vld [vmem:[%s10561_s5 + $0x38] sm:$0xff] }
  0x3f   : > { %6445 = vmatpush1.bf16.msra.mxu1 %v6444_v61  ;;  %566 = vmatmul.mubr.f32.gmra.mrb[4].mxu0 %v565_v1  ;;  %v7865_v7 = vsub.f32 %v465_v59, %v7854_v2  ;;  %v6446_v10 = vpack.c.bf16 %v7753_v42, %v7749_v40  ;;  %v7882_v21 = vpack.c.bf16 %v641_v51, %v629_v50  ;;  %v387_v56 = vld [vmem:[%s10557_s1] sm:$0xff]  ;;  %v388_v59 = vld [vmem:[%s10557_s1 + $0x8] sm:$0xff] }
  0x40   : > { %1400 = vmatmul.mubr.f32.gmra.mrb[4].mxu1 %v565_v1  ;;  %571 = vmatprep.mubr.f32.mxu0 %v10566_v11  ;;  %v586_v19 = vsub.f32 %v7847_v57, %v7857_v3  ;;  %v7875_v20 = vand.u32 4294901760, %v7860_v4  ;;  %v7888_v24 = vpack.c.bf16 %v1475_v62, %v1463_v52  ;;  %v7894_v25 = vpack.c.bf16 %v647_v0, %v635_v63 }
  0x41   : > { %1405 = vmatprep.mubr.f32.mxu1 %v10566_v11  ;;  %6423 = vmatprep.subr.bf16.mxu0 %v6422_v5  ;;  %v7896_v26 = vpack.c.bf16 %v1481_v12, %v1469_v8  ;;  %v7901_v40 = vand.u32 4294901760, %v7865_v7  ;;  %v7904_v42 = vsub.f32 %v468_v60, %v7867_v9  ;;  %v6424_v8 = vpack.c.bf16 %v7760_v45, %v7757_v44  ;;  %v397_v44 = vld [vmem:[%s10559_s3] sm:$0xff]  ;;  %v2335_v5 = vld [vmem:[%s10560_s4 + $0x28] sm:$0xff] }
  0x42   : > { %6447 = vmatprep.subr.bf16.mxu1 %v6446_v10  ;;  %v587_v38 = vand.u32 4294901760, %v586_v19  ;;  %v597_v39 = vsub.f32 %v7860_v4, %v7875_v20  ;;  %v6448_v12 = vpack.c.bf16 %v7777_v55, %v7775_v54  ;;  %v7586_v45 = vmov 0   ;;  %v399_v54 = vld [vmem:[%s10559_s3 + $0x10] sm:$0xff]  ;;  %v398_v55 = vld [vmem:[%s10559_s3 + $0x8] sm:$0xff] }
  0x43   : > { %577 = vmatmul.mubr.f32.gmra.mrb[6].mxu0 %v576_v6  ;;  %v608_v51 = vsub.f32 %v7865_v7, %v7901_v40  ;;  %v7911_v52 = vand.u32 4294901760, %v7904_v42  ;;  %7303 = vset.pattern.permute.xlu0 %v7586_v45  ;;  %v5943_v60 = vsub.f32 0.0, %v387_v56 }
  0x44   : > { %1411 = vmatmul.mubr.f32.gmra.mrb[6].mxu1 %v576_v6  ;;  %582 = vmatprep.mubr.f32.mxu0 %v10566_v11  ;;  %v598_v50 = vand.u32 4294901760, %v597_v39 }
  0x45   : > { %1416 = vmatprep.mubr.f32.mxu1 %v10566_v11  ;;  %v609_v62 = vand.u32 4294901760, %v608_v51  ;;  %v619_v63 = vsub.f32 %v7904_v42, %v7911_v52  ;;  %407 = vperm.xlu0 %7303, %v397_v44  }
  0x46   : > { %7304 = vset.pattern.permute.xlu1 %v7586_v45 }
  0x47   : > { %588 = vmatmul.mubr.f32.gmra.mrb[8].mxu0 %v587_v38  ;;  %v620_v0 = vand.u32 4294901760, %v619_v63  ;;  %417 = vperm.xlu1 %7304, %v399_v54  }
  0x48   : > { %1422 = vmatmul.mubr.f32.gmra.mrb[8].mxu1 %v587_v38  ;;  %593 = vmatprep.mubr.f32.mxu0 %v10566_v11 }
  0x49   : > { %1427 = vmatprep.mubr.f32.mxu1 %v10566_v11  ;;  %412 = vperm.xlu0 %7303, %v398_v55  }
  0x4b   : > { %599 = vmatmul.mubr.f32.gmra.mrb[10].mxu0 %v598_v50 }
  0x4c   : > { %1433 = vmatmul.mubr.f32.gmra.mrb[10].mxu1 %v598_v50  ;;  %604 = vmatprep.mubr.f32.mxu0 %v10566_v11 }
  0x4d   : > { %1438 = vmatprep.mubr.f32.mxu1 %v10566_v11  ;;  %427 = vperm.xlu0 %7303, %v401_v27  }
  0x4f   : > { %610 = vmatmul.mubr.f32.gmra.mrb[12].mxu0 %v609_v62 }
  0x50   : > { %1444 = vmatmul.mubr.f32.gmra.mrb[12].mxu1 %v609_v62  ;;  %615 = vmatprep.mubr.f32.mxu0 %v10566_v11 }
  0x51   : > { %1449 = vmatprep.mubr.f32.mxu1 %v10566_v11 }
  0x53   : > { %621 = vmatmul.mubr.f32.gmra.mrb[14].mxu0 %v620_v0 }
  0x54   : > { %1455 = vmatmul.mubr.f32.gmra.mrb[14].mxu1 %v620_v0  ;;  %711 = vmatprep.mubr.f32.mxu0 %v10566_v11 }
  0x55   : > { %1545 = vmatprep.mubr.f32.mxu1 %v10566_v11 }
  0x57   : > { %713 = vmatmul.mubr.f32.vlgmr.msra.gmra.mrb[0].mxu0 %v7722_v16 }
  0x58   : > { %1547 = vmatmul.mubr.f32.vlgmr.msra.gmra.mrb[0].mxu1 %v7722_v16  ;;  %718 = vmatprep.mubr.f32.mxu0 %v10566_v11 }
  0x59   : > { %1552 = vmatprep.mubr.f32.mxu1 %v10566_v11  ;;  %6425 = vmatpush1.bf16.msra.mxu0 %v6424_v8 }
  0x5a   : > { %6449 = vmatpush1.bf16.msra.mxu1 %v6448_v12  ;;  %6427 = vmatprep.subr.bf16.mxu0 %v7743_v37 }
  0x5b   : > { %720 = vmatmul.mubr.f32.gmra.mrb[2].mxu0 %v7724_v17  ;;  %6451 = vmatprep.subr.bf16.mxu1 %v7751_v41 }
  0x5c   : > { %1554 = vmatmul.mubr.f32.gmra.mrb[2].mxu1 %v7724_v17  ;;  %725 = vmatprep.mubr.f32.mxu0 %v10566_v11 }
  0x5d   : > { %1559 = vmatprep.mubr.f32.mxu1 %v10566_v11 }
  0x5f   : > { %727 = vmatmul.mubr.f32.gmra.mrb[4].mxu0 %v7732_v22 }
  0x60   : > { %1561 = vmatmul.mubr.f32.gmra.mrb[4].mxu1 %v7732_v22  ;;  %732 = vmatprep.mubr.f32.mxu0 %v10566_v11 }
  0x61   : > { %1566 = vmatprep.mubr.f32.mxu1 %v10566_v11 }
  0x63   : > { %734 = vmatmul.mubr.f32.gmra.mrb[6].mxu0 %v7735_v23 }
  0x64   : > { %1568 = vmatmul.mubr.f32.gmra.mrb[6].mxu1 %v7735_v23  ;;  %739 = vmatprep.mubr.f32.mxu0 %v10566_v11 }
  0x65   : > { %1573 = vmatprep.mubr.f32.mxu1 %v10566_v11 }
  0x67   : > { %741 = vmatmul.mubr.f32.gmra.mrb[8].mxu0 %v7838_v34 }
  0x68   : > { %1575 = vmatmul.mubr.f32.gmra.mrb[8].mxu1 %v7838_v34  ;;  %746 = vmatprep.mubr.f32.mxu0 %v10566_v11 }
  0x69   : > { %1580 = vmatprep.mubr.f32.mxu1 %v10566_v11 }
  0x6b   : > { %748 = vmatmul.mubr.f32.gmra.mrb[10].mxu0 %v7849_v58 }
  0x6c   : > { %1582 = vmatmul.mubr.f32.gmra.mrb[10].mxu1 %v7849_v58  ;;  %753 = vmatprep.mubr.f32.mxu0 %v10566_v11 }
  0x6d   : > { %1587 = vmatprep.mubr.f32.mxu1 %v10566_v11 }
  0x6f   : > { %755 = vmatmul.mubr.f32.gmra.mrb[12].mxu0 %v7854_v2 }
  0x70   : > { %1589 = vmatmul.mubr.f32.gmra.mrb[12].mxu1 %v7854_v2  ;;  %760 = vmatprep.mubr.f32.mxu0 %v10566_v11 }
  0x71   : > { %1594 = vmatprep.mubr.f32.mxu1 %v10566_v11 }
  0x73   : > { %762 = vmatmul.mubr.f32.gmra.mrb[14].mxu0 %v7867_v9 }
  0x74   : > { %1596 = vmatmul.mubr.f32.gmra.mrb[14].mxu1 %v7867_v9  ;;  %840 = vmatprep.mubr.f32.mxu0 %v10566_v11 }
  0x75   : > { %1674 = vmatprep.mubr.f32.mxu1 %v10566_v11 }
  0x77   : > { %843 = vmatmul.mubr.f32.vlgmr.msra.gmra.mrb[0].mxu0 %v7738_v30 }
  0x78   : > { %1677 = vmatmul.mubr.f32.vlgmr.msra.gmra.mrb[0].mxu1 %v7738_v30  ;;  %848 = vmatprep.mubr.f32.mxu0 %v10566_v11  ;;  %v400_v30 = vld [vmem:[%s10559_s3 + $0x18] sm:$0xff] }
  0x79   : > { %1682 = vmatprep.mubr.f32.mxu1 %v10566_v11  ;;  %6429 = vmatpush1.bf16.msra.mxu0 %v7755_v43 }
  0x7a   : > { %6453 = vmatpush1.bf16.msra.mxu1 %v7773_v53  ;;  %6431 = vmatprep.subr.bf16.mxu0 %v7882_v21 }
  0x7b   : > { %851 = vmatmul.mubr.f32.gmra.mrb[2].mxu0 %v7741_v36  ;;  %6455 = vmatprep.subr.bf16.mxu1 %v7888_v24 }
  0x7c   : > { %1685 = vmatmul.mubr.f32.gmra.mrb[2].mxu1 %v7741_v36  ;;  %856 = vmatprep.mubr.f32.mxu0 %v10566_v11  ;;  %v403_v36 = vld [vmem:[%s10559_s3 + $0x30] sm:$0xff] }
  0x7d   : > { %1690 = vmatprep.mubr.f32.mxu1 %v10566_v11  ;;  %422 = vperm.xlu1 %7304, %v400_v30  }
  0x7e   : > { %437 = vperm.xlu0 %7303, %v403_v36  }
  0x7f   : > { %859 = vmatmul.mubr.f32.gmra.mrb[4].mxu0 %v7813_v13 }
  0x80   : > { %1693 = vmatmul.mubr.f32.gmra.mrb[4].mxu1 %v7813_v13  ;;  %864 = vmatprep.mubr.f32.mxu0 %v10566_v11  ;;  %v2338_v13 = vld [vmem:[%s10561_s5] sm:$0xff] }
  0x81   : > { %1698 = vmatprep.mubr.f32.mxu1 %v10566_v11  ;;  %432 = vperm.xlu1 %7304, %v402_v28  }
  0x82   : > { %2348 = vperm.xlu0 %7303, %v2338_v13  }
  0x83   : > { %867 = vmatmul.mubr.f32.gmra.mrb[6].mxu0 %v7817_v15 }
  0x84   : > { %1701 = vmatmul.mubr.f32.gmra.mrb[6].mxu1 %v7817_v15  ;;  %872 = vmatprep.mubr.f32.mxu0 %v10566_v11  ;;  %v2340_v15 = vld [vmem:[%s10561_s5 + $0x10] sm:$0xff] }
  0x85   : > { %1706 = vmatprep.mubr.f32.mxu1 %v10566_v11  ;;  %442 = vperm.xlu1 %7304, %v404_v29  }
  0x86   : > { %2358 = vperm.xlu0 %7303, %v2340_v15  }
  0x87   : > { %875 = vmatmul.mubr.f32.gmra.mrb[8].mxu0 %v7847_v57 }
  0x88   : > { %1709 = vmatmul.mubr.f32.gmra.mrb[8].mxu1 %v7847_v57  ;;  %880 = vmatprep.mubr.f32.mxu0 %v10566_v11  ;;  %v4584_v57 = vld [vmem:[%s10563_s7] sm:$0xf] }
  0x89   : > { %1714 = vmatprep.mubr.f32.mxu1 %v10566_v11  ;;  %2353 = vperm.xlu1 %7304, %v2339_v31  }
  0x8a   : > { %2368 = vperm.xlu0 %7303, %v2342_v33  }
  0x8b   : > { %883 = vmatmul.mubr.f32.gmra.mrb[10].mxu0 %v7860_v4 }
  0x8c   : > { %1717 = vmatmul.mubr.f32.gmra.mrb[10].mxu1 %v7860_v4  ;;  %888 = vmatprep.mubr.f32.mxu0 %v10566_v11 }
  0x8d   : > { %1722 = vmatprep.mubr.f32.mxu1 %v10566_v11  ;;  %2363 = vperm.xlu1 %7304, %v2341_v32  }
  0x8e   : > { %2378 = vperm.xlu0 %7303, %v2344_v46  }
  0x8f   : > { %891 = vmatmul.mubr.f32.gmra.mrb[12].mxu0 %v7865_v7 }
  0x90   : > { %1725 = vmatmul.mubr.f32.gmra.mrb[12].mxu1 %v7865_v7  ;;  %896 = vmatprep.mubr.f32.mxu0 %v10566_v11 }
  0x91   : > { %1730 = vmatprep.mubr.f32.mxu1 %v10566_v11  ;;  %2373 = vperm.xlu1 %7304, %v2343_v35  }
  0x92   : > { %4587 = vperm.xlu0 %7303, %v4584_v57  }
  0x93   : > { %899 = vmatmul.mubr.f32.gmra.mrb[14].mxu0 %v7904_v42 }
  0x94   : > { %1733 = vmatmul.mubr.f32.gmra.mrb[14].mxu1 %v7904_v42  ;;  %973 = vmatprep.mubr.f32.mxu0 %v10566_v11 }
  0x95   : > { %1807 = vmatprep.mubr.f32.mxu1 %v10566_v11  ;;  %2383 = vperm.xlu1 %7304, %v2345_v47  }
  0x97   : > { %977 = vmatmul.mubr.f32.vlgmr.msra.gmra.mrb[0].mxu0 %v7763_v48 }
  0x98   : > { %1811 = vmatmul.mubr.f32.vlgmr.msra.gmra.mrb[0].mxu1 %v7763_v48  ;;  %982 = vmatprep.mubr.f32.mxu0 %v10566_v11 }
  0x99   : > { %1816 = vmatprep.mubr.f32.mxu1 %v10566_v11  ;;  %6433 = vmatpush1.bf16.msra.mxu0 %v7894_v25 }
  0x9a   : > { %6457 = vmatpush1.bf16.msra.mxu1 %v7896_v26  ;;  %6435 = vmatprep.subr.bf16.mxu0 %v7743_v37  ;;  %v5944_v37 = vsub.f32 0.0, %v388_v59  ;;  %v2337_v59 = vld [vmem:[%s10560_s4 + $0x38] sm:$0xff] }
  0x9b   : > { %986 = vmatmul.mubr.f32.gmra.mrb[2].mxu0 %v7768_v49  ;;  %6459 = vmatprep.subr.bf16.mxu1 %v7751_v41 }
  0x9c   : > { %1820 = vmatmul.mubr.f32.gmra.mrb[2].mxu1 %v7768_v49  ;;  %991 = vmatprep.mubr.f32.mxu0 %v10566_v11 }
  0x9d   : > { %1825 = vmatprep.mubr.f32.mxu1 %v10566_v11  ;;  %5947 = vperm.xlu1 %7304, %v5943_v60  }
  0x9e   : > { %5952 = vperm.xlu0 %7303, %v5944_v37  }
  0x9f   : > { %995 = vmatmul.mubr.f32.gmra.mrb[4].mxu0 %v7826_v14 }
  0xa0   : > { %1829 = vmatmul.mubr.f32.gmra.mrb[4].mxu1 %v7826_v14  ;;  %1000 = vmatprep.mubr.f32.mxu0 %v10566_v11 }
  0xa1   : > { %1834 = vmatprep.mubr.f32.mxu1 %v10566_v11 }
  0xa3   : > { %1004 = vmatmul.mubr.f32.gmra.mrb[6].mxu0 %v7829_v18 }
  0xa4   : > { %1838 = vmatmul.mubr.f32.gmra.mrb[6].mxu1 %v7829_v18  ;;  %1009 = vmatprep.mubr.f32.mxu0 %v10566_v11  ;;  %v2334_v18 = vld [vmem:[%s10560_s4 + $0x20] sm:$0xff] }
  0xa5   : > { %1843 = vmatprep.mubr.f32.mxu1 %v10566_v11  ;;  %v2400_v1 = vsel %vm2386_vm1, %v2334_v18, 0 }
  0xa6   : > { %v8193_v4 = vand.u32 4294901760, %v2400_v1 }
  0xa7   : > { %1013 = vmatmul.mubr.f32.gmra.mrb[8].mxu0 %v7857_v3 }
  0xa8   : > { %1847 = vmatmul.mubr.f32.gmra.mrb[8].mxu1 %v7857_v3  ;;  %1018 = vmatprep.mubr.f32.mxu0 %v10566_v11  ;;  %10765 = vst [vmem:[#allocation16_spill] sm:$0xff] %v8193_v4  ;;  %v8215_v21 = vsub.f32 %v2400_v1, %v8193_v4 }
  0xa9   : > { %1852 = vmatprep.mubr.f32.mxu1 %v10566_v11 }
  0xaa   : > { %10770 = vst [vmem:[#allocation21_spill] sm:$0xff] %v8215_v21  ;;  %v8234_v0 = vand.u32 4294901760, %v8215_v21 }
  0xab   : > { %1022 = vmatmul.mubr.f32.gmra.mrb[10].mxu0 %v7875_v20 }
  0xac   : > { %1856 = vmatmul.mubr.f32.gmra.mrb[10].mxu1 %v7875_v20  ;;  %1027 = vmatprep.mubr.f32.mxu0 %v10566_v11  ;;  %v2403_v20 = vsel %vm2386_vm1, %v2335_v5, 0  ;;  %10774 = vst [vmem:[#allocation25_spill] sm:$0xff] %v8234_v0  ;;  %v2409_v5 = vsel %vm2386_vm1, %v2337_v59, 0 }
  0xad   : > { %1861 = vmatprep.mubr.f32.mxu1 %v10566_v11 }
  0xaf   : > { %1031 = vmatmul.mubr.f32.gmra.mrb[12].mxu0 %v7901_v40 }
  0xb0   : > { %1865 = vmatmul.mubr.f32.gmra.mrb[12].mxu1 %v7901_v40  ;;  %1036 = vmatprep.mubr.f32.mxu0 %v10566_v11  ;;  %v8224_v40 = vand.u32 4294901760, %v2403_v20 }
  0xb1   : > { %1870 = vmatprep.mubr.f32.mxu1 %v10566_v11 }
  0xb2   : > { %10771 = vst [vmem:[#allocation22_spill] sm:$0xff] %v8224_v40  ;;  %v8250_v28 = vsub.f32 %v2403_v20, %v8224_v40 }
  0xb3   : > { %1040 = vmatmul.mubr.f32.gmra.mrb[14].mxu0 %v7911_v52 }
  0xb4   : > { %1874 = vmatmul.mubr.f32.gmra.mrb[14].mxu1 %v7911_v52  ;;  %1122 = vmatprep.mubr.f32.mxu0 %v10566_v11  ;;  %10778 = vst [vmem:[#allocation29_spill] sm:$0xff] %v8250_v28 }
  0xb5   : > { %1956 = vmatprep.mubr.f32.mxu1 %v10566_v11 }
  0xb7   : > { %1124 = vmatmul.mubr.f32.vlgmr.msra.gmra.mrb[0].mxu0 %v7722_v16 }
  0xb8   : > { %1958 = vmatmul.mubr.f32.vlgmr.msra.gmra.mrb[0].mxu1 %v7722_v16  ;;  %1129 = vmatprep.mubr.f32.mxu0 %v10566_v11 }
  0xb9   : > { %1963 = vmatprep.mubr.f32.mxu1 %v10566_v11  ;;  %6437 = vmatpush1.bf16.msra.mxu0 %v7755_v43 }
  0xba   : > { %6461 = vmatpush1.bf16.msra.mxu1 %v7773_v53  ;;  %v2333_v53 = vld [vmem:[%s10560_s4 + $0x18] sm:$0xff] }
  0xbb   : > { %1131 = vmatmul.mubr.f32.gmra.mrb[2].mxu0 %v7724_v17 }
  0xbc   : > { %1965 = vmatmul.mubr.f32.gmra.mrb[2].mxu1 %v7724_v17  ;;  %1136 = vmatprep.mubr.f32.mxu0 %v10566_v11 }
  0xbd   : > { %1970 = vmatprep.mubr.f32.mxu1 %v10566_v11 }
  0xbf   : > { %1138 = vmatmul.mubr.f32.gmra.mrb[4].mxu0 %v7732_v22 }
  0xc0   : > { %1972 = vmatmul.mubr.f32.gmra.mrb[4].mxu1 %v7732_v22  ;;  %1143 = vmatprep.mubr.f32.mxu0 %v10566_v11 }
  0xc1   : > { %1977 = vmatprep.mubr.f32.mxu1 %v10566_v11 }
  0xc3   : > { %1145 = vmatmul.mubr.f32.gmra.mrb[6].mxu0 %v7735_v23 }
  0xc4   : > { %1979 = vmatmul.mubr.f32.gmra.mrb[6].mxu1 %v7735_v23  ;;  %1150 = vmatprep.mubr.f32.mxu0 %v10566_v11  ;;  %v408_v25 = vpop.permute.xlu0 %407 }
  0xc5   : > { %1984 = vmatprep.mubr.f32.mxu1 %v10566_v11 }
  0xc6   : > { %v418_v60 = vpop.permute.xlu1 %417 }
  0xc7   : > { %1152 = vmatmul.mubr.f32.gmra.mrb[8].mxu0 %v7838_v34 }
  0xc8   : > { %1986 = vmatmul.mubr.f32.gmra.mrb[8].mxu1 %v7838_v34  ;;  %1157 = vmatprep.mubr.f32.mxu0 %v10566_v11  ;;  %v413_v36 = vpop.permute.xlu0 %412 }
  0xc9   : > { %1991 = vmatprep.mubr.f32.mxu1 %v10566_v11 }
  0xcb   : > { %1159 = vmatmul.mubr.f32.gmra.mrb[10].mxu0 %v7849_v58 }
  0xcc   : > { %1993 = vmatmul.mubr.f32.gmra.mrb[10].mxu1 %v7849_v58  ;;  %1164 = vmatprep.mubr.f32.mxu0 %v10566_v11 }
  0xcd   : > { %1998 = vmatprep.mubr.f32.mxu1 %v10566_v11 }
  0xcf   : > { %1166 = vmatmul.mubr.f32.gmra.mrb[12].mxu0 %v7854_v2 }
  0xd0   : > { %2000 = vmatmul.mubr.f32.gmra.mrb[12].mxu1 %v7854_v2  ;;  %1171 = vmatprep.mubr.f32.mxu0 %v10566_v11 }
  0xd1   : > { %2005 = vmatprep.mubr.f32.mxu1 %v10566_v11 }
  0xd3   : > { %1173 = vmatmul.mubr.f32.gmra.mrb[14].mxu0 %v7867_v9 }
  0xd4   : > { %2007 = vmatmul.mubr.f32.gmra.mrb[14].mxu1 %v7867_v9  ;;  %1247 = vmatprep.mubr.f32.mxu0 %v10566_v11 }
  0xd5   : > { %2081 = vmatprep.mubr.f32.mxu1 %v10566_v11 }
  0xd7   : > { %1249 = vmatmul.mubr.f32.vlgmr.msra.gmra.mrb[0].mxu0 %v7722_v16 }
  0xd8   : > { %2083 = vmatmul.mubr.f32.vlgmr.msra.gmra.mrb[0].mxu1 %v7722_v16  ;;  %1254 = vmatprep.mubr.f32.mxu0 %v10566_v11  ;;  %v2330_v16 = vld [vmem:[%s10560_s4] sm:$0xff] }
  0xd9   : > { %2088 = vmatprep.mubr.f32.mxu1 %v10566_v11 }
  0xdb   : > { %1256 = vmatmul.mubr.f32.gmra.mrb[2].mxu0 %v7724_v17 }
  0xdc   : > { %2090 = vmatmul.mubr.f32.gmra.mrb[2].mxu1 %v7724_v17  ;;  %1261 = vmatprep.mubr.f32.mxu0 %v10566_v11  ;;  %v2331_v17 = vld [vmem:[%s10560_s4 + $0x8] sm:$0xff] }
  0xdd   : > { %2095 = vmatprep.mubr.f32.mxu1 %v10566_v11  ;;  %v2391_v41 = vsel %vm2386_vm1, %v2331_v17, 0 }
  0xde   : > { %v8170_v49 = vand.u32 4294901760, %v2391_v41 }
  0xdf   : > { %1263 = vmatmul.mubr.f32.gmra.mrb[4].mxu0 %v7732_v22 }
  0xe0   : > { %2097 = vmatmul.mubr.f32.gmra.mrb[4].mxu1 %v7732_v22  ;;  %1268 = vmatprep.mubr.f32.mxu0 %v10566_v11  ;;  %v2332_v22 = vld [vmem:[%s10560_s4 + $0x10] sm:$0xff]  ;;  %10759 = vst [vmem:[#allocation10_spill] sm:$0xff] %v8170_v49  ;;  %v8185_v61 = vsub.f32 %v2391_v41, %v8170_v49 }
  0xe1   : > { %2102 = vmatprep.mubr.f32.mxu1 %v10566_v11  ;;  %v2394_v43 = vsel %vm2386_vm1, %v2332_v22, 0 }
  0xe2   : > { %v8175_v14 = vand.u32 4294901760, %v2394_v43  ;;  %10762 = vst [vmem:[#allocation13_spill] sm:$0xff] %v8185_v61  ;;  %v8202_v7 = vand.u32 4294901760, %v8185_v61 }
  0xe3   : > { %1270 = vmatmul.mubr.f32.gmra.mrb[6].mxu0 %v7735_v23 }
  0xe4   : > { %2104 = vmatmul.mubr.f32.gmra.mrb[6].mxu1 %v7735_v23  ;;  %1275 = vmatprep.mubr.f32.mxu0 %v10566_v11  ;;  %v2388_v23 = vsel %vm2386_vm1, %v2330_v16, 0  ;;  %10760 = vst [vmem:[#allocation11_spill] sm:$0xff] %v8175_v14  ;;  %10767 = vst [vmem:[#allocation18_spill] sm:$0xff] %v8202_v7  ;;  %v2506_v38 = vsub.f32 %v8185_v61, %v8202_v7 }
  0xe5   : > { %2109 = vmatprep.mubr.f32.mxu1 %v10566_v11  ;;  %v8168_v48 = vand.u32 4294901760, %v2388_v23 }
  0xe6   : > { %v8242_v54 = vand.u32 4294901760, %v2506_v38 }
  0xe7   : > { %1277 = vmatmul.mubr.f32.gmra.mrb[8].mxu0 %v7838_v34  ;;  %10758 = vst [vmem:[#allocation9_spill] sm:$0xff] %v8168_v48 }
  0xe8   : > { %2111 = vmatmul.mubr.f32.gmra.mrb[8].mxu1 %v7838_v34  ;;  %1282 = vmatprep.mubr.f32.mxu0 %v10566_v11  ;;  %v2397_v34 = vsel %vm2386_vm1, %v2333_v53, 0  ;;  %10776 = vst [vmem:[#allocation27_spill] sm:$0xff] %v8242_v54  ;;  %v8273_v53 = vand.u32 4294901760, %v8250_v28 }
  0xe9   : > { %2116 = vmatprep.mubr.f32.mxu1 %v10566_v11  ;;  %v8191_v3 = vand.u32 4294901760, %v2397_v34 }
  0xea   : > { %10780 = vst [vmem:[#allocation31_spill] sm:$0xff] %v8273_v53 }
  0xeb   : > { %1284 = vmatmul.mubr.f32.gmra.mrb[10].mxu0 %v7849_v58  ;;  %10764 = vst [vmem:[#allocation15_spill] sm:$0xff] %v8191_v3  ;;  %v8211_v19 = vsub.f32 %v2397_v34, %v8191_v3 }
  0xec   : > { %2118 = vmatmul.mubr.f32.gmra.mrb[10].mxu1 %v7849_v58  ;;  %1289 = vmatprep.mubr.f32.mxu0 %v10566_v11  ;;  %v8182_v58 = vsub.f32 %v2388_v23, %v8168_v48 }
  0xed   : > { %2123 = vmatprep.mubr.f32.mxu1 %v10566_v11  ;;  %10769 = vst [vmem:[#allocation20_spill] sm:$0xff] %v8211_v19  ;;  %v8227_v50 = vand.u32 4294901760, %v8211_v19 }
  0xee   : > { %10761 = vst [vmem:[#allocation12_spill] sm:$0xff] %v8182_v58  ;;  %v8199_v6 = vand.u32 4294901760, %v8182_v58 }
  0xef   : > { %1291 = vmatmul.mubr.f32.gmra.mrb[12].mxu0 %v7854_v2  ;;  %10772 = vst [vmem:[#allocation23_spill] sm:$0xff] %v8227_v50 }
  0xf0   : > { %2125 = vmatmul.mubr.f32.gmra.mrb[12].mxu1 %v7854_v2  ;;  %1296 = vmatprep.mubr.f32.mxu0 %v10566_v11  ;;  %v8189_v2 = vsub.f32 %v2394_v43, %v8175_v14  ;;  %10766 = vst [vmem:[#allocation17_spill] sm:$0xff] %v8199_v6  ;;  %v2495_v26 = vsub.f32 %v8182_v58, %v8199_v6  ;;  %v428_v14 = vpop.permute.xlu0 %427 }
  0xf1   : > { %2130 = vmatprep.mubr.f32.mxu1 %v10566_v11 }
  0xf2   : > { %10763 = vst [vmem:[#allocation14_spill] sm:$0xff] %v8189_v2  ;;  %v8208_v10 = vand.u32 4294901760, %v8189_v2  ;;  %v8240_v45 = vand.u32 4294901760, %v2495_v26 }
  0xf3   : > { %1298 = vmatmul.mubr.f32.gmra.mrb[14].mxu0 %v7867_v9 }
  0xf4   : > { %2132 = vmatmul.mubr.f32.gmra.mrb[14].mxu1 %v7867_v9  ;;  %2491 = vmatprep.mubr.f32.mxu0 %v10566_v11  ;;  %v2336_v9 = vld [vmem:[%s10560_s4 + $0x30] sm:$0xff]  ;;  %10768 = vst [vmem:[#allocation19_spill] sm:$0xff] %v8208_v10  ;;  %v2517_v39 = vsub.f32 %v8189_v2, %v8208_v10  ;;  %10775 = vst [vmem:[#allocation26_spill] sm:$0xff] %v8240_v45 }
  0xf5   : > { %3481 = vmatprep.mubr.f32.mxu1 %v10566_v11  ;;  %v2406_v24 = vsel %vm2386_vm1, %v2336_v9, 0 }
  0xf6   : > { %v8229_v51 = vand.u32 4294901760, %v2406_v24  ;;  %v8247_v27 = vand.u32 4294901760, %v2517_v39 }
  0xf8   : > { %10773 = vst [vmem:[#allocation24_spill] sm:$0xff] %v8229_v51  ;;  %10777 = vst [vmem:[#allocation28_spill] sm:$0xff] %v8247_v27  ;;  %v8257_v32 = vsub.f32 %v2406_v24, %v8229_v51 }
  0xfa   : > { %10779 = vst [vmem:[#allocation30_spill] sm:$0xff] %v8257_v32  ;;  %v8277_v1 = vand.u32 4294901760, %v8257_v32 }
  0xfc   : > { %10781 = vst [vmem:[#allocation32_spill] sm:$0xff] %v8277_v1 }
 0x1aa   : > { %v1250_v42 = vpop.f32.mrb[0].mxu0 }
 0x1ab   : > { %v8231_v52 = vadd.f32 %v1250_v42, %v408_v25  ;;  %v2084_v62 = vpop.f32.mrb[0].mxu1  ;;  %v1252_v63 = vpop.f32.mrb[1].mxu0 }
 0x1ac   : > { %v8236_v8 = vadd.f32 %v2084_v62, %v408_v25  ;;  %v8238_v12 = vadd.f32 %v1252_v63, %v408_v25  ;;  %v2086_v44 = vpop.f32.mrb[1].mxu1 }
 0x1ad   : > { %v2170_v55 = vmin.f32 %v8231_v52, 0.0  ;;  %v8245_v30 = vadd.f32 %v2086_v44, %v408_v25  ;;  %vm2138_vm2 = vcmp.gt.f32.partialorder %v8231_v52, 0.0 }
 0x1ae   : > { %v2172_v29 = vmin.f32 %v8236_v8, 0.0  ;;  %v2171_v13 = vmin.f32 %v8238_v12, 0.0  ;;  %v1257_v31 = vpop.f32.mrb[2].mxu0  ;;  %vm2140_vm3 = vcmp.gt.f32.partialorder %v8236_v8, 0.0  ;;  %vm2139_vm4 = vcmp.gt.f32.partialorder %v8238_v12, 0.0 }
 0x1af   : > { %v2202_v33 = vmul.f32 1.442695, %v2170_v55  ;;  %v2173_v35 = vmin.f32 %v8245_v30, 0.0  ;;  %v8260_v46 = vadd.f32 %v1257_v31, %v413_v36  ;;  %v2091_v47 = vpop.f32.mrb[2].mxu1  ;;  %v1259_v56 = vpop.f32.mrb[3].mxu0  ;;  %v8288_v55 = vand.u32 4294901760, %v2409_v5 }
 0x1b0   : > { %v2206_v37 = vmul.f32 1.442695, %v2172_v29  ;;  %v2204_v16 = vmul.f32 1.442695, %v2171_v13  ;;  %v8267_v17 = vadd.f32 %v2091_v47, %v413_v36  ;;  %v8269_v22 = vadd.f32 %v1259_v56, %v413_v36  ;;  %v2093_v23 = vpop.f32.mrb[3].mxu1  ;;  %v8290_v29 = vpop.permute.xlu1 %422 }
 0x1b1   : > { %7305 = vpow2.f32 %v2202_v33  ;;  %v2208_v41 = vmul.f32 1.442695, %v2173_v35  ;;  %v2174_v43 = vmin.f32 %v8260_v46, 0.0  ;;  %v8281_v24 = vadd.f32 %v2093_v23, %v413_v36  ;;  %10782 = vst [vmem:[#allocation33_spill] sm:$0xff] %v8288_v55 }
 0x1b2   : > { %7307 = vpow2.f32 %v2206_v37  ;;  %v2176_v18 = vmin.f32 %v8267_v17, 0.0  ;;  %v1264_v34 = vpop.f32.mrb[4].mxu0  ;;  %v2175_v20 = vmin.f32 %v8269_v22, 0.0  ;;  %vm2141_vm5 = vcmp.gt.f32.partialorder %v8245_v30, 0.0 }
 0x1b3   : > { %7309 = vpow2.f32 %v2204_v16  ;;  %v2210_v9 = vmul.f32 1.442695, %v2174_v43  ;;  %v2098_v25 = vpop.f32.mrb[4].mxu1  ;;  %v1266_v26 = vpop.f32.mrb[5].mxu0  ;;  %v8283_v39 = vadd.f32 %v1264_v34, %v418_v60  ;;  %v2177_v44 = vmin.f32 %v8281_v24, 0.0 }
 0x1b4   : > { %7311 = vpow2.f32 %v2208_v41  ;;  %v2214_v38 = vmul.f32 1.442695, %v2176_v18  ;;  %v8285_v42 = vadd.f32 %v2098_v25, %v418_v60  ;;  %v2100_v62 = vpop.f32.mrb[5].mxu1  ;;  %v2212_v63 = vmul.f32 1.442695, %v2175_v20  ;;  %v433_v48 = vpop.permute.xlu1 %432 }
 0x1b5   : > { %7313 = vpow2.f32 %v2210_v9  ;;  %v2178_v36 = vmin.f32 %v8283_v39, 0.0  ;;  %v2216_v35 = vmul.f32 1.442695, %v2177_v44  ;;  %v8298_v56 = vadd.f32 %v1266_v26, %v418_v60 }
 0x1b6   : > { %7315 = vpow2.f32 %v2214_v38  ;;  %v1271_v13 = vpop.f32.mrb[6].mxu0  ;;  %v2180_v47 = vmin.f32 %v8285_v42, 0.0  ;;  %v8300_v23 = vadd.f32 %v2100_v62, %v418_v60  ;;  %v8312_v20 = vsub.f32 %v2409_v5, %v8288_v55 }
 0x1b7   : > { %7317 = vpow2.f32 %v2212_v63  ;;  %v2105_v59 = vpop.f32.mrb[6].mxu1  ;;  %v1273_v37 = vpop.f32.mrb[7].mxu0  ;;  %v2218_v16 = vmul.f32 1.442695, %v2178_v36  ;;  %v8303_v41 = vadd.f32 %v1271_v13, %v8290_v29  ;;  %v2179_v9 = vmin.f32 %v8298_v56, 0.0 }
 0x1b8   : > { %v8306_v43 = vadd.f32 %v2105_v59, %v8290_v29  ;;  %v8308_v18 = vpop.f32.mrb[7].mxu1  ;;  %7319 = vpow2.f32 %v2216_v35  ;;  %v2222_v34 = vmul.f32 1.442695, %v2180_v47  ;;  %10783 = vst [vmem:[#allocation34_spill] sm:$0xff] %v8312_v20  ;;  %v2181_v60 = vmin.f32 %v8300_v23, 0.0 }
 0x1b9   : > { %7321 = vpow2.f32 %v2218_v16  ;;  %v2220_v38 = vmul.f32 1.442695, %v2179_v9  ;;  %v2182_v62 = vmin.f32 %v8303_v41, 0.0  ;;  %vm2142_vm6 = vcmp.gt.f32.partialorder %v8260_v46, 0.0 }
 0x1ba   : > { %v8317_v25 = vpop.f32.mrb[8].mxu0  ;;  %7323 = vpow2.f32 %v2222_v34  ;;  %v2224_v13 = vmul.f32 1.442695, %v2181_v60  ;;  %v2184_v35 = vmin.f32 %v8306_v43, 0.0  ;;  %vm2144_vm7 = vcmp.gt.f32.partialorder %v8267_v17, 0.0 }
 0x1bb   : > { %v7306_v26 = vpop.eup %7305  ;;  %v8321_v63 = vpop.f32.mrb[8].mxu1  ;;  %7325 = vpow2.f32 %v2220_v38  ;;  %v2226_v34 = vmul.f32 1.442695, %v2182_v62  ;;  %vm2143_vm8 = vcmp.gt.f32.partialorder %v8269_v22, 0.0  ;;  %vm2145_vm9 = vcmp.gt.f32.partialorder %v8281_v24, 0.0 }
 0x1bc   : > { %v8323_v5 = vpop.f32.mrb[9].mxu0  ;;  %v7308_v44 = vpop.eup %7307  ;;  %v6339_v36 = vadd.f32 -1.0, %v7306_v26  ;;  %7327 = vpow2.f32 %v2224_v13  ;;  %v2230_v60 = vmul.f32 1.442695, %v2184_v35  ;;  %vm2146_vm10 = vcmp.gt.f32.partialorder %v8283_v39, 0.0 }
 0x1bd   : > { %v8327_v47 = vpop.f32.mrb[9].mxu1  ;;  %v7310_v59 = vpop.eup %7309  ;;  %v6341_v16 = vadd.f32 -1.0, %v7308_v44  ;;  %7329 = vpow2.f32 %v2226_v34  ;;  %vm2148_vm11 = vcmp.gt.f32.partialorder %v8285_v42, 0.0  ;;  %vm2147_vm12 = vcmp.gt.f32.partialorder %v8298_v56, 0.0 }
 0x1be   : > { %v7312_v9 = vpop.eup %7311  ;;  %v8333_v33 = vsel %vm2138_vm2, %v8231_v52, %v6339_v36  ;;  %v8336_v26 = vpop.f32.mrb[10].mxu0  ;;  %v6340_v57 = vadd.f32 -1.0, %v7310_v59  ;;  %7331 = vpow2.f32 %v2230_v60  ;;  %vm2149_vm13 = vcmp.gt.f32.partialorder %v8300_v23, 0.0 }
 0x1bf   : > { %v7314_v31 = vpop.eup %7313  ;;  %v8340_v38 = vpop.f32.mrb[10].mxu1  ;;  %v8347_v52 = vsel %vm2140_vm3, %v8236_v8, %v6341_v16  ;;  %v6342_v36 = vadd.f32 -1.0, %v7312_v9  ;;  %vm2150_vm14 = vcmp.gt.f32.partialorder %v8303_v41, 0.0  ;;  %vm2152_vm15 = vcmp.gt.f32.partialorder %v8306_v43, 0.0 }
 0x1c0   : > { %v8342_v62 = vpop.f32.mrb[11].mxu0  ;;  %v7316_v44 = vpop.eup %7315  ;;  %v6343_v13 = vadd.f32 -1.0, %v7314_v31  ;;  %v8361_v31 = vadd.f32 %v1273_v37, %v8290_v29  ;;  %v10785_v61 = vand.u32 4294901760, %v8347_v52  ;;  %v8504_v1 = vadd.f32 %v8317_v25, %v428_v14 }
 0x1c1   : > { %v8349_v35 = vpop.f32.mrb[11].mxu1  ;;  %v7318_v59 = vpop.eup %7317  ;;  %v6345_v11 = vadd.f32 -1.0, %v7316_v44  ;;  %v8369_v44 = vsel %vm2139_vm4, %v8238_v12, %v6340_v57  ;;  %v8384_v60 = vsel %vm2141_vm5, %v8245_v30, %v6342_v36  ;;  %v8390_v12 = vadd.f32 %v8308_v18, %v8290_v29 }
 0x1c2   : > { %v8357_v34 = vsel %vm2142_vm6, %v8260_v46, %v6343_v13  ;;  %v6344_v8 = vadd.f32 -1.0, %v7318_v59  ;;  %v8363_v16 = vpop.f32.mrb[12].mxu0  ;;  %v7320_v9 = vpop.eup %7319  ;;  %v2183_v6 = vmin.f32 %v8361_v31, 0.0  ;;  %v8413_v58 = vsub.f32 %v8347_v52, %v10785_v61 }
 0x1c3   : > { %v8375_v46 = vsel %vm2144_vm7, %v8267_v17, %v6345_v11  ;;  %v8377_v13 = vpop.f32.mrb[12].mxu1  ;;  %v8379_v37 = vpop.f32.mrb[13].mxu0  ;;  %v10784_v17 = vand.u32 4294901760, %v8333_v33  ;;  %v6346_v36 = vadd.f32 -1.0, %v7320_v9  ;;  %vm2151_vm0 = vcmp.gt.f32.partialorder %v8361_v31, 0.0 }
 0x1c4   : > { %v7322_v59 = vpop.eup %7321  ;;  %v8392_v11 = vpop.f32.mrb[13].mxu1  ;;  %v8402_v30 = vsel %vm2143_vm8, %v8269_v22, %v6344_v8  ;;  %v10786_v8 = vand.u32 4294901760, %v8357_v34  ;;  %v2228_v61 = vmul.f32 1.442695, %v2183_v6  ;;  %vm2153_vm2 = vcmp.gt.f32.partialorder %v8390_v12, 0.0 }
 0x1c5   : > { %v7324_v57 = vpop.eup %7323  ;;  %v8397_v15 = vsub.f32 %v8333_v33, %v10784_v17  ;;  %v6347_v10 = vadd.f32 -1.0, %v7322_v59  ;;  %v8434_v22 = vsel %vm2145_vm9, %v8281_v24, %v6346_v36  ;;  %v10787_v24 = vand.u32 4294901760, %v8369_v44 }
 0x1c6   : > { %v6349_v18 = vadd.f32 -1.0, %v7324_v57  ;;  %v8408_v2 = vpop.f32.mrb[14].mxu0  ;;  %v7326_v17 = vpop.eup %7325  ;;  %v8419_v9 = vsub.f32 %v8357_v34, %v10786_v8  ;;  %v10788_v8 = vand.u32 4294901760, %v8375_v46  ;;  %v10790_v51 = vand.u32 4294901760, %v8402_v30 }
 0x1c7   : > { %v8424_v59 = vsel %vm2146_vm10, %v8283_v39, %v6347_v10  ;;  %v8426_v57 = vpop.f32.mrb[14].mxu1  ;;  %v8428_v29 = vpop.f32.mrb[15].mxu0  ;;  %v6348_v40 = vadd.f32 -1.0, %v7326_v17  ;;  %v8449_v36 = vsub.f32 %v8369_v44, %v10787_v24  ;;  %v10789_v17 = vand.u32 4294901760, %v8384_v60 }
 0x1c8   : > { %v7328_v7 = vpop.eup %7327  ;;  %v8440_v55 = vsel %vm2148_vm11, %v8285_v42, %v6349_v18  ;;  %v8442_v10 = vpop.f32.mrb[15].mxu1  ;;  %v8454_v42 = vsub.f32 %v8375_v46, %v10788_v8  ;;  %v8471_v8 = vsub.f32 %v8402_v30, %v10790_v51  ;;  %v10791_v49 = vand.u32 4294901760, %v8424_v59 }
 0x1c9   : > { %v7330_v39 = vpop.eup %7329  ;;  %v6350_v4 = vadd.f32 -1.0, %v7328_v7  ;;  %v8460_v6 = vsub.f32 %v8384_v60, %v10789_v17  ;;  %v8465_v7 = vsel %vm2147_vm12, %v8298_v56, %v6348_v40  ;;  %7333 = vpow2.f32 %v2228_v61 }
 0x1ca   : > { %v7332_v3 = vpop.eup %7331  ;;  %v6351_v18 = vadd.f32 -1.0, %v7330_v39  ;;  %v8482_v40 = vsub.f32 %v8424_v59, %v10791_v49  ;;  %v2185_v49 = vmin.f32 %v8390_v12, 0.0  ;;  %v8514_v39 = vadd.f32 %v8327_v47, %v428_v14 }
 0x1cb   : > { %v6353_v24 = vadd.f32 -1.0, %v7332_v3  ;;  %v10792_v3 = vand.u32 4294901760, %v8440_v55  ;;  %v8492_v51 = vsel %vm2149_vm13, %v8300_v23, %v6350_v4  ;;  %v8507_v4 = vadd.f32 %v8321_v63, %v428_v14 }
 0x1cc   : > { %v8477_v17 = vsel %vm2150_vm14, %v8303_v41, %v6351_v18  ;;  %v8510_v23 = vadd.f32 %v8323_v5, %v428_v14  ;;  %v2232_v41 = vmul.f32 1.442695, %v2185_v49  ;;  %v8517_v18 = vadd.f32 %v8336_v26, %v433_v48 }
 0x1cd   : > { %v8487_v56 = vsub.f32 %v8440_v55, %v10792_v3  ;;  %v8501_v3 = vsel %vm2152_vm15, %v8306_v43, %v6353_v24  ;;  %v10794_v43 = vand.u32 4294901760, %v8434_v22  ;;  %v2186_v5 = vmin.f32 %v8504_v1, 0.0 }
 0x1ce   : > { %v10795_v49 = vand.u32 4294901760, %v8465_v7  ;;  %7335 = vpow2.f32 %v2232_v41  ;;  %v2188_v26 = vmin.f32 %v8507_v4, 0.0  ;;  %v2187_v61 = vmin.f32 %v8510_v23, 0.0 }
 0x1cf   : > { %10793 = vst [vmem:[#allocation35_spill] sm:$0xff] %v8487_v56  ;;  %v8522_v25 = vsub.f32 %v8434_v22, %v10794_v43  ;;  %v10796_v43 = vand.u32 4294901760, %v8477_v17  ;;  %v2234_v24 = vmul.f32 1.442695, %v2186_v5  ;;  %v2189_v32 = vmin.f32 %v8514_v39, 0.0 }
 0x1d0   : > { %v8531_v14 = vsub.f32 %v8465_v7, %v10795_v49  ;;  %v10797_v20 = vand.u32 4294901760, %v8492_v51  ;;  %v2238_v53 = vmul.f32 1.442695, %v2188_v26  ;;  %v2190_v41 = vmin.f32 %v8517_v18, 0.0 }
 0x1d1   : > { %v8538_v63 = vsub.f32 %v8477_v17, %v10796_v43  ;;  %v8549_v47 = vadd.f32 %v8340_v38, %v433_v48  ;;  %7337 = vpow2.f32 %v2234_v24  ;;  %v2236_v28 = vmul.f32 1.442695, %v2187_v61  ;;  %v438_v38 = vpop.permute.xlu0 %437 }
 0x1d2   : > { %v8545_v49 = vsub.f32 %v8492_v51, %v10797_v20  ;;  %v2240_v43 = vmul.f32 1.442695, %v2189_v32  ;;  %v8552_v5 = vadd.f32 %v8342_v62, %v433_v48  ;;  %v10798_v0 = vand.u32 4294901760, %v8501_v3 }
 0x1d3   : > { %7339 = vpow2.f32 %v2238_v53  ;;  %v2242_v20 = vmul.f32 1.442695, %v2190_v41  ;;  %v2192_v26 = vmin.f32 %v8549_v47, 0.0  ;;  %v7334_v27 = vpop.eup %7333  ;;  %v8564_v62 = vadd.f32 %v8349_v35, %v433_v48 }
 0x1d4   : > { %v8557_v21 = vsub.f32 %v8501_v3, %v10798_v0  ;;  %7341 = vpow2.f32 %v2236_v28  ;;  %v2191_v32 = vmin.f32 %v8552_v5, 0.0  ;;  %v6352_v61 = vadd.f32 -1.0, %v7334_v27 }
 0x1d5   : > { %7343 = vpow2.f32 %v2240_v43  ;;  %v2246_v0 = vmul.f32 1.442695, %v2192_v26  ;;  %v8567_v50 = vadd.f32 %v8363_v16, %v438_v38  ;;  %vm2154_vm3 = vcmp.gt.f32.partialorder %v8504_v1, 0.0 }
 0x1d6   : > { %10799 = vst [vmem:[#allocation36_spill] sm:$0xff] %v8557_v21  ;;  %7345 = vpow2.f32 %v2242_v20  ;;  %v2244_v53 = vmul.f32 1.442695, %v2191_v32  ;;  %v2193_v41 = vmin.f32 %v8564_v62, 0.0  ;;  %v8574_v28 = vsel %vm2151_vm0, %v8361_v31, %v6352_v61  ;;  %v8589_v32 = vpop.permute.xlu1 %442 }
 0x1d7   : > { %vm2156_vm4 = vcmp.gt.f32.partialorder %v8507_v4, 0.0  ;;  %7347 = vpow2.f32 %v2246_v0  ;;  %v2194_v48 = vmin.f32 %v8567_v50, 0.0  ;;  %v8580_v16 = vadd.f32 %v8377_v13, %v438_v38 }
 0x1d8   : > { %7349 = vpow2.f32 %v2244_v53  ;;  %v2248_v35 = vmul.f32 1.442695, %v2193_v41  ;;  %v7336_v43 = vpop.eup %7335  ;;  %vm2155_vm5 = vcmp.gt.f32.partialorder %v8510_v23, 0.0  ;;  %v8584_v26 = vadd.f32 %v8379_v37, %v438_v38 }
 0x1d9   : > { %v2250_v20 = vmul.f32 1.442695, %v2194_v48  ;;  %v8587_v31 = vadd.f32 %v8392_v11, %v438_v38  ;;  %v10615_v61 = vand.u32 4294901760, %v8574_v28  ;;  %v6354_v0 = vadd.f32 -1.0, %v7336_v43 }
 0x1da   : > { %vm2157_vm6 = vcmp.gt.f32.partialorder %v8514_v39, 0.0  ;;  %7351 = vpow2.f32 %v2248_v35  ;;  %v2196_v13 = vmin.f32 %v8580_v16, 0.0  ;;  %v2195_v53 = vmin.f32 %v8584_v26, 0.0 }
 0x1db   : > { %7353 = vpow2.f32 %v2250_v20  ;;  %v8597_v37 = vadd.f32 %v8408_v2, %v8589_v32  ;;  %v7338_v41 = vpop.eup %7337  ;;  %v8602_v11 = vsel %vm2153_vm2, %v8390_v12, %v6354_v0  ;;  %vm2158_vm7 = vcmp.gt.f32.partialorder %v8517_v18, 0.0 }
 0x1dc   : > { %vm2160_vm8 = vcmp.gt.f32.partialorder %v8549_v47, 0.0  ;;  %v2197_v38 = vmin.f32 %v8587_v31, 0.0  ;;  %v6355_v35 = vadd.f32 -1.0, %v7338_v41  ;;  %vm2159_vm9 = vcmp.gt.f32.partialorder %v8552_v5, 0.0 }
 0x1dd   : > { %v7340_v48 = vpop.eup %7339  ;;  %v2254_v43 = vmul.f32 1.442695, %v2196_v13  ;;  %v2252_v20 = vmul.f32 1.442695, %v2195_v53  ;;  %v8611_v27 = vsub.f32 %v8574_v28, %v10615_v61  ;;  %vm2161_vm10 = vcmp.gt.f32.partialorder %v8564_v62, 0.0 }
 0x1de   : > { %v7342_v2 = vpop.eup %7341  ;;  %v6357_v0 = vadd.f32 -1.0, %v7340_v48  ;;  %v2256_v24 = vmul.f32 1.442695, %v2197_v38  ;;  %v8617_v54 = vsel %vm2154_vm3, %v8504_v1, %v6355_v35  ;;  %vm2162_vm11 = vcmp.gt.f32.partialorder %v8567_v50, 0.0 }
 0x1df   : > { %v7344_v19 = vpop.eup %7343  ;;  %v6356_v41 = vadd.f32 -1.0, %v7342_v2  ;;  %7355 = vpow2.f32 %v2254_v43  ;;  %v2198_v13 = vmin.f32 %v8597_v37, 0.0  ;;  %v10618_v61 = vand.u32 4294901760, %v8617_v54 }
 0x1e0   : > { %v7346_v53 = vpop.eup %7345  ;;  %v8626_v38 = vsel %vm2156_vm4, %v8507_v4, %v6357_v0  ;;  %v6358_v48 = vadd.f32 -1.0, %v7344_v19  ;;  %7357 = vpow2.f32 %v2252_v20  ;;  %vm2164_vm12 = vcmp.gt.f32.partialorder %v8580_v16, 0.0 }
 0x1e1   : > { %v7348_v1 = vpop.eup %7347  ;;  %v10617_v35 = vand.u32 4294901760, %v8626_v38  ;;  %v8632_v2 = vsel %vm2155_vm5, %v8510_v23, %v6356_v41  ;;  %v6359_v43 = vadd.f32 -1.0, %v7346_v53  ;;  %7359 = vpow2.f32 %v2256_v24 }
 0x1e2   : > { %v7350_v12 = vpop.eup %7349  ;;  %v8637_v45 = vsub.f32 %v8617_v54, %v10618_v61  ;;  %v10623_v4 = vand.u32 4294901760, %v8632_v2  ;;  %v8643_v19 = vsel %vm2157_vm6, %v8514_v39, %v6358_v48  ;;  %v6361_v20 = vadd.f32 -1.0, %v7348_v1 }
 0x1e3   : > { %v8648_v23 = vsub.f32 %v8626_v38, %v10617_v35  ;;  %v8653_v24 = vsel %vm2158_vm7, %v8517_v18, %v6359_v43  ;;  %v6360_v0 = vadd.f32 -1.0, %v7350_v12  ;;  %v8658_v41 = vadd.f32 %v8426_v57, %v8589_v32 }
 0x1e4   : > { %10800 = vst [vmem:[#allocation37_spill] sm:$0xff] %v8637_v45  ;;  %v7352_v39 = vpop.eup %7351  ;;  %v10625_v48 = vand.u32 4294901760, %v8653_v24  ;;  %v8665_v1 = vsel %vm2160_vm8, %v8549_v47, %v6361_v20  ;;  %vm2163_vm13 = vcmp.gt.f32.partialorder %v8584_v26, 0.0  ;;  %v10802_v12 = vand.u32 4294901760, %v8602_v11 }
 0x1e5   : > { %10801 = vst [vmem:[#allocation38_spill] sm:$0xff] %v8648_v23  ;;  %v7354_v18 = vpop.eup %7353  ;;  %v8678_v61 = vsel %vm2159_vm9, %v8552_v5, %v6360_v0  ;;  %vm2165_vm14 = vcmp.gt.f32.partialorder %v8587_v31, 0.0  ;;  %v8684_v47 = vsub.f32 %v8632_v2, %v10623_v4  ;;  %v2258_v5 = vmul.f32 1.442695, %v2198_v13 }
 0x1e6   : > { %v8671_v43 = vsub.f32 %v8602_v11, %v10802_v12  ;;  %v8689_v20 = vsub.f32 %v8653_v24, %v10625_v48  ;;  %v6362_v12 = vadd.f32 -1.0, %v7352_v39  ;;  %v6363_v57 = vadd.f32 -1.0, %v7354_v18 }
 0x1e7   : > { %10803 = vst [vmem:[#allocation39_spill] sm:$0xff] %v8684_v47  ;;  %v2431_v53 = vand.u32 4294901760, %v8678_v61  ;;  %v2200_v0 = vmin.f32 %v8658_v41, 0.0  ;;  %v10804_v45 = vand.u32 4294901760, %v8643_v19  ;;  %v10806_v4 = vand.u32 4294901760, %v8665_v1 }
 0x1e8   : > { %v2321_v39 = vsel %vm2161_vm10, %v8564_v62, %v6362_v12  ;;  %v8710_v13 = vsel %vm2162_vm11, %v8567_v50, %v6363_v57  ;;  %7361 = vpow2.f32 %v2258_v5  ;;  %v8716_v56 = vadd.f32 %v8428_v29, %v8589_v32 }
 0x1e9   : > { %v8697_v21 = vsub.f32 %v8643_v19, %v10804_v45  ;;  %v8702_v47 = vsub.f32 %v8665_v1, %v10806_v4  ;;  %v7356_v18 = vpop.eup %7355  ;;  %v3421_v48 = vand.u32 4294901760, %v2321_v39  ;;  %v10631_v45 = vand.u32 4294901760, %v8710_v13 }
 0x1ea   : > { %v7358_v23 = vpop.eup %7357  ;;  %v2262_v4 = vmul.f32 1.442695, %v2200_v0  ;;  %v8720_v62 = vadd.f32 %v8442_v10, %v8589_v32  ;;  %v8723_v57 = vsub.f32 %v8678_v61, %v2431_v53  ;;  %v10807_v0 = vand.u32 4294901760, %v8369_v44 }
 0x1eb   : > { %10805 = vst [vmem:[#allocation40_spill] sm:$0xff] %v8697_v21  ;;  %v6365_v21 = vadd.f32 -1.0, %v7356_v18  ;;  %v7360_v50 = vpop.eup %7359  ;;  %v8728_v12 = vsub.f32 %v8710_v13, %v10631_v45  ;;  %v6364_v5 = vadd.f32 -1.0, %v7358_v23  ;;  %v10808_v18 = vand.u32 4294901760, %v8402_v30 }
 0x1ec   : > { %v6366_v32 = vadd.f32 -1.0, %v7360_v50  ;;  %7363 = vpow2.f32 %v2262_v4  ;;  %v8742_v61 = vsub.f32 %v2321_v39, %v3421_v48  ;;  %vm2166_vm15 = vcmp.gt.f32.partialorder %v8597_v37, 0.0 }
 0x1ed   : > { %v8734_v29 = vpack.c.bf16 %v10808_v18, %v10807_v0  ;;  %v8740_v10 = vsel %vm2164_vm12, %v8580_v16, %v6365_v21  ;;  %v8748_v44 = vsel %vm2163_vm13, %v8584_v26, %v6364_v5  ;;  %v2199_v30 = vmin.f32 %v8716_v56, 0.0 }
 0x1ee   : > { %v10632_v45 = vand.u32 4294901760, %v8740_v10  ;;  %v10638_v16 = vand.u32 4294901760, %v8748_v44  ;;  %v8758_v23 = vsel %vm2165_vm14, %v8587_v31, %v6366_v32  ;;  %v2201_v39 = vmin.f32 %v8720_v62, 0.0 }
 0x1ef   : > { %6463 = vmatprep.subr.bf16.mxu0 %v8734_v29  ;;  %v10635_v4 = vand.u32 4294901760, %v8758_v23  ;;  %v2260_v50 = vmul.f32 1.442695, %v2199_v30  ;;  %v10809_v5 = vand.u32 4294901760, %v8384_v60  ;;  %v10810_v0 = vand.u32 4294901760, %v8434_v22 }
 0x1f0   : > { %v8764_v26 = vsub.f32 %v8740_v10, %v10632_v45  ;;  %v8776_v31 = vsub.f32 %v8748_v44, %v10638_v16  ;;  %vm2168_vm0 = vcmp.gt.f32.partialorder %v8658_v41, 0.0  ;;  %v2264_v32 = vmul.f32 1.442695, %v2201_v39 }
 0x1f1   : > { %v8771_v18 = vpack.c.bf16 %v10810_v0, %v10809_v5  ;;  %v10811_v21 = vand.u32 4294901760, %v8333_v33  ;;  %v10812_v35 = vand.u32 4294901760, %v8357_v34  ;;  %v10813_v60 = vand.u32 4294901760, %v8347_v52 }
 0x1f2   : > { %v10814_v22 = vand.u32 4294901760, %v8375_v46  ;;  %v8795_v0 = vsub.f32 %v8758_v23, %v10635_v4  ;;  %7365 = vpow2.f32 %v2260_v50  ;;  %v10815_v33 = vand.u32 4294901760, %v8465_v7 }
 0x1f3   : > { %v8783_v45 = vpack.c.bf16 %v10812_v35, %v10811_v21  ;;  %6559 = vmatprep.subr.bf16.mxu1 %v8771_v18  ;;  %v10816_v34 = vand.u32 4294901760, %v8574_v28  ;;  %7367 = vpow2.f32 %v2264_v32  ;;  %v10817_v52 = vand.u32 4294901760, %v8492_v51 }
 0x1f4   : > { %v8789_v30 = vpack.c.bf16 %v10814_v22, %v10813_v60  ;;  %v10818_v46 = vand.u32 4294901760, %v8602_v11  ;;  %v10820_v39 = vand.u32 4294901760, %v8424_v59  ;;  %v10821_v50 = vand.u32 4294901760, %v8477_v17  ;;  %v7362_v22 = vpop.eup %7361 }
 0x1f5   : > { %v8802_v35 = vpack.c.bf16 %v10816_v34, %v10815_v33  ;;  %6465 = vmatpush1.bf16.msra.mxu0 %v8783_v45  ;;  %v10823_v28 = vand.u32 4294901760, %v8440_v55  ;;  %v10824_v32 = vand.u32 4294901760, %v8501_v3  ;;  %v10826_v51 = vand.u32 4294901760, %v8632_v2 }
 0x1f6   : > { %6561 = vmatpush1.bf16.msra.mxu1 %v8789_v30  ;;  %v8810_v21 = vpack.c.bf16 %v10818_v46, %v10817_v52  ;;  %v8816_v7 = vpack.c.bf16 %v10821_v50, %v10820_v39  ;;  %v10828_v33 = vand.u32 4294901760, %v8643_v19  ;;  %v10830_v17 = vand.u32 4294901760, %v8617_v54 }
 0x1f7   : > { %v8822_v60 = vpack.c.bf16 %v10824_v32, %v10823_v28  ;;  %6467 = vmatprep.subr.bf16.mxu0 %v8802_v35  ;;  %v8827_v11 = vpack.c.bf16 %v2431_v53, %v10826_v51  ;;  %v10831_v34 = vand.u32 4294901760, %v8653_v24  ;;  %v10833_v3 = vand.u32 4294901760, %v8626_v38  ;;  %v7364_v32 = vpop.eup %7363 }
 0x1f8   : > { %10819 = vst [vmem:[#allocation41_spill] sm:$0xff] %v8810_v21  ;;  %10822 = vst [vmem:[#allocation42_spill] sm:$0xff] %v8816_v7  ;;  %v8831_v59 = vpack.c.bf16 %v3421_v48, %v10828_v33  ;;  %v10834_v52 = vand.u32 4294901760, %v8665_v1  ;;  %v6367_v39 = vadd.f32 -1.0, %v7362_v22  ;;  %6563 = vmatprep.subr.bf16.mxu1 %v8810_v21  ;;  %v10634_v2 = vand.u32 4294901760, %v8449_v36 }
 0x1f9   : > { %10825 = vst [vmem:[#allocation43_spill] sm:$0xff] %v8822_v60  ;;  %10827 = vst [vmem:[#allocation44_spill] sm:$0xff] %v8827_v11  ;;  %v8837_v55 = vpack.c.bf16 %v10831_v34, %v10830_v17  ;;  %v10633_v19 = vand.u32 4294901760, %v8471_v8  ;;  %v10636_v53 = vand.u32 4294901760, %v8460_v6  ;;  %vm2167_vm2 = vcmp.gt.f32.partialorder %v8716_v56, 0.0  ;;  %6469 = vmatpush1.bf16.msra.mxu0 %v8816_v7 }
 0x1fa   : > { %10829 = vst [vmem:[#allocation45_spill] sm:$0xff] %v8831_v59  ;;  %v8843_v46 = vpack.c.bf16 %v10834_v52, %v10833_v3  ;;  %v10637_v54 = vand.u32 4294901760, %v8522_v25  ;;  %v10836_v24 = vand.u32 4294901760, %v8397_v15  ;;  %v10837_v48 = vand.u32 4294901760, %v8419_v9  ;;  %6565 = vmatpush1.bf16.msra.mxu1 %v8822_v60  ;;  %6471 = vmatprep.subr.bf16.mxu0 %v8827_v11 }
 0x1fb   : > { %10832 = vst [vmem:[#allocation46_spill] sm:$0xff] %v8837_v55  ;;  %v10838_v50 = vand.u32 4294901760, %v8413_v58  ;;  %v2326_v22 = vsel %vm2166_vm15, %v8597_v37, %v6367_v39  ;;  %vm2169_vm3 = vcmp.gt.f32.partialorder %v8720_v62, 0.0  ;;  %v2583_v51 = vsub.f32 %v8449_v36, %v10634_v2  ;;  %6567 = vmatprep.subr.bf16.mxu1 %v8831_v59 }
 0x1fc   : > { %10835 = vst [vmem:[#allocation47_spill] sm:$0xff] %v8843_v46  ;;  %v2589_v38 = vsub.f32 %v8397_v15, %v10836_v24  ;;  %v2601_v1 = vsub.f32 %v8419_v9, %v10837_v48  ;;  %v2595_v33 = vsub.f32 %v8471_v8, %v10633_v19  ;;  %v10639_v17 = vand.u32 4294901760, %v8531_v14 }
 0x1fd   : > { %v3579_v28 = vsub.f32 %v8413_v58, %v10838_v50  ;;  %v2441_v34 = vand.u32 4294901760, %v2326_v22  ;;  %v6369_v3 = vadd.f32 -1.0, %v7364_v32  ;;  %v3573_v37 = vsub.f32 %v8460_v6, %v10636_v53  ;;  %6473 = vmatpush1.bf16.msra.mxu0 %v8837_v55 }
 0x1fe   : > { %v3585_v52 = vsub.f32 %v8522_v25, %v10637_v54  ;;  %v2584_v39 = vand.u32 4294901760, %v2583_v51  ;;  %v2596_v24 = vand.u32 4294901760, %v2595_v33  ;;  %v2590_v48 = vand.u32 4294901760, %v2589_v38  ;;  %6569 = vmatpush1.bf16.msra.mxu1 %v8843_v46 }
 0x1ff   : > { %v2602_v50 = vand.u32 4294901760, %v2601_v1  ;;  %v8881_v19 = vsub.f32 %v2326_v22, %v2441_v34  ;;  %v2328_v32 = vsel %vm2168_vm0, %v8658_v41, %v6369_v3  ;;  %v10839_v2 = vand.u32 4294901760, %v8710_v13  ;;  %v7366_v1 = vpop.eup %7365 }
 0x200   : > { %v3574_v4 = vand.u32 4294901760, %v3573_v37  ;;  %v3431_v53 = vand.u32 4294901760, %v2328_v32  ;;  %v6478_v51 = vpack.c.bf16 %v2596_v24, %v2584_v39  ;;  %v3586_v33 = vand.u32 4294901760, %v3585_v52 }
 0x201   : > { %v8888_v5 = vpack.c.bf16 %v2441_v34, %v10839_v2  ;;  %v6480_v38 = vpack.c.bf16 %v2602_v50, %v2590_v48  ;;  %v3580_v54 = vand.u32 4294901760, %v3579_v28  ;;  %v10841_v16 = vand.u32 4294901760, %v8454_v42  ;;  %v7368_v2 = vpop.eup %7367 }
 0x202   : > { %v2607_v13 = vsub.f32 %v8531_v14, %v10639_v17  ;;  %v8899_v34 = vsub.f32 %v2328_v32, %v3431_v53  ;;  %v6368_v3 = vadd.f32 -1.0, %v7366_v1  ;;  %v10842_v37 = vand.u32 4294901760, %v8740_v10 }
 0x203   : > { %10840 = vst [vmem:[#allocation48_spill] sm:$0xff] %v8888_v5  ;;  %v3591_v41 = vsub.f32 %v8454_v42, %v10841_v16  ;;  %v6574_v39 = vpack.c.bf16 %v3586_v33, %v3574_v4  ;;  %v6370_v24 = vadd.f32 -1.0, %v7368_v2  ;;  %v10641_v50 = vand.u32 4294901760, %v8611_v27 }
 0x204   : > { %v8903_v52 = vpack.c.bf16 %v3431_v53, %v10842_v37  ;;  %v2608_v28 = vand.u32 4294901760, %v2607_v13  ;;  %v2327_v17 = vsel %vm2167_vm2, %v8716_v56, %v6368_v3  ;;  %v10640_v32 = vand.u32 4294901760, %v8545_v49 }
 0x205   : > { %v3592_v48 = vand.u32 4294901760, %v3591_v41  ;;  %v10642_v1 = vand.u32 4294901760, %v8671_v43  ;;  %v2439_v22 = vand.u32 4294901760, %v2327_v17  ;;  %v2329_v10 = vsel %vm2169_vm3, %v8720_v62, %v6370_v24 }
 0x206   : > { %10843 = vst [vmem:[#allocation49_spill] sm:$0xff] %v8903_v52  ;;  %v2619_v53 = vsub.f32 %v8611_v27, %v10641_v50  ;;  %v3429_v33 = vand.u32 4294901760, %v2329_v10  ;;  %v3597_v41 = vsub.f32 %v8545_v49, %v10640_v32  ;;  %v10844_v13 = vand.u32 4294901760, %v8482_v40 }
 0x207   : > { %v6576_v4 = vpack.c.bf16 %v3592_v48, %v3580_v54  ;;  %v3609_v56 = vsub.f32 %v8671_v43, %v10642_v1  ;;  %v8927_v3 = vsub.f32 %v2327_v17, %v2439_v22  ;;  %v10845_v62 = vand.u32 4294901760, %v8748_v44 }
 0x208   : > { %v2613_v2 = vsub.f32 %v8482_v40, %v10844_v13  ;;  %v2620_v37 = vand.u32 4294901760, %v2619_v53  ;;  %v10847_v24 = vand.u32 4294901760, %v8538_v63  ;;  %v8936_v32 = vsub.f32 %v2329_v10, %v3429_v33 }
 0x209   : > { %v8931_v54 = vpack.c.bf16 %v2439_v22, %v10845_v62  ;;  %v10848_v50 = vand.u32 4294901760, %v8758_v23  ;;  %v3598_v16 = vand.u32 4294901760, %v3597_v41  ;;  %v3610_v46 = vand.u32 4294901760, %v3609_v56  ;;  %v10850_v22 = vld [vmem:[#allocation35_spill] sm:$0xff] }
 0x20a   : > { %v2625_v48 = vsub.f32 %v8538_v63, %v10847_v24  ;;  %v6482_v17 = vpack.c.bf16 %v2620_v37, %v2608_v28  ;;  %v2614_v13 = vand.u32 4294901760, %v2613_v2  ;;  %v10851_v62 = vand.u32 4294901760, %v10850_v22  ;;  %v10852_v24 = vld [vmem:[#allocation36_spill] sm:$0xff] }
 0x20b   : > { %10846 = vst [vmem:[#allocation50_spill] sm:$0xff] %v8931_v54  ;;  %v8940_v1 = vpack.c.bf16 %v3429_v33, %v10848_v50  ;;  %6475 = vmatprep.subr.bf16.mxu0 %v8931_v54  ;;  %v6578_v10 = vpack.c.bf16 %v3610_v46, %v3598_v16  ;;  %v10853_v23 = vand.u32 4294901760, %v10852_v24  ;;  %v10854_v33 = vld [vmem:[#allocation39_spill] sm:$0xff]  ;;  %v10650_v56 = vand.u32 4294901760, %v8723_v57  ;;  %v10855_v37 = vld [vmem:[#allocation40_spill] sm:$0xff] }
 0x20c   : > { %v2626_v44 = vand.u32 4294901760, %v2625_v48  ;;  %v3603_v53 = vsub.f32 %v10850_v22, %v10851_v62  ;;  %6477 = vmatpush1.bf16.msra.mxu0 %v8888_v5  ;;  %v10649_v41 = vand.u32 4294901760, %v10854_v33  ;;  %v10659_v48 = vand.u32 4294901760, %v10855_v37 }
 0x20d   : > { %10849 = vst [vmem:[#allocation51_spill] sm:$0xff] %v8940_v1  ;;  %6571 = vmatprep.subr.bf16.mxu1 %v8940_v1  ;;  %v3615_v50 = vsub.f32 %v10852_v24, %v10853_v23  ;;  %6479 = vmatprep.subr.bf16.mxu0 %v6478_v51  ;;  %v10662_v62 = vand.u32 4294901760, %v8742_v61  ;;  %v2643_v16 = vsub.f32 %v8723_v57, %v10650_v56  ;;  %v10856_v23 = vld [vmem:[#allocation37_spill] sm:$0xff]  ;;  %v10862_v7 = vmov 0.0  }
 0x20e   : > { %6573 = vmatpush1.bf16.msra.mxu1 %v8903_v52  ;;  %v6484_v28 = vpack.c.bf16 %v2626_v44, %v2614_v13  ;;  %v3604_v2 = vand.u32 4294901760, %v3603_v53  ;;  %v2631_v46 = vsub.f32 %v10854_v33, %v10649_v41  ;;  %v10857_v1 = vand.u32 4294901760, %v10856_v23  ;;  %v10858_v13 = vld [vmem:[#allocation26_spill] sm:$0xff] }
 0x20f   : > { %6575 = vmatprep.subr.bf16.mxu1 %v6574_v39  ;;  %v3616_v5 = vand.u32 4294901760, %v3615_v50  ;;  %2497 = vmatmul.mubr.f32.vlgmr.msra.gmra.mrb[16].mxu0 %v10858_v13  ;;  %v3621_v44 = vsub.f32 %v10855_v37, %v10659_v48  ;;  %v3633_v39 = vsub.f32 %v8742_v61, %v10662_v62  ;;  %v10859_v53 = vand.u32 4294901760, %v8689_v20  ;;  %v10860_v41 = vld [vmem:[#allocation38_spill] sm:$0xff] }
 0x210   : > { %v2637_v51 = vsub.f32 %v10856_v23, %v10857_v1  ;;  %v10861_v56 = vand.u32 4294901760, %v10860_v41  ;;  %6481 = vmatpush1.bf16.msra.mxu0 %v6480_v38  ;;  %v2632_v54 = vand.u32 4294901760, %v2631_v46  ;;  %v2644_v55 = vand.u32 4294901760, %v2643_v16  ;;  %2502 = vmatprep.mubr.f32.mxu0 %v10862_v7 }
 0x211   : > { %v2649_v50 = vsub.f32 %v8689_v20, %v10859_v53  ;;  %3487 = vmatmul.mubr.f32.vlgmr.msra.gmra.mrb[16].mxu1 %v10858_v13  ;;  %v6580_v1 = vpack.c.bf16 %v3616_v5, %v3604_v2  ;;  %6483 = vmatprep.subr.bf16.mxu0 %v6482_v17  ;;  %v3622_v48 = vand.u32 4294901760, %v3621_v44  ;;  %v3634_v11 = vand.u32 4294901760, %v3633_v39 }
 0x212   : > { %v3627_v52 = vsub.f32 %v10860_v41, %v10861_v56  ;;  %v2638_v59 = vand.u32 4294901760, %v2637_v51  ;;  %6577 = vmatpush1.bf16.msra.mxu1 %v6576_v4  ;;  %v6486_v53 = vpack.c.bf16 %v2644_v55, %v2632_v54  ;;  %v10863_v21 = vand.u32 4294901760, %v8702_v47  ;;  %3492 = vmatprep.mubr.f32.mxu1 %v10862_v7  ;;  %v10864_v4 = vld [vmem:[#allocation27_spill] sm:$0xff] }
 0x213   : > { %v2650_v62 = vand.u32 4294901760, %v2649_v50  ;;  %6579 = vmatprep.subr.bf16.mxu1 %v6578_v10  ;;  %v10672_v38 = vand.u32 4294901760, %v8776_v31  ;;  %v10671_v5 = vand.u32 4294901760, %v8927_v3  ;;  %2508 = vmatmul.mubr.f32.gmra.mrb[18].mxu0 %v10864_v4  ;;  %v6582_v17 = vpack.c.bf16 %v3634_v11, %v3622_v48  ;;  %v10866_v48 = vld [vmem:[#allocation20_spill] sm:$0xff] }
 0x214   : > { %v3628_v60 = vand.u32 4294901760, %v3627_v52  ;;  %v3639_v56 = vsub.f32 %v8702_v47, %v10863_v21  ;;  %v10670_v52 = vand.u32 4294901760, %v8795_v0  ;;  %v10669_v10 = vand.u32 4294901760, %v8936_v32  ;;  %6485 = vmatpush1.bf16.msra.mxu0 %v6484_v28  ;;  %2513 = vmatprep.mubr.f32.mxu0 %v10862_v7 }
 0x215   : > { %v6488_v2 = vpack.c.bf16 %v2650_v62, %v2638_v59  ;;  %3498 = vmatmul.mubr.f32.gmra.mrb[18].mxu1 %v10864_v4  ;;  %v2655_v21 = vsub.f32 %v8776_v31, %v10672_v38  ;;  %v2667_v54 = vsub.f32 %v8927_v3, %v10671_v5  ;;  %v10865_v46 = vand.u32 4294901760, %v8728_v12  ;;  %6487 = vmatprep.subr.bf16.mxu0 %v6486_v53  ;;  %v10867_v62 = vld [vmem:[#allocation23_spill] sm:$0xff] }
 0x216   : > { %v3640_v55 = vand.u32 4294901760, %v3639_v56  ;;  %6581 = vmatpush1.bf16.msra.mxu1 %v6580_v1  ;;  %v3645_v59 = vsub.f32 %v8795_v0, %v10670_v52  ;;  %v3657_v28 = vsub.f32 %v8936_v32, %v10669_v10  ;;  %v10868_v16 = vsub.f32 %v10866_v48, %v10867_v62  ;;  %3503 = vmatprep.mubr.f32.mxu1 %v10862_v7  ;;  %v10870_v56 = vld [vmem:[#allocation28_spill] sm:$0xff] }
 0x217   : > { %v2661_v11 = vsub.f32 %v8728_v12, %v10865_v46  ;;  %v10869_v13 = vand.u32 4294901760, %v8881_v19  ;;  %6583 = vmatprep.subr.bf16.mxu1 %v6582_v17  ;;  %v2656_v50 = vand.u32 4294901760, %v2655_v21  ;;  %v2668_v1 = vand.u32 4294901760, %v2667_v54  ;;  %2519 = vmatmul.mubr.f32.gmra.mrb[20].mxu0 %v10870_v56 }
 0x218   : > { %v2529_v51 = vand.u32 4294901760, %v10868_v16  ;;  %v6584_v39 = vpack.c.bf16 %v3640_v55, %v3628_v60  ;;  %v3646_v4 = vand.u32 4294901760, %v3645_v59  ;;  %v3658_v46 = vand.u32 4294901760, %v3657_v28  ;;  %6489 = vmatpush1.bf16.msra.mxu0 %v6488_v2  ;;  %2524 = vmatprep.mubr.f32.mxu0 %v10862_v7 }
 0x219   : > { %v2673_v44 = vsub.f32 %v8881_v19, %v10869_v13  ;;  %v2662_v53 = vand.u32 4294901760, %v2661_v11  ;;  %v10871_v16 = vand.u32 4294901760, %v8764_v26  ;;  %3509 = vmatmul.mubr.f32.gmra.mrb[20].mxu1 %v10870_v56  ;;  %v6490_v17 = vpack.c.bf16 %v2668_v1, %v2656_v50 }
 0x21a   : > { %v10872_v60 = vand.u32 4294901760, %v8899_v34  ;;  %v6494_v21 = vpack.c.bf16 %v8471_v8, %v8449_v36  ;;  %6585 = vmatpush1.bf16.msra.mxu1 %v6584_v39  ;;  %v6586_v54 = vpack.c.bf16 %v3658_v46, %v3646_v4  ;;  %v6590_v28 = vpack.c.bf16 %v8522_v25, %v8460_v6  ;;  %3514 = vmatprep.mubr.f32.mxu1 %v10862_v7 }
 0x21b   : > { %v2674_v10 = vand.u32 4294901760, %v2673_v44  ;;  %v3651_v52 = vsub.f32 %v8764_v26, %v10871_v16  ;;  %6491 = vmatprep.subr.bf16.mxu0 %v6490_v17  ;;  %v6496_v13 = vpack.c.bf16 %v8419_v9, %v8397_v15  ;;  %2530 = vmatmul.mubr.f32.gmra.mrb[22].mxu0 %v2529_v51  ;;  %v6502_v16 = vpack.c.bf16 %v8723_v57, %v10854_v33 }
 0x21c   : > { %v3663_v55 = vsub.f32 %v8899_v34, %v10872_v60  ;;  %6587 = vmatprep.subr.bf16.mxu1 %v6586_v54  ;;  %v6598_v17 = vpack.c.bf16 %v8742_v61, %v10855_v37  ;;  %2535 = vmatprep.mubr.f32.mxu0 %v10862_v7  ;;  %v6504_v60 = vpack.c.bf16 %v8689_v20, %v10856_v23  ;;  %v10876_v54 = vld [vmem:[#allocation29_spill] sm:$0xff]  ;;  %v10881_v56 = vand.u32 4294901760, %v8471_v8 }
 0x21d   : > { %v6492_v11 = vpack.c.bf16 %v2674_v10, %v2662_v53  ;;  %v3652_v59 = vand.u32 4294901760, %v3651_v52  ;;  %v10873_v10 = vld [vmem:[#allocation21_spill] sm:$0xff]  ;;  %v6594_v53 = vpack.c.bf16 %v8671_v43, %v8545_v49  ;;  %3520 = vmatmul.mubr.f32.gmra.mrb[22].mxu1 %v2529_v51  ;;  %v10883_v44 = vand.u32 4294901760, %v8522_v25 }
 0x21e   : > { %v3664_v2 = vand.u32 4294901760, %v3663_v55  ;;  %v10874_v52 = vld [vmem:[#allocation25_spill] sm:$0xff]  ;;  %3525 = vmatprep.mubr.f32.mxu1 %v10862_v7  ;;  %v10879_v55 = vld [vmem:[#allocation34_spill] sm:$0xff]  ;;  %v10887_v8 = vand.u32 4294901760, %v8454_v42  ;;  %v10889_v25 = vand.u32 4294901760, %v8611_v27 }
 0x21f   : > { %v10875_v50 = vsub.f32 %v10873_v10, %v10874_v52  ;;  %6493 = vmatpush1.bf16.msra.mxu0 %v6492_v11  ;;  %v10877_v11 = vld [vmem:[#allocation31_spill] sm:$0xff]  ;;  %v9064_v51 = vand.u32 4294901760, %v10879_v55 }
 0x220   : > { %v6588_v46 = vpack.c.bf16 %v3664_v2, %v3652_v59  ;;  %6495 = vmatprep.subr.bf16.mxu0 %v6494_v21  ;;  %v10878_v59 = vsub.f32 %v10876_v54, %v10877_v11  ;;  %v6602_v21 = vpack.c.bf16 %v8936_v32, %v8795_v0 }
 0x221   : > { %v2540_v1 = vand.u32 4294901760, %v10875_v50  ;;  %v10884_v50 = vand.u32 4294901760, %v8397_v15  ;;  %v10890_v15 = vand.u32 4294901760, %v8545_v49  ;;  %v10896_v49 = vand.u32 4294901760, %v10854_v33 }
 0x222   : > { %6589 = vmatpush1.bf16.msra.mxu1 %v6588_v46  ;;  %v2551_v2 = vand.u32 4294901760, %v10878_v59  ;;  %v10880_v46 = vand.u32 4294901760, %v8449_v36  ;;  %v10882_v59 = vand.u32 4294901760, %v8460_v6  ;;  %v10886_v36 = vand.u32 4294901760, %v8413_v58 }
 0x223   : > { %6591 = vmatprep.subr.bf16.mxu1 %v6590_v28  ;;  %2541 = vmatmul.mubr.f32.gmra.mrb[24].mxu0 %v2540_v1  ;;  %v10885_v28 = vand.u32 4294901760, %v8419_v9  ;;  %v10888_v6 = vand.u32 4294901760, %v8531_v14  ;;  %v10891_v9 = vand.u32 4294901760, %v8671_v43  ;;  %v10897_v43 = vand.u32 4294901760, %v8723_v57 }
 0x224   : > { %v9070_v39 = vpack.c.bf16 %v10881_v56, %v10880_v46  ;;  %v9076_v5 = vpack.c.bf16 %v10883_v44, %v10882_v59  ;;  %3531 = vmatmul.mubr.f32.gmra.mrb[24].mxu1 %v2540_v1  ;;  %2546 = vmatprep.mubr.f32.mxu0 %v10862_v7  ;;  %v9089_v56 = vpack.c.bf16 %v10887_v8, %v10886_v36  ;;  %v10892_v1 = vand.u32 4294901760, %v8482_v40 }
 0x225   : > { %v9082_v4 = vpack.c.bf16 %v10885_v28, %v10884_v50  ;;  %v9095_v44 = vpack.c.bf16 %v10889_v25, %v10888_v6  ;;  %v9101_v50 = vpack.c.bf16 %v10891_v9, %v10890_v15  ;;  %3536 = vmatprep.mubr.f32.mxu1 %v10862_v7  ;;  %v10893_v46 = vand.u32 4294901760, %v8538_v63 }
 0x226   : > { %v10894_v28 = vand.u32 4294901760, %v10850_v22  ;;  %v10895_v36 = vand.u32 4294901760, %v10852_v24  ;;  %v9120_v6 = vpack.c.bf16 %v10897_v43, %v10896_v49  ;;  %v10898_v25 = vand.u32 4294901760, %v10855_v37 }
 0x227   : > { %v9108_v59 = vpack.c.bf16 %v10893_v46, %v10892_v1  ;;  %v10899_v15 = vand.u32 4294901760, %v8742_v61  ;;  %v10900_v1 = vand.u32 4294901760, %v10856_v23  ;;  %v10901_v46 = vand.u32 4294901760, %v8689_v20  ;;  %2552 = vmatmul.mubr.f32.gmra.mrb[26].mxu0 %v2551_v2  ;;  %v10908_v20 = vld [vmem:[#allocation30_spill] sm:$0xff] }
 0x228   : > { %v9114_v8 = vpack.c.bf16 %v10895_v36, %v10894_v28  ;;  %v10902_v28 = vand.u32 4294901760, %v10860_v41  ;;  %v10903_v33 = vand.u32 4294901760, %v8702_v47  ;;  %v10904_v57 = vand.u32 4294901760, %v8776_v31  ;;  %3542 = vmatmul.mubr.f32.gmra.mrb[26].mxu1 %v2551_v2  ;;  %2557 = vmatprep.mubr.f32.mxu0 %v10862_v7 }
 0x229   : > { %v9126_v9 = vpack.c.bf16 %v10899_v15, %v10898_v25  ;;  %v9132_v38 = vpack.c.bf16 %v10901_v46, %v10900_v1  ;;  %v10905_v37 = vand.u32 4294901760, %v8927_v3  ;;  %v10906_v61 = vand.u32 4294901760, %v8795_v0  ;;  %v10909_v25 = vld [vmem:[#allocation32_spill] sm:$0xff]  ;;  %3547 = vmatprep.mubr.f32.mxu1 %v10862_v7 }
 0x22a   : > { %v9138_v36 = vpack.c.bf16 %v10903_v33, %v10902_v28  ;;  %v10907_v23 = vand.u32 4294901760, %v8936_v32  ;;  %v10910_v15 = vsub.f32 %v10908_v20, %v10909_v25  ;;  %v2572_v46 = vsub.f32 %v10879_v55, %v9064_v51 }
 0x22b   : > { %v9144_v49 = vpack.c.bf16 %v10905_v37, %v10904_v57  ;;  %v10911_v28 = vand.u32 4294901760, %v8728_v12  ;;  %v10912_v33 = vand.u32 4294901760, %v8881_v19  ;;  %v10913_v0 = vand.u32 4294901760, %v8764_v26 }
 0x22c   : > { %v9150_v43 = vpack.c.bf16 %v10907_v23, %v10906_v61  ;;  %v2562_v1 = vand.u32 4294901760, %v10910_v15  ;;  %v10914_v32 = vand.u32 4294901760, %v8899_v34  ;;  %v2573_v61 = vand.u32 4294901760, %v2572_v46  ;;  %v10915_v23 = vld [vmem:[#allocation9_spill] sm:$0xff]  ;;  %v10941_v46 = vld [vmem:[#allocation50_spill] sm:$0xff] }
 0x22d   : > { %v9161_v57 = vpack.c.bf16 %v10912_v33, %v10911_v28  ;;  %v10916_v2 = vpack.c.bf16 %v8454_v42, %v8413_v58  ;;  %v10917_v15 = vpack.c.bf16 %v8611_v27, %v8531_v14  ;;  %v10920_v58 = vpack.c.bf16 %v10852_v24, %v10850_v22  ;;  %v10921_v42 = vld [vmem:[#allocation11_spill] sm:$0xff]  ;;  %v10933_v22 = vld [vmem:[#allocation13_spill] sm:$0xff]  ;;  %v10934_v24 = vld [vmem:[#allocation42_spill] sm:$0xff] }
 0x22e   : > { %v9167_v37 = vpack.c.bf16 %v10914_v32, %v10913_v0  ;;  %2563 = vmatmul.mubr.f32.gmra.mrb[28].mxu0 %v2562_v1  ;;  %3553 = vmatmul.mubr.f32.gmra.mrb[28].mxu1 %v2562_v1  ;;  %v10918_v1 = vld [vmem:[#allocation10_spill] sm:$0xff]  ;;  %v10924_v14 = vld [vmem:[#allocation15_spill] sm:$0xff]  ;;  %v10925_v27 = vpack.c.bf16 %v8881_v19, %v8728_v12  ;;  %v10930_v19 = vld [vmem:[#allocation33_spill] sm:$0xff] }
 0x22f   : > { %2568 = vmatprep.mubr.f32.mxu0 %v10862_v7  ;;  %3558 = vmatprep.mubr.f32.mxu1 %v10862_v7  ;;  %v10928_v12 = vld [vmem:[#allocation22_spill] sm:$0xff]  ;;  %v10942_v28 = vld [vmem:[#allocation51_spill] sm:$0xff]  ;;  %v10943_v33 = vld [vmem:[#allocation48_spill] sm:$0xff] }
 0x230   : > { %v10944_v0 = vld [vmem:[#allocation49_spill] sm:$0xff] }
 0x232   : > { %2574 = vmatmul.mubr.f32.gmra.mrb[30].mxu0 %v2573_v61  ;;  %3564 = vmatmul.mubr.f32.gmra.mrb[30].mxu1 %v2573_v61 }
 0x233   : > { %2724 = vmatprep.mubr.f32.mxu0 %v10862_v7  ;;  %3714 = vmatprep.mubr.f32.mxu1 %v10862_v7 }
 0x236   : > { %2726 = vmatmul.mubr.f32.vlgmr.msra.gmra.mrb[16].mxu0 %v10915_v23  ;;  %3716 = vmatmul.mubr.f32.vlgmr.msra.gmra.mrb[16].mxu1 %v10915_v23 }
 0x237   : > { %6497 = vmatpush1.bf16.msra.mxu0 %v6496_v13  ;;  %6593 = vmatpush1.bf16.msra.mxu1 %v10916_v2  ;;  %v10919_v13 = vpack.c.bf16 %v8538_v63, %v8482_v40  ;;  %v10922_v40 = vpack.c.bf16 %v8702_v47, %v10860_v41  ;;  %v10923_v63 = vpack.c.bf16 %v8927_v3, %v8776_v31  ;;  %v10927_v31 = vld [vmem:[#allocation16_spill] sm:$0xff]  ;;  %v10932_v3 = vld [vmem:[#allocation41_spill] sm:$0xff]  ;;  %v10935_v41 = vld [vmem:[#allocation43_spill] sm:$0xff] }
 0x238   : > { %6499 = vmatprep.subr.bf16.mxu0 %v10917_v15  ;;  %6595 = vmatprep.subr.bf16.mxu1 %v6594_v53  ;;  %v10926_v47 = vpack.c.bf16 %v8899_v34, %v8764_v26  ;;  %v10929_v26 = vld [vmem:[#allocation24_spill] sm:$0xff] }
 0x239   : > { %2731 = vmatprep.mubr.f32.mxu0 %v10862_v7  ;;  %3721 = vmatprep.mubr.f32.mxu1 %v10862_v7  ;;  %v10931_v34 = vld [vmem:[#allocation12_spill] sm:$0xff] }
 0x23a   : > { %2733 = vmatmul.mubr.f32.gmra.mrb[18].mxu0 %v10918_v1  ;;  %3723 = vmatmul.mubr.f32.gmra.mrb[18].mxu1 %v10918_v1  ;;  %v10936_v53 = vld [vmem:[#allocation44_spill] sm:$0xff] }
 0x23b   : > { %6501 = vmatpush1.bf16.msra.mxu0 %v10919_v13  ;;  %6597 = vmatpush1.bf16.msra.mxu1 %v10920_v58 }
 0x23c   : > { %6503 = vmatprep.subr.bf16.mxu0 %v6502_v16  ;;  %6599 = vmatprep.subr.bf16.mxu1 %v6598_v17  ;;  %v10937_v16 = vld [vmem:[#allocation45_spill] sm:$0xff]  ;;  %v10938_v17 = vld [vmem:[#allocation14_spill] sm:$0xff] }
 0x23d   : > { %2738 = vmatprep.mubr.f32.mxu0 %v10862_v7  ;;  %3728 = vmatprep.mubr.f32.mxu1 %v10862_v7 }
 0x23e   : > { %2740 = vmatmul.mubr.f32.gmra.mrb[20].mxu0 %v10921_v42  ;;  %3730 = vmatmul.mubr.f32.gmra.mrb[20].mxu1 %v10921_v42 }
 0x23f   : > { %6505 = vmatpush1.bf16.msra.mxu0 %v6504_v60  ;;  %6601 = vmatpush1.bf16.msra.mxu1 %v10922_v40  ;;  %v10939_v60 = vld [vmem:[#allocation46_spill] sm:$0xff] }
 0x240   : > { %6507 = vmatprep.subr.bf16.mxu0 %v10923_v63  ;;  %6603 = vmatprep.subr.bf16.mxu1 %v6602_v21  ;;  %v10940_v21 = vld [vmem:[#allocation47_spill] sm:$0xff] }
 0x241   : > { %2745 = vmatprep.mubr.f32.mxu0 %v10862_v7  ;;  %3735 = vmatprep.mubr.f32.mxu1 %v10862_v7 }
 0x242   : > { %2747 = vmatmul.mubr.f32.gmra.mrb[22].mxu0 %v10924_v14  ;;  %3737 = vmatmul.mubr.f32.gmra.mrb[22].mxu1 %v10924_v14 }
 0x243   : > { %6509 = vmatpush1.bf16.msra.mxu0 %v10925_v27  ;;  %6605 = vmatpush1.bf16.msra.mxu1 %v10926_v47 }
 0x244   : > { %6511 = vmatprep.subr.bf16.mxu0 %v8734_v29  ;;  %6607 = vmatprep.subr.bf16.mxu1 %v8771_v18 }
 0x245   : > { %2752 = vmatprep.mubr.f32.mxu0 %v10862_v7  ;;  %3742 = vmatprep.mubr.f32.mxu1 %v10862_v7 }
 0x246   : > { %2754 = vmatmul.mubr.f32.gmra.mrb[24].mxu0 %v10927_v31  ;;  %3744 = vmatmul.mubr.f32.gmra.mrb[24].mxu1 %v10927_v31 }
 0x247   : > { %2759 = vmatprep.mubr.f32.mxu0 %v10862_v7  ;;  %3749 = vmatprep.mubr.f32.mxu1 %v10862_v7 }
 0x24a   : > { %2761 = vmatmul.mubr.f32.gmra.mrb[26].mxu0 %v10928_v12  ;;  %3751 = vmatmul.mubr.f32.gmra.mrb[26].mxu1 %v10928_v12 }
 0x24b   : > { %2766 = vmatprep.mubr.f32.mxu0 %v10862_v7  ;;  %3756 = vmatprep.mubr.f32.mxu1 %v10862_v7 }
 0x24e   : > { %2768 = vmatmul.mubr.f32.gmra.mrb[28].mxu0 %v10929_v26  ;;  %3758 = vmatmul.mubr.f32.gmra.mrb[28].mxu1 %v10929_v26 }
 0x24f   : > { %2773 = vmatprep.mubr.f32.mxu0 %v10862_v7  ;;  %3763 = vmatprep.mubr.f32.mxu1 %v10862_v7 }
 0x252   : > { %2775 = vmatmul.mubr.f32.gmra.mrb[30].mxu0 %v10930_v19  ;;  %3765 = vmatmul.mubr.f32.gmra.mrb[30].mxu1 %v10930_v19 }
 0x253   : > { %2877 = vmatprep.mubr.f32.mxu0 %v10862_v7  ;;  %3867 = vmatprep.mubr.f32.mxu1 %v10862_v7 }
 0x256   : > { %2880 = vmatmul.mubr.f32.vlgmr.msra.gmra.mrb[16].mxu0 %v10931_v34  ;;  %3870 = vmatmul.mubr.f32.vlgmr.msra.gmra.mrb[16].mxu1 %v10931_v34 }
 0x257   : > { %6513 = vmatpush1.bf16.msra.mxu0 %v8783_v45  ;;  %6609 = vmatpush1.bf16.msra.mxu1 %v8789_v30 }
 0x258   : > { %6515 = vmatprep.subr.bf16.mxu0 %v8802_v35  ;;  %6611 = vmatprep.subr.bf16.mxu1 %v10932_v3 }
 0x259   : > { %2885 = vmatprep.mubr.f32.mxu0 %v10862_v7  ;;  %3875 = vmatprep.mubr.f32.mxu1 %v10862_v7 }
 0x25a   : > { %2888 = vmatmul.mubr.f32.gmra.mrb[18].mxu0 %v10933_v22  ;;  %3878 = vmatmul.mubr.f32.gmra.mrb[18].mxu1 %v10933_v22 }
 0x25b   : > { %6517 = vmatpush1.bf16.msra.mxu0 %v10934_v24  ;;  %6613 = vmatpush1.bf16.msra.mxu1 %v10935_v41 }
 0x25c   : > { %6519 = vmatprep.subr.bf16.mxu0 %v10936_v53  ;;  %6615 = vmatprep.subr.bf16.mxu1 %v10937_v16 }
 0x25d   : > { %2893 = vmatprep.mubr.f32.mxu0 %v10862_v7  ;;  %3883 = vmatprep.mubr.f32.mxu1 %v10862_v7 }
 0x25e   : > { %2896 = vmatmul.mubr.f32.gmra.mrb[20].mxu0 %v10938_v17  ;;  %3886 = vmatmul.mubr.f32.gmra.mrb[20].mxu1 %v10938_v17 }
 0x25f   : > { %6521 = vmatpush1.bf16.msra.mxu0 %v10939_v60  ;;  %6617 = vmatpush1.bf16.msra.mxu1 %v10940_v21 }
 0x260   : > { %6523 = vmatprep.subr.bf16.mxu0 %v10941_v46  ;;  %6619 = vmatprep.subr.bf16.mxu1 %v10942_v28 }
 0x261   : > { %2901 = vmatprep.mubr.f32.mxu0 %v10862_v7  ;;  %3891 = vmatprep.mubr.f32.mxu1 %v10862_v7 }
 0x262   : > { %2904 = vmatmul.mubr.f32.gmra.mrb[22].mxu0 %v10866_v48  ;;  %3894 = vmatmul.mubr.f32.gmra.mrb[22].mxu1 %v10866_v48  ;;  %v10946_v48 = vld [vmem:[#allocation18_spill] sm:$0xff] }
 0x263   : > { %6525 = vmatpush1.bf16.msra.mxu0 %v10943_v33  ;;  %6621 = vmatpush1.bf16.msra.mxu1 %v10944_v0 }
 0x264   : > { %6527 = vmatprep.subr.bf16.mxu0 %v9070_v39  ;;  %6623 = vmatprep.subr.bf16.mxu1 %v9076_v5  ;;  %v10945_v5 = vld [vmem:[#allocation17_spill] sm:$0xff]  ;;  %v10947_v39 = vld [vmem:[#allocation19_spill] sm:$0xff] }
 0x265   : > { %2909 = vmatprep.mubr.f32.mxu0 %v10862_v7  ;;  %3899 = vmatprep.mubr.f32.mxu1 %v10862_v7 }
 0x266   : > { %2912 = vmatmul.mubr.f32.gmra.mrb[24].mxu0 %v10873_v10  ;;  %3902 = vmatmul.mubr.f32.gmra.mrb[24].mxu1 %v10873_v10 }
 0x267   : > { %2917 = vmatprep.mubr.f32.mxu0 %v10862_v7  ;;  %3907 = vmatprep.mubr.f32.mxu1 %v10862_v7 }
 0x26a   : > { %2920 = vmatmul.mubr.f32.gmra.mrb[26].mxu0 %v10876_v54  ;;  %3910 = vmatmul.mubr.f32.gmra.mrb[26].mxu1 %v10876_v54 }
 0x26b   : > { %2925 = vmatprep.mubr.f32.mxu0 %v10862_v7  ;;  %3915 = vmatprep.mubr.f32.mxu1 %v10862_v7 }
 0x26e   : > { %2928 = vmatmul.mubr.f32.gmra.mrb[28].mxu0 %v10908_v20  ;;  %3918 = vmatmul.mubr.f32.gmra.mrb[28].mxu1 %v10908_v20 }
 0x26f   : > { %2933 = vmatprep.mubr.f32.mxu0 %v10862_v7  ;;  %3923 = vmatprep.mubr.f32.mxu1 %v10862_v7 }
 0x272   : > { %2936 = vmatmul.mubr.f32.gmra.mrb[30].mxu0 %v10879_v55  ;;  %3926 = vmatmul.mubr.f32.gmra.mrb[30].mxu1 %v10879_v55 }
 0x273   : > { %3022 = vmatprep.mubr.f32.mxu0 %v10862_v7  ;;  %4012 = vmatprep.mubr.f32.mxu1 %v10862_v7 }
 0x276   : > { %3026 = vmatmul.mubr.f32.vlgmr.msra.gmra.mrb[16].mxu0 %v10945_v5  ;;  %4016 = vmatmul.mubr.f32.vlgmr.msra.gmra.mrb[16].mxu1 %v10945_v5 }
 0x277   : > { %6529 = vmatpush1.bf16.msra.mxu0 %v9082_v4  ;;  %6625 = vmatpush1.bf16.msra.mxu1 %v9089_v56  ;;  %v2354_v56 = vpop.permute.xlu1 %2353 }
 0x278   : > { %6531 = vmatprep.subr.bf16.mxu0 %v9095_v44  ;;  %6627 = vmatprep.subr.bf16.mxu1 %v9101_v50 }
 0x279   : > { %3031 = vmatprep.mubr.f32.mxu0 %v10862_v7  ;;  %4021 = vmatprep.mubr.f32.mxu1 %v10862_v7 }
 0x27a   : > { %3035 = vmatmul.mubr.f32.gmra.mrb[18].mxu0 %v10946_v48  ;;  %4025 = vmatmul.mubr.f32.gmra.mrb[18].mxu1 %v10946_v48 }
 0x27b   : > { %6533 = vmatpush1.bf16.msra.mxu0 %v9108_v59  ;;  %6629 = vmatpush1.bf16.msra.mxu1 %v9114_v8  ;;  %v9449_v34 = vpop.permute.xlu1 %2363 }
 0x27c   : > { %6535 = vmatprep.subr.bf16.mxu0 %v9120_v6  ;;  %6631 = vmatprep.subr.bf16.mxu1 %v9126_v9 }
 0x27d   : > { %3040 = vmatprep.mubr.f32.mxu0 %v10862_v7  ;;  %4030 = vmatprep.mubr.f32.mxu1 %v10862_v7 }
 0x27e   : > { %3044 = vmatmul.mubr.f32.gmra.mrb[20].mxu0 %v10947_v39  ;;  %4034 = vmatmul.mubr.f32.gmra.mrb[20].mxu1 %v10947_v39 }
 0x27f   : > { %6537 = vmatpush1.bf16.msra.mxu0 %v9132_v38  ;;  %6633 = vmatpush1.bf16.msra.mxu1 %v9138_v36 }
 0x280   : > { %6539 = vmatprep.subr.bf16.mxu0 %v9144_v49  ;;  %6635 = vmatprep.subr.bf16.mxu1 %v9150_v43 }
 0x281   : > { %3049 = vmatprep.mubr.f32.mxu0 %v10862_v7  ;;  %4039 = vmatprep.mubr.f32.mxu1 %v10862_v7 }
 0x282   : > { %3053 = vmatmul.mubr.f32.gmra.mrb[22].mxu0 %v10867_v62  ;;  %4043 = vmatmul.mubr.f32.gmra.mrb[22].mxu1 %v10867_v62 }
 0x283   : > { %6541 = vmatpush1.bf16.msra.mxu0 %v9161_v57  ;;  %6637 = vmatpush1.bf16.msra.mxu1 %v9167_v37 }
 0x284   : > { %6543 = vmatprep.subr.bf16.mxu0 %v8734_v29  ;;  %6639 = vmatprep.subr.bf16.mxu1 %v8771_v18 }
 0x285   : > { %3058 = vmatprep.mubr.f32.mxu0 %v10862_v7  ;;  %4048 = vmatprep.mubr.f32.mxu1 %v10862_v7 }
 0x286   : > { %3062 = vmatmul.mubr.f32.gmra.mrb[24].mxu0 %v10874_v52  ;;  %4052 = vmatmul.mubr.f32.gmra.mrb[24].mxu1 %v10874_v52 }
 0x287   : > { %3067 = vmatprep.mubr.f32.mxu0 %v10862_v7  ;;  %4057 = vmatprep.mubr.f32.mxu1 %v10862_v7 }
 0x28a   : > { %3071 = vmatmul.mubr.f32.gmra.mrb[26].mxu0 %v10877_v11  ;;  %4061 = vmatmul.mubr.f32.gmra.mrb[26].mxu1 %v10877_v11 }
 0x28b   : > { %3076 = vmatprep.mubr.f32.mxu0 %v10862_v7  ;;  %4066 = vmatprep.mubr.f32.mxu1 %v10862_v7 }
 0x28e   : > { %3080 = vmatmul.mubr.f32.gmra.mrb[28].mxu0 %v10909_v25  ;;  %4070 = vmatmul.mubr.f32.gmra.mrb[28].mxu1 %v10909_v25 }
 0x28f   : > { %3085 = vmatprep.mubr.f32.mxu0 %v10862_v7  ;;  %4075 = vmatprep.mubr.f32.mxu1 %v10862_v7 }
 0x292   : > { %3089 = vmatmul.mubr.f32.gmra.mrb[30].mxu0 %v9064_v51  ;;  %4079 = vmatmul.mubr.f32.gmra.mrb[30].mxu1 %v9064_v51 }
 0x293   : > { %3207 = vmatprep.mubr.f32.mxu0 %v10862_v7  ;;  %4197 = vmatprep.mubr.f32.mxu1 %v10862_v7 }
 0x296   : > { %3209 = vmatmul.mubr.f32.vlgmr.msra.gmra.mrb[16].mxu0 %v10915_v23  ;;  %4199 = vmatmul.mubr.f32.vlgmr.msra.gmra.mrb[16].mxu1 %v10915_v23 }
 0x297   : > { %6545 = vmatpush1.bf16.msra.mxu0 %v8783_v45  ;;  %6641 = vmatpush1.bf16.msra.mxu1 %v8789_v30  ;;  %v4583_v45 = vld [vmem:[%s10562_s6] sm:$0xf]  ;;  %v2349_v30 = vpop.permute.xlu0 %2348 }
 0x298   : > { %6547 = vmatprep.subr.bf16.mxu0 %v8802_v35  ;;  %6643 = vmatprep.subr.bf16.mxu1 %v10932_v3  ;;  %v4591_v29 = vsel %vm2386_vm1, %v4583_v45, 0 }
 0x299   : > { %3214 = vmatprep.mubr.f32.mxu0 %v10862_v7  ;;  %4204 = vmatprep.mubr.f32.mxu1 %v10862_v7  ;;  %v9411_v18 = vand.u32 4294901760, %v4591_v29 }
 0x29a   : > { %3216 = vmatmul.mubr.f32.gmra.mrb[18].mxu0 %v10918_v1  ;;  %4206 = vmatmul.mubr.f32.gmra.mrb[18].mxu1 %v10918_v1 }
 0x29b   : > { %6549 = vmatpush1.bf16.msra.mxu0 %v10934_v24  ;;  %6645 = vmatpush1.bf16.msra.mxu1 %v10935_v41  ;;  %10948 = vst [vmem:[#allocation35_spill] sm:$0xff] %v9411_v18  ;;  %v9423_v11 = vsub.f32 %v4591_v29, %v9411_v18  ;;  %v2359_v2 = vpop.permute.xlu0 %2358 }
 0x29c   : > { %6551 = vmatprep.subr.bf16.mxu0 %v10936_v53  ;;  %6647 = vmatprep.subr.bf16.mxu1 %v10937_v16 }
 0x29d   : > { %3221 = vmatprep.mubr.f32.mxu0 %v10862_v7  ;;  %4211 = vmatprep.mubr.f32.mxu1 %v10862_v7  ;;  %10949 = vst [vmem:[#allocation36_spill] sm:$0xff] %v9423_v11 }
 0x29e   : > { %3223 = vmatmul.mubr.f32.gmra.mrb[20].mxu0 %v10921_v42  ;;  %4213 = vmatmul.mubr.f32.gmra.mrb[20].mxu1 %v10921_v42 }
 0x29f   : > { %6553 = vmatpush1.bf16.msra.mxu0 %v10939_v60  ;;  %6649 = vmatpush1.bf16.msra.mxu1 %v10940_v21 }
 0x2a0   : > { %6555 = vmatprep.subr.bf16.mxu0 %v10941_v46  ;;  %6651 = vmatprep.subr.bf16.mxu1 %v10942_v28 }
 0x2a1   : > { %3228 = vmatprep.mubr.f32.mxu0 %v10862_v7  ;;  %4218 = vmatprep.mubr.f32.mxu1 %v10862_v7 }
 0x2a2   : > { %3230 = vmatmul.mubr.f32.gmra.mrb[22].mxu0 %v10924_v14  ;;  %4220 = vmatmul.mubr.f32.gmra.mrb[22].mxu1 %v10924_v14 }
 0x2a3   : > { %6557 = vmatpush1.bf16.msra.mxu0 %v10943_v33  ;;  %6653 = vmatpush1.bf16.msra.mxu1 %v10944_v0 }
 0x2a4   : > { %3235 = vmatprep.mubr.f32.mxu0 %v10862_v7  ;;  %4225 = vmatprep.mubr.f32.mxu1 %v10862_v7 }
 0x2a6   : > { %3237 = vmatmul.mubr.f32.gmra.mrb[24].mxu0 %v10927_v31  ;;  %4227 = vmatmul.mubr.f32.gmra.mrb[24].mxu1 %v10927_v31 }
 0x2a7   : > { %3242 = vmatprep.mubr.f32.mxu0 %v10862_v7  ;;  %4232 = vmatprep.mubr.f32.mxu1 %v10862_v7 }
 0x2aa   : > { %3244 = vmatmul.mubr.f32.gmra.mrb[26].mxu0 %v10928_v12  ;;  %4234 = vmatmul.mubr.f32.gmra.mrb[26].mxu1 %v10928_v12 }
 0x2ab   : > { %3249 = vmatprep.mubr.f32.mxu0 %v10862_v7  ;;  %4239 = vmatprep.mubr.f32.mxu1 %v10862_v7 }
 0x2ae   : > { %3251 = vmatmul.mubr.f32.gmra.mrb[28].mxu0 %v10929_v26  ;;  %4241 = vmatmul.mubr.f32.gmra.mrb[28].mxu1 %v10929_v26 }
 0x2af   : > { %3256 = vmatprep.mubr.f32.mxu0 %v10862_v7  ;;  %4246 = vmatprep.mubr.f32.mxu1 %v10862_v7 }
 0x2b2   : > { %3258 = vmatmul.mubr.f32.gmra.mrb[30].mxu0 %v10930_v19  ;;  %4248 = vmatmul.mubr.f32.gmra.mrb[30].mxu1 %v10930_v19 }
 0x2b3   : > { %3344 = vmatprep.mubr.f32.mxu0 %v10862_v7  ;;  %4334 = vmatprep.mubr.f32.mxu1 %v10862_v7 }
 0x2b6   : > { %3346 = vmatmul.mubr.f32.vlgmr.msra.gmra.mrb[16].mxu0 %v10915_v23  ;;  %4336 = vmatmul.mubr.f32.vlgmr.msra.gmra.mrb[16].mxu1 %v10915_v23  ;;  %v9436_v23 = vand.u32 4294901760, %v9423_v11 }
 0x2b7   : > { %3351 = vmatprep.mubr.f32.mxu0 %v10862_v7  ;;  %4341 = vmatprep.mubr.f32.mxu1 %v10862_v7 }
 0x2b8   : > { %10950 = vst [vmem:[#allocation39_spill] sm:$0xff] %v9436_v23 }
 0x2ba   : > { %3353 = vmatmul.mubr.f32.gmra.mrb[18].mxu0 %v10918_v1  ;;  %4343 = vmatmul.mubr.f32.gmra.mrb[18].mxu1 %v10918_v1 }
 0x2bb   : > { %3358 = vmatprep.mubr.f32.mxu0 %v10862_v7  ;;  %4348 = vmatprep.mubr.f32.mxu1 %v10862_v7 }
 0x2be   : > { %3360 = vmatmul.mubr.f32.gmra.mrb[20].mxu0 %v10921_v42  ;;  %4350 = vmatmul.mubr.f32.gmra.mrb[20].mxu1 %v10921_v42 }
 0x2bf   : > { %3365 = vmatprep.mubr.f32.mxu0 %v10862_v7  ;;  %4355 = vmatprep.mubr.f32.mxu1 %v10862_v7 }
 0x2c2   : > { %3367 = vmatmul.mubr.f32.gmra.mrb[22].mxu0 %v10924_v14  ;;  %4357 = vmatmul.mubr.f32.gmra.mrb[22].mxu1 %v10924_v14 }
 0x2c3   : > { %3372 = vmatprep.mubr.f32.mxu0 %v10862_v7  ;;  %4362 = vmatprep.mubr.f32.mxu1 %v10862_v7 }
 0x2c6   : > { %3374 = vmatmul.mubr.f32.gmra.mrb[24].mxu0 %v10927_v31  ;;  %4364 = vmatmul.mubr.f32.gmra.mrb[24].mxu1 %v10927_v31 }
 0x2c7   : > { %3379 = vmatprep.mubr.f32.mxu0 %v10862_v7  ;;  %4369 = vmatprep.mubr.f32.mxu1 %v10862_v7 }
 0x2ca   : > { %3381 = vmatmul.mubr.f32.gmra.mrb[26].mxu0 %v10928_v12  ;;  %4371 = vmatmul.mubr.f32.gmra.mrb[26].mxu1 %v10928_v12 }
 0x2cb   : > { %3386 = vmatprep.mubr.f32.mxu0 %v10862_v7  ;;  %4376 = vmatprep.mubr.f32.mxu1 %v10862_v7 }
 0x2ce   : > { %3388 = vmatmul.mubr.f32.gmra.mrb[28].mxu0 %v10929_v26  ;;  %4378 = vmatmul.mubr.f32.gmra.mrb[28].mxu1 %v10929_v26 }
 0x2cf   : > { %3393 = vmatprep.mubr.f32.mxu0 %v10862_v7  ;;  %4383 = vmatprep.mubr.f32.mxu1 %v10862_v7 }
 0x2d2   : > { %3395 = vmatmul.mubr.f32.gmra.mrb[30].mxu0 %v10930_v19  ;;  %4385 = vmatmul.mubr.f32.gmra.mrb[30].mxu1 %v10930_v19  ;;  %v4677_v19 = vsub.f32 %v9423_v11, %v9436_v23 }
 0x2d3   : > { %4673 = vmatprep.mubr.f32.mxu0 %v10862_v7  ;;  %5320 = vmatprep.mubr.f32.mxu1 %v10862_v7 }
 0x2d4   : > { %v9466_v48 = vand.u32 4294901760, %v4677_v19 }
 0x2d6   : > { %10951 = vst [vmem:[#allocation40_spill] sm:$0xff] %v9466_v48 }
 0x389   : > { %v3347_v35 = vpop.f32.mrb[16].mxu0  ;;  %v4337_v62 = vpop.f32.mrb[16].mxu1 }
 0x38a   : > { %v9413_v38 = vadd.f32 %v3347_v35, %v2349_v30  ;;  %v3349_v10 = vpop.f32.mrb[17].mxu0  ;;  %v9415_v52 = vadd.f32 %v4337_v62, %v2349_v30  ;;  %v4339_v55 = vpop.f32.mrb[17].mxu1 }
 0x38b   : > { %v9417_v4 = vadd.f32 %v3349_v10, %v2349_v30  ;;  %v9420_v54 = vadd.f32 %v4339_v55, %v2349_v30 }
 0x38c   : > { %v4423_v51 = vmin.f32 %v9413_v38, 0.0  ;;  %v4425_v44 = vmin.f32 %v9415_v52, 0.0  ;;  %vm4391_vm1 = vcmp.gt.f32.partialorder %v9413_v38, 0.0  ;;  %vm4393_vm4 = vcmp.gt.f32.partialorder %v9415_v52, 0.0 }
 0x38d   : > { %v4424_v50 = vmin.f32 %v9417_v4, 0.0  ;;  %v3354_v59 = vpop.f32.mrb[18].mxu0  ;;  %v4426_v6 = vmin.f32 %v9420_v54, 0.0  ;;  %v4344_v36 = vpop.f32.mrb[18].mxu1  ;;  %vm4392_vm5 = vcmp.gt.f32.partialorder %v9417_v4, 0.0  ;;  %vm4394_vm6 = vcmp.gt.f32.partialorder %v9420_v54, 0.0 }
 0x38e   : > { %v4455_v8 = vmul.f32 1.442695, %v4423_v51  ;;  %v9428_v9 = vadd.f32 %v3354_v59, %v2354_v56  ;;  %v3356_v49 = vpop.f32.mrb[19].mxu0  ;;  %v4459_v43 = vmul.f32 1.442695, %v4425_v44  ;;  %v9430_v25 = vadd.f32 %v4344_v36, %v2354_v56  ;;  %v4346_v32 = vpop.f32.mrb[19].mxu1 }
 0x38f   : > { %v4457_v20 = vmul.f32 1.442695, %v4424_v50  ;;  %v9432_v57 = vadd.f32 %v3356_v49, %v2354_v56  ;;  %v4461_v37 = vmul.f32 1.442695, %v4426_v6  ;;  %v9440_v42 = vadd.f32 %v4346_v32, %v2354_v56 }
 0x390   : > { %7369 = vpow2.f32 %v4455_v8  ;;  %v4427_v61 = vmin.f32 %v9428_v9, 0.0  ;;  %v4429_v15 = vmin.f32 %v9430_v25, 0.0  ;;  %vm4395_vm7 = vcmp.gt.f32.partialorder %v9428_v9, 0.0 }
 0x391   : > { %7371 = vpow2.f32 %v4459_v43  ;;  %v3361_v1 = vpop.f32.mrb[20].mxu0  ;;  %v4428_v58 = vmin.f32 %v9432_v57, 0.0  ;;  %v4351_v40 = vpop.f32.mrb[20].mxu1  ;;  %v4430_v26 = vmin.f32 %v9440_v42, 0.0  ;;  %vm4397_vm8 = vcmp.gt.f32.partialorder %v9430_v25, 0.0 }
 0x392   : > { %7373 = vpow2.f32 %v4457_v20  ;;  %v4463_v13 = vmul.f32 1.442695, %v4427_v61  ;;  %v3363_v63 = vpop.f32.mrb[21].mxu0  ;;  %v4467_v14 = vmul.f32 1.442695, %v4429_v15  ;;  %v9442_v27 = vadd.f32 %v3361_v1, %v2359_v2  ;;  %v4353_v31 = vpop.f32.mrb[21].mxu1 }
 0x393   : > { %7375 = vpow2.f32 %v4461_v37  ;;  %v9444_v47 = vadd.f32 %v4351_v40, %v2359_v2  ;;  %v4465_v12 = vmul.f32 1.442695, %v4428_v58  ;;  %v4469_v24 = vmul.f32 1.442695, %v4430_v26 }
 0x394   : > { %7377 = vpow2.f32 %v4463_v13  ;;  %v4431_v3 = vmin.f32 %v9442_v27, 0.0  ;;  %v9453_v53 = vadd.f32 %v3363_v63, %v2359_v2  ;;  %v9455_v21 = vadd.f32 %v4353_v31, %v2359_v2 }
 0x395   : > { %7379 = vpow2.f32 %v4467_v14  ;;  %v3368_v22 = vpop.f32.mrb[22].mxu0  ;;  %v4433_v41 = vmin.f32 %v9444_v47, 0.0  ;;  %v4358_v16 = vpop.f32.mrb[22].mxu1  ;;  %vm4396_vm9 = vcmp.gt.f32.partialorder %v9432_v57, 0.0  ;;  %vm4398_vm10 = vcmp.gt.f32.partialorder %v9440_v42, 0.0 }
 0x396   : > { %7381 = vpow2.f32 %v4465_v12  ;;  %v3370_v17 = vpop.f32.mrb[23].mxu0  ;;  %v4471_v60 = vmul.f32 1.442695, %v4431_v3  ;;  %v9458_v46 = vadd.f32 %v3368_v22, %v9449_v34  ;;  %v9461_v28 = vadd.f32 %v4358_v16, %v9449_v34  ;;  %v9463_v33 = vpop.f32.mrb[23].mxu1 }
 0x397   : > { %7383 = vpow2.f32 %v4469_v24  ;;  %v4475_v0 = vmul.f32 1.442695, %v4433_v41  ;;  %v4432_v5 = vmin.f32 %v9453_v53, 0.0  ;;  %v4434_v39 = vmin.f32 %v9455_v21, 0.0 }
 0x398   : > { %7385 = vpow2.f32 %v4471_v60  ;;  %v4435_v35 = vmin.f32 %v9458_v46, 0.0  ;;  %v4437_v44 = vmin.f32 %v9461_v28, 0.0  ;;  %vm4399_vm11 = vcmp.gt.f32.partialorder %v9442_v27, 0.0 }
 0x399   : > { %v9471_v45 = vpop.f32.mrb[24].mxu0  ;;  %7387 = vpow2.f32 %v4475_v0  ;;  %v4473_v30 = vmul.f32 1.442695, %v4432_v5  ;;  %v9475_v62 = vpop.f32.mrb[24].mxu1  ;;  %v4477_v56 = vmul.f32 1.442695, %v4434_v39  ;;  %v9515_v12 = vadd.f32 %v3370_v17, %v9449_v34 }
 0x39a   : > { %v7370_v29 = vpop.eup %7369  ;;  %v9477_v10 = vpop.f32.mrb[25].mxu0  ;;  %v4479_v6 = vmul.f32 1.442695, %v4435_v35  ;;  %v4483_v43 = vmul.f32 1.442695, %v4437_v44  ;;  %vm4401_vm12 = vcmp.gt.f32.partialorder %v9444_v47, 0.0 }
 0x39b   : > { %v7372_v55 = vpop.eup %7371  ;;  %v6371_v51 = vadd.f32 -1.0, %v7370_v29  ;;  %v9481_v50 = vpop.f32.mrb[25].mxu1  ;;  %7389 = vpow2.f32 %v4473_v30  ;;  %vm4400_vm13 = vcmp.gt.f32.partialorder %v9453_v53, 0.0  ;;  %vm4402_vm14 = vcmp.gt.f32.partialorder %v9455_v21, 0.0 }
 0x39c   : > { %v7374_v59 = vpop.eup %7373  ;;  %v6373_v8 = vadd.f32 -1.0, %v7372_v55  ;;  %7391 = vpow2.f32 %v4477_v56  ;;  %vm4403_vm15 = vcmp.gt.f32.partialorder %v9458_v46, 0.0  ;;  %vm4405_vm0 = vcmp.gt.f32.partialorder %v9461_v28, 0.0 }
 0x39d   : > { %v7376_v36 = vpop.eup %7375  ;;  %v9487_v49 = vsel %vm4391_vm1, %v9413_v38, %v6371_v51  ;;  %v9490_v20 = vpop.f32.mrb[26].mxu0  ;;  %v6372_v37 = vadd.f32 -1.0, %v7374_v59  ;;  %7393 = vpow2.f32 %v4479_v6  ;;  %v4436_v35 = vmin.f32 %v9515_v12, 0.0 }
 0x39e   : > { %v7378_v32 = vpop.eup %7377  ;;  %v9494_v61 = vpop.f32.mrb[26].mxu1  ;;  %v9501_v38 = vsel %vm4393_vm4, %v9415_v52, %v6373_v8  ;;  %v6374_v1 = vadd.f32 -1.0, %v7376_v36  ;;  %7395 = vpow2.f32 %v4483_v43  ;;  %v10678_v63 = vand.u32 4294901760, %v9487_v49 }
 0x39f   : > { %v9496_v2 = vpop.f32.mrb[27].mxu0  ;;  %v7380_v15 = vpop.eup %7379  ;;  %v6375_v13 = vadd.f32 -1.0, %v7378_v32  ;;  %v10676_v3 = vand.u32 4294901760, %v9501_v38  ;;  %v9523_v22 = vsel %vm4392_vm5, %v9417_v4, %v6372_v37  ;;  %v9544_v4 = vadd.f32 %v9463_v33, %v9449_v34 }
 0x3a0   : > { %v9503_v58 = vpop.f32.mrb[27].mxu1  ;;  %v7382_v40 = vpop.eup %7381  ;;  %v6377_v14 = vadd.f32 -1.0, %v7380_v15  ;;  %v9538_v60 = vsel %vm4394_vm6, %v9420_v54, %v6374_v1  ;;  %v9551_v5 = vsub.f32 %v9487_v49, %v10678_v63  ;;  %v10684_v30 = vand.u32 4294901760, %v9523_v22 }
 0x3a1   : > { %v9511_v31 = vsel %vm4395_vm7, %v9428_v9, %v6375_v13  ;;  %v6376_v52 = vadd.f32 -1.0, %v7382_v40  ;;  %v9517_v26 = vpop.f32.mrb[28].mxu0  ;;  %v7384_v19 = vpop.eup %7383  ;;  %v9567_v56 = vsub.f32 %v9501_v38, %v10676_v3  ;;  %vm4404_vm2 = vcmp.gt.f32.partialorder %v9515_v12, 0.0 }
 0x3a2   : > { %v10677_v24 = vand.u32 4294901760, %v9511_v31  ;;  %v9529_v9 = vsel %vm4397_vm8, %v9430_v25, %v6377_v14  ;;  %v9531_v41 = vpop.f32.mrb[28].mxu1  ;;  %v9533_v16 = vpop.f32.mrb[29].mxu0  ;;  %v6378_v39 = vadd.f32 -1.0, %v7384_v19  ;;  %vm4406_vm3 = vcmp.gt.f32.partialorder %v9544_v4, 0.0 }
 0x3a3   : > { %v7386_v17 = vpop.eup %7385  ;;  %v9546_v25 = vpop.f32.mrb[29].mxu1  ;;  %v9556_v54 = vsel %vm4396_vm9, %v9432_v57, %v6376_v52  ;;  %v10674_v34 = vand.u32 4294901760, %v9529_v9  ;;  %v10681_v57 = vand.u32 4294901760, %v9538_v60  ;;  %v4481_v52 = vmul.f32 1.442695, %v4436_v35 }
 0x3a4   : > { %v7388_v0 = vpop.eup %7387  ;;  %v6379_v29 = vadd.f32 -1.0, %v7386_v17  ;;  %v9573_v44 = vsub.f32 %v9511_v31, %v10677_v24  ;;  %v10682_v43 = vand.u32 4294901760, %v9556_v54  ;;  %v9588_v32 = vsel %vm4398_vm10, %v9440_v42, %v6378_v39 }
 0x3a5   : > { %v6381_v33 = vadd.f32 -1.0, %v7388_v0  ;;  %v9562_v55 = vpop.f32.mrb[30].mxu0  ;;  %v7390_v51 = vpop.eup %7389  ;;  %v9603_v42 = vsub.f32 %v9523_v22, %v10684_v30  ;;  %7397 = vpow2.f32 %v4481_v52 }
 0x3a6   : > { %v9578_v59 = vsel %vm4399_vm11, %v9442_v27, %v6379_v29  ;;  %v9580_v8 = vpop.f32.mrb[30].mxu1  ;;  %v9582_v6 = vpop.f32.mrb[31].mxu0  ;;  %v6380_v40 = vadd.f32 -1.0, %v7390_v51  ;;  %v9614_v29 = vsub.f32 %v9538_v60, %v10681_v57 }
 0x3a7   : > { %v7392_v36 = vpop.eup %7391  ;;  %v10673_v37 = vand.u32 4294901760, %v9578_v59  ;;  %v9594_v15 = vsel %vm4401_vm12, %v9444_v47, %v6381_v33  ;;  %v9596_v27 = vpop.f32.mrb[31].mxu1  ;;  %v9608_v47 = vsub.f32 %v9529_v9, %v10674_v34 }
 0x3a8   : > { %v7394_v1 = vpop.eup %7393  ;;  %v10675_v13 = vand.u32 4294901760, %v9594_v15  ;;  %v6382_v14 = vadd.f32 -1.0, %v7392_v36  ;;  %v9619_v33 = vsel %vm4400_vm13, %v9453_v53, %v6380_v40  ;;  %v9625_v36 = vsub.f32 %v9556_v54, %v10682_v43  ;;  %v2369_v51 = vpop.permute.xlu0 %2368 }
 0x3a9   : > { %v7396_v19 = vpop.eup %7395  ;;  %v6383_v0 = vadd.f32 -1.0, %v7394_v1  ;;  %v10680_v1 = vand.u32 4294901760, %v9588_v32  ;;  %v9636_v53 = vsub.f32 %v9578_v59, %v10673_v37  ;;  %v4438_v37 = vmin.f32 %v9544_v4, 0.0  ;;  %v2374_v34 = vpop.permute.xlu1 %2373 }
 0x3aa   : > { %v6385_v35 = vadd.f32 -1.0, %v7396_v19  ;;  %v9641_v40 = vsub.f32 %v9594_v15, %v10675_v13  ;;  %v9646_v19 = vsel %vm4402_vm14, %v9455_v21, %v6382_v14  ;;  %v9658_v3 = vadd.f32 %v9471_v45, %v2369_v51 }
 0x3ab   : > { %v9631_v39 = vsel %vm4403_vm15, %v9458_v46, %v6383_v0  ;;  %v10679_v0 = vand.u32 4294901760, %v9619_v33  ;;  %v9661_v21 = vadd.f32 %v9475_v62, %v2369_v51  ;;  %v9664_v14 = vadd.f32 %v9477_v10, %v2369_v51 }
 0x3ac   : > { %10952 = vst [vmem:[#allocation37_spill] sm:$0xff] %v9641_v40  ;;  %v10683_v17 = vand.u32 4294901760, %v9631_v39  ;;  %v9655_v13 = vsel %vm4405_vm0, %v9461_v28, %v6385_v35  ;;  %v10685_v52 = vand.u32 4294901760, %v9646_v19  ;;  %v4485_v46 = vmul.f32 1.442695, %v4438_v37 }
 0x3ad   : > { %v9668_v24 = vadd.f32 %v9481_v50, %v2369_v51  ;;  %v9671_v63 = vadd.f32 %v9490_v20, %v2374_v34  ;;  %v9676_v28 = vsub.f32 %v9588_v32, %v10680_v1  ;;  %v4439_v10 = vmin.f32 %v9658_v3, 0.0 }
 0x3ae   : > { %v9685_v50 = vsub.f32 %v9619_v33, %v10679_v0  ;;  %v10688_v20 = vand.u32 4294901760, %v9655_v13  ;;  %7399 = vpow2.f32 %v4485_v46  ;;  %v4441_v37 = vmin.f32 %v9661_v21, 0.0 }
 0x3af   : > { %v9692_v35 = vsub.f32 %v9631_v39, %v10683_v17  ;;  %v4487_v51 = vmul.f32 1.442695, %v4439_v10  ;;  %v4440_v62 = vmin.f32 %v9664_v14, 0.0  ;;  %v4442_v45 = vmin.f32 %v9668_v24, 0.0  ;;  %v7398_v23 = vpop.eup %7397 }
 0x3b0   : > { %v9699_v0 = vsub.f32 %v9646_v19, %v10685_v52  ;;  %v4491_v1 = vmul.f32 1.442695, %v4441_v37  ;;  %v4443_v46 = vmin.f32 %v9671_v63, 0.0  ;;  %v9703_v57 = vadd.f32 %v9494_v61, %v2374_v34  ;;  %v2379_v61 = vpop.permute.xlu0 %2378 }
 0x3b1   : > { %7401 = vpow2.f32 %v4487_v51  ;;  %v4489_v43 = vmul.f32 1.442695, %v4440_v62  ;;  %v4493_v17 = vmul.f32 1.442695, %v4442_v45  ;;  %v9706_v10 = vadd.f32 %v9496_v2, %v2374_v34 }
 0x3b2   : > { %v9711_v30 = vsub.f32 %v9655_v13, %v10688_v20  ;;  %7403 = vpow2.f32 %v4491_v1  ;;  %v4495_v37 = vmul.f32 1.442695, %v4443_v46  ;;  %v4445_v52 = vmin.f32 %v9703_v57, 0.0 }
 0x3b3   : > { %7405 = vpow2.f32 %v4489_v43  ;;  %v4444_v45 = vmin.f32 %v9706_v10, 0.0  ;;  %v9718_v2 = vadd.f32 %v9503_v58, %v2374_v34  ;;  %v6384_v62 = vadd.f32 -1.0, %v7398_v23 }
 0x3b4   : > { %10953 = vst [vmem:[#allocation26_spill] sm:$0xff] %v9711_v30  ;;  %7407 = vpow2.f32 %v4493_v17  ;;  %v4499_v20 = vmul.f32 1.442695, %v4445_v52  ;;  %v9721_v11 = vadd.f32 %v9517_v26, %v2379_v61  ;;  %vm4407_vm1 = vcmp.gt.f32.partialorder %v9658_v3, 0.0 }
 0x3b5   : > { %7409 = vpow2.f32 %v4495_v37  ;;  %v4497_v1 = vmul.f32 1.442695, %v4444_v45  ;;  %v4446_v46 = vmin.f32 %v9718_v2, 0.0  ;;  %v9728_v43 = vsel %vm4404_vm2, %v9515_v12, %v6384_v62 }
 0x3b6   : > { %vm4409_vm4 = vcmp.gt.f32.partialorder %v9661_v21, 0.0  ;;  %7411 = vpow2.f32 %v4499_v20  ;;  %v4447_v23 = vmin.f32 %v9721_v11, 0.0  ;;  %v9734_v34 = vadd.f32 %v9531_v41, %v2379_v61  ;;  %v9743_v20 = vpop.permute.xlu1 %2383 }
 0x3b7   : > { %7413 = vpow2.f32 %v4497_v1  ;;  %v4501_v26 = vmul.f32 1.442695, %v4446_v46  ;;  %vm4408_vm5 = vcmp.gt.f32.partialorder %v9664_v14, 0.0  ;;  %v9738_v37 = vadd.f32 %v9533_v16, %v2379_v61 }
 0x3b8   : > { %v7400_v17 = vpop.eup %7399  ;;  %v4503_v52 = vmul.f32 1.442695, %v4447_v23  ;;  %v9741_v12 = vadd.f32 %v9546_v25, %v2379_v61  ;;  %v10694_v45 = vand.u32 4294901760, %v9728_v43  ;;  %vm4410_vm6 = vcmp.gt.f32.partialorder %v9668_v24, 0.0 }
 0x3b9   : > { %v6386_v62 = vadd.f32 -1.0, %v7400_v17  ;;  %7415 = vpow2.f32 %v4501_v26  ;;  %v4449_v41 = vmin.f32 %v9734_v34, 0.0  ;;  %v4448_v1 = vmin.f32 %v9738_v37, 0.0 }
 0x3ba   : > { %7417 = vpow2.f32 %v4503_v52  ;;  %v9751_v16 = vadd.f32 %v9562_v55, %v9743_v20  ;;  %vm4411_vm7 = vcmp.gt.f32.partialorder %v9671_v63, 0.0  ;;  %vm4413_vm8 = vcmp.gt.f32.partialorder %v9703_v57, 0.0 }
 0x3bb   : > { %v7402_v46 = vpop.eup %7401  ;;  %v9756_v25 = vsel %vm4406_vm3, %v9544_v4, %v6386_v62  ;;  %v4450_v61 = vmin.f32 %v9741_v12, 0.0  ;;  %vm4412_vm9 = vcmp.gt.f32.partialorder %v9706_v10, 0.0  ;;  %v4507_v17 = vmul.f32 1.442695, %v4449_v41 }
 0x3bc   : > { %v7404_v23 = vpop.eup %7403  ;;  %v6387_v26 = vadd.f32 -1.0, %v7402_v46  ;;  %v4505_v52 = vmul.f32 1.442695, %v4448_v1  ;;  %v9765_v58 = vsub.f32 %v9728_v43, %v10694_v45  ;;  %vm4414_vm10 = vcmp.gt.f32.partialorder %v9718_v2, 0.0 }
 0x3bd   : > { %v7406_v55 = vpop.eup %7405  ;;  %v6389_v62 = vadd.f32 -1.0, %v7404_v23  ;;  %v4509_v51 = vmul.f32 1.442695, %v4450_v61  ;;  %vm4415_vm11 = vcmp.gt.f32.partialorder %v9721_v11, 0.0  ;;  %7419 = vpow2.f32 %v4507_v17 }
 0x3be   : > { %v7408_v18 = vpop.eup %7407  ;;  %v9771_v7 = vsel %vm4407_vm1, %v9658_v3, %v6387_v26  ;;  %v6388_v46 = vadd.f32 -1.0, %v7406_v55  ;;  %v4451_v41 = vmin.f32 %v9751_v16, 0.0  ;;  %7421 = vpow2.f32 %v4505_v52 }
 0x3bf   : > { %v7410_v1 = vpop.eup %7409  ;;  %v10697_v45 = vand.u32 4294901760, %v9771_v7  ;;  %v9780_v61 = vsel %vm4409_vm4, %v9661_v21, %v6389_v62  ;;  %v6390_v23 = vadd.f32 -1.0, %v7408_v18  ;;  %7423 = vpow2.f32 %v4509_v51 }
 0x3c0   : > { %v7412_v3 = vpop.eup %7411  ;;  %v10696_v26 = vand.u32 4294901760, %v9780_v61  ;;  %v9786_v55 = vsel %vm4408_vm5, %v9664_v14, %v6388_v46  ;;  %v6391_v17 = vadd.f32 -1.0, %v7410_v1  ;;  %vm4417_vm12 = vcmp.gt.f32.partialorder %v9734_v34, 0.0 }
 0x3c1   : > { %v7414_v4 = vpop.eup %7413  ;;  %v9791_v48 = vsub.f32 %v9771_v7, %v10697_v45  ;;  %v10702_v21 = vand.u32 4294901760, %v9786_v55  ;;  %v9797_v18 = vsel %vm4410_vm6, %v9668_v24, %v6390_v23  ;;  %v6393_v52 = vadd.f32 -1.0, %v7412_v3 }
 0x3c2   : > { %v9802_v14 = vsub.f32 %v9780_v61, %v10696_v26  ;;  %v9807_v51 = vsel %vm4411_vm7, %v9671_v63, %v6391_v17  ;;  %v6392_v62 = vadd.f32 -1.0, %v7414_v4  ;;  %v9812_v46 = vadd.f32 %v9580_v8, %v9743_v20 }
 0x3c3   : > { %10954 = vst [vmem:[#allocation38_spill] sm:$0xff] %v9791_v48  ;;  %v7416_v24 = vpop.eup %7415  ;;  %v10704_v23 = vand.u32 4294901760, %v9807_v51  ;;  %v9819_v3 = vsel %vm4413_vm8, %v9703_v57, %v6393_v52  ;;  %vm4416_vm13 = vcmp.gt.f32.partialorder %v9738_v37, 0.0  ;;  %v10956_v4 = vand.u32 4294901760, %v9756_v25 }
 0x3c4   : > { %10955 = vst [vmem:[#allocation27_spill] sm:$0xff] %v9802_v14  ;;  %v7418_v63 = vpop.eup %7417  ;;  %v9832_v45 = vsel %vm4412_vm9, %v9706_v10, %v6392_v62  ;;  %vm4418_vm14 = vcmp.gt.f32.partialorder %v9741_v12, 0.0  ;;  %v9838_v57 = vsub.f32 %v9786_v55, %v10702_v21  ;;  %v4511_v10 = vmul.f32 1.442695, %v4451_v41 }
 0x3c5   : > { %v9825_v17 = vsub.f32 %v9756_v25, %v10956_v4  ;;  %v9843_v52 = vsub.f32 %v9807_v51, %v10704_v23  ;;  %v6394_v4 = vadd.f32 -1.0, %v7416_v24  ;;  %v6395_v8 = vadd.f32 -1.0, %v7418_v63 }
 0x3c6   : > { %10957 = vst [vmem:[#allocation20_spill] sm:$0xff] %v9838_v57  ;;  %v4613_v1 = vand.u32 4294901760, %v9832_v45  ;;  %v4453_v62 = vmin.f32 %v9812_v46, 0.0  ;;  %v10958_v48 = vand.u32 4294901760, %v9797_v18  ;;  %v10960_v21 = vand.u32 4294901760, %v9819_v3 }
 0x3c7   : > { %v4574_v24 = vsel %vm4414_vm10, %v9718_v2, %v6394_v4  ;;  %v9864_v41 = vsel %vm4415_vm11, %v9721_v11, %v6395_v8  ;;  %v7420_v63 = vpop.eup %7419  ;;  %7425 = vpow2.f32 %v4511_v10  ;;  %v9870_v40 = vadd.f32 %v9582_v6, %v9743_v20 }
 0x3c8   : > { %v9851_v30 = vsub.f32 %v9797_v18, %v10958_v48  ;;  %v9856_v57 = vsub.f32 %v9819_v3, %v10960_v21  ;;  %v5260_v23 = vand.u32 4294901760, %v4574_v24  ;;  %v10710_v48 = vand.u32 4294901760, %v9864_v41  ;;  %v7422_v14 = vpop.eup %7421 }
 0x3c9   : > { %v4515_v21 = vmul.f32 1.442695, %v4453_v62  ;;  %v9874_v2 = vadd.f32 %v9596_v27, %v9743_v20  ;;  %v7424_v11 = vpop.eup %7423  ;;  %v9877_v8 = vsub.f32 %v9832_v45, %v4613_v1  ;;  %v6396_v10 = vadd.f32 -1.0, %v7422_v14 }
 0x3ca   : > { %10959 = vst [vmem:[#allocation23_spill] sm:$0xff] %v9851_v30  ;;  %v6397_v30 = vadd.f32 -1.0, %v7420_v63  ;;  %v9882_v4 = vsub.f32 %v9864_v41, %v10710_v48  ;;  %v10961_v62 = vand.u32 4294901760, %v9523_v22  ;;  %v10962_v63 = vand.u32 4294901760, %v9556_v54 }
 0x3cb   : > { %v6398_v20 = vadd.f32 -1.0, %v7424_v11  ;;  %7427 = vpow2.f32 %v4515_v21  ;;  %v9896_v45 = vsub.f32 %v4574_v24, %v5260_v23  ;;  %v9902_v22 = vsel %vm4416_vm13, %v9738_v37, %v6396_v10 }
 0x3cc   : > { %v9888_v6 = vpack.c.bf16 %v10962_v63, %v10961_v62  ;;  %v9894_v27 = vsel %vm4417_vm12, %v9734_v34, %v6397_v30  ;;  %vm4419_vm15 = vcmp.gt.f32.partialorder %v9751_v16, 0.0  ;;  %v4452_v54 = vmin.f32 %v9870_v40, 0.0 }
 0x3cd   : > { %v10711_v48 = vand.u32 4294901760, %v9894_v27  ;;  %v10717_v34 = vand.u32 4294901760, %v9902_v22  ;;  %v9912_v14 = vsel %vm4418_vm14, %v9741_v12, %v6398_v20  ;;  %v4454_v24 = vmin.f32 %v9874_v2, 0.0 }
 0x3ce   : > { %6655 = vmatprep.subr.bf16.mxu0 %v9888_v6  ;;  %v10714_v21 = vand.u32 4294901760, %v9912_v14  ;;  %v4513_v11 = vmul.f32 1.442695, %v4452_v54  ;;  %v10963_v10 = vand.u32 4294901760, %v9538_v60  ;;  %v10964_v62 = vand.u32 4294901760, %v9588_v32 }
 0x3cf   : > { %v9918_v37 = vsub.f32 %v9894_v27, %v10711_v48  ;;  %v9930_v12 = vsub.f32 %v9902_v22, %v10717_v34  ;;  %vm4421_vm0 = vcmp.gt.f32.partialorder %v9812_v46, 0.0  ;;  %v4517_v20 = vmul.f32 1.442695, %v4454_v24 }
 0x3d0   : > { %v9925_v63 = vpack.c.bf16 %v10964_v62, %v10963_v10  ;;  %v10965_v30 = vand.u32 4294901760, %v9487_v49  ;;  %v10966_v26 = vand.u32 4294901760, %v9511_v31  ;;  %v10967_v60 = vand.u32 4294901760, %v9501_v38 }
 0x3d1   : > { %v10968_v32 = vand.u32 4294901760, %v9529_v9  ;;  %v9949_v62 = vsub.f32 %v9912_v14, %v10714_v21  ;;  %7429 = vpow2.f32 %v4513_v11  ;;  %v10970_v49 = vand.u32 4294901760, %v9619_v33 }
 0x3d2   : > { %v9937_v48 = vpack.c.bf16 %v10966_v26, %v10965_v30  ;;  %6751 = vmatprep.subr.bf16.mxu1 %v9925_v63  ;;  %v10971_v31 = vand.u32 4294901760, %v9728_v43  ;;  %7431 = vpow2.f32 %v4517_v20  ;;  %v10973_v38 = vand.u32 4294901760, %v9646_v19 }
 0x3d3   : > { %v9943_v54 = vpack.c.bf16 %v10968_v32, %v10967_v60  ;;  %v10974_v9 = vand.u32 4294901760, %v9756_v25  ;;  %v10976_v24 = vand.u32 4294901760, %v9578_v59  ;;  %v10977_v11 = vand.u32 4294901760, %v9631_v39  ;;  %v7426_v32 = vpop.eup %7425 }
 0x3d4   : > { %v9956_v26 = vpack.c.bf16 %v10971_v31, %v10970_v49  ;;  %6657 = vmatpush1.bf16.msra.mxu0 %v9937_v48  ;;  %v10979_v43 = vand.u32 4294901760, %v9594_v15  ;;  %v10980_v20 = vand.u32 4294901760, %v9655_v13  ;;  %v10982_v19 = vand.u32 4294901760, %v9786_v55 }
 0x3d5   : > { %10969 = vst [vmem:[#allocation28_spill] sm:$0xff] %v9943_v54  ;;  %6753 = vmatpush1.bf16.msra.mxu1 %v9943_v54  ;;  %v9964_v30 = vpack.c.bf16 %v10974_v9, %v10973_v38  ;;  %v9970_v33 = vpack.c.bf16 %v10977_v11, %v10976_v24  ;;  %v10984_v49 = vand.u32 4294901760, %v9797_v18  ;;  %v10986_v39 = vand.u32 4294901760, %v9771_v7 }
 0x3d6   : > { %10972 = vst [vmem:[#allocation21_spill] sm:$0xff] %v9956_v26  ;;  %v9976_v60 = vpack.c.bf16 %v10980_v20, %v10979_v43  ;;  %6659 = vmatprep.subr.bf16.mxu0 %v9956_v26  ;;  %v9981_v25 = vpack.c.bf16 %v4613_v1, %v10982_v19  ;;  %v10987_v31 = vand.u32 4294901760, %v9807_v51  ;;  %v10989_v13 = vand.u32 4294901760, %v9780_v61  ;;  %v7428_v20 = vpop.eup %7427 }
 0x3d7   : > { %10975 = vst [vmem:[#allocation25_spill] sm:$0xff] %v9964_v30  ;;  %10978 = vst [vmem:[#allocation29_spill] sm:$0xff] %v9970_v33  ;;  %v9985_v59 = vpack.c.bf16 %v5260_v23, %v10984_v49  ;;  %v10990_v38 = vand.u32 4294901760, %v9819_v3  ;;  %v6399_v24 = vadd.f32 -1.0, %v7426_v32  ;;  %6755 = vmatprep.subr.bf16.mxu1 %v9964_v30  ;;  %v10713_v55 = vand.u32 4294901760, %v9603_v42 }
 0x3d8   : > { %10981 = vst [vmem:[#allocation31_spill] sm:$0xff] %v9976_v60  ;;  %10983 = vst [vmem:[#allocation34_spill] sm:$0xff] %v9981_v25  ;;  %v9991_v15 = vpack.c.bf16 %v10987_v31, %v10986_v39  ;;  %v10712_v18 = vand.u32 4294901760, %v9625_v36  ;;  %v10715_v1 = vand.u32 4294901760, %v9614_v29  ;;  %vm4420_vm2 = vcmp.gt.f32.partialorder %v9870_v40, 0.0  ;;  %6661 = vmatpush1.bf16.msra.mxu0 %v9970_v33 }
 0x3d9   : > { %10985 = vst [vmem:[#allocation30_spill] sm:$0xff] %v9985_v59  ;;  %v9997_v9 = vpack.c.bf16 %v10990_v38, %v10989_v13  ;;  %v10716_v7 = vand.u32 4294901760, %v9676_v28  ;;  %v10992_v51 = vand.u32 4294901760, %v9551_v5  ;;  %v10993_v23 = vand.u32 4294901760, %v9573_v44  ;;  %6757 = vmatpush1.bf16.msra.mxu1 %v9976_v60  ;;  %6663 = vmatprep.subr.bf16.mxu0 %v9981_v25 }
 0x3da   : > { %10988 = vst [vmem:[#allocation32_spill] sm:$0xff] %v9991_v15  ;;  %v10994_v11 = vand.u32 4294901760, %v9567_v56  ;;  %v4579_v32 = vsel %vm4419_vm15, %v9751_v16, %v6399_v24  ;;  %vm4422_vm3 = vcmp.gt.f32.partialorder %v9874_v2, 0.0  ;;  %v4688_v19 = vsub.f32 %v9603_v42, %v10713_v55  ;;  %6759 = vmatprep.subr.bf16.mxu1 %v9985_v59 }
 0x3db   : > { %10991 = vst [vmem:[#allocation9_spill] sm:$0xff] %v9997_v9  ;;  %v4694_v61 = vsub.f32 %v9551_v5, %v10992_v51  ;;  %v4706_v3 = vsub.f32 %v9573_v44, %v10993_v23  ;;  %v4700_v49 = vsub.f32 %v9625_v36, %v10712_v18  ;;  %v10718_v39 = vand.u32 4294901760, %v9685_v50 }
 0x3dc   : > { %v5341_v43 = vsub.f32 %v9567_v56, %v10994_v11  ;;  %v4623_v31 = vand.u32 4294901760, %v4579_v32  ;;  %v6401_v13 = vadd.f32 -1.0, %v7428_v20  ;;  %v5335_v16 = vsub.f32 %v9614_v29, %v10715_v1  ;;  %6665 = vmatpush1.bf16.msra.mxu0 %v9991_v15 }
 0x3dd   : > { %v5347_v38 = vsub.f32 %v9676_v28, %v10716_v7  ;;  %v4689_v24 = vand.u32 4294901760, %v4688_v19  ;;  %v4701_v51 = vand.u32 4294901760, %v4700_v49  ;;  %v4695_v23 = vand.u32 4294901760, %v4694_v61  ;;  %6761 = vmatpush1.bf16.msra.mxu1 %v9997_v9 }
 0x3de   : > { %v4707_v11 = vand.u32 4294901760, %v4706_v3  ;;  %v10035_v18 = vsub.f32 %v4579_v32, %v4623_v31  ;;  %v4581_v20 = vsel %vm4421_vm0, %v9812_v46, %v6401_v13  ;;  %v10995_v55 = vand.u32 4294901760, %v9864_v41  ;;  %v7430_v3 = vpop.eup %7429 }
 0x3df   : > { %v5336_v21 = vand.u32 4294901760, %v5335_v16  ;;  %v5270_v1 = vand.u32 4294901760, %v4581_v20  ;;  %v6670_v19 = vpack.c.bf16 %v4701_v51, %v4689_v24  ;;  %v5348_v49 = vand.u32 4294901760, %v5347_v38 }
 0x3e0   : > { %v10042_v10 = vpack.c.bf16 %v4623_v31, %v10995_v55  ;;  %v6672_v61 = vpack.c.bf16 %v4707_v11, %v4695_v23  ;;  %v5342_v7 = vand.u32 4294901760, %v5341_v43  ;;  %v10997_v34 = vand.u32 4294901760, %v9608_v47  ;;  %v7432_v55 = vpop.eup %7431 }
 0x3e1   : > { %v4712_v41 = vsub.f32 %v9685_v50, %v10718_v39  ;;  %v10053_v31 = vsub.f32 %v4581_v20, %v5270_v1  ;;  %v6400_v13 = vadd.f32 -1.0, %v7430_v3  ;;  %v10998_v16 = vand.u32 4294901760, %v9894_v27 }
 0x3e2   : > { %10996 = vst [vmem:[#allocation10_spill] sm:$0xff] %v10042_v10  ;;  %v5353_v46 = vsub.f32 %v9608_v47, %v10997_v34  ;;  %v6766_v24 = vpack.c.bf16 %v5348_v49, %v5336_v21  ;;  %v6402_v51 = vadd.f32 -1.0, %v7432_v55  ;;  %v10720_v11 = vand.u32 4294901760, %v9765_v58 }
 0x3e3   : > { %v10057_v38 = vpack.c.bf16 %v5270_v1, %v10998_v16  ;;  %v4713_v43 = vand.u32 4294901760, %v4712_v41  ;;  %v4580_v39 = vsel %vm4420_vm2, %v9870_v40, %v6400_v13  ;;  %v10719_v20 = vand.u32 4294901760, %v9699_v0 }
 0x3e4   : > { %v5354_v23 = vand.u32 4294901760, %v5353_v46  ;;  %v10721_v3 = vand.u32 4294901760, %v9825_v17  ;;  %v4621_v32 = vand.u32 4294901760, %v4580_v39  ;;  %v4582_v27 = vsel %vm4422_vm3, %v9874_v2, %v6402_v51 }
 0x3e5   : > { %10999 = vst [vmem:[#allocation11_spill] sm:$0xff] %v10057_v38  ;;  %v4724_v1 = vsub.f32 %v9765_v58, %v10720_v11  ;;  %v5268_v49 = vand.u32 4294901760, %v4582_v27  ;;  %v5359_v46 = vsub.f32 %v9699_v0, %v10719_v20  ;;  %v11000_v41 = vand.u32 4294901760, %v9636_v53 }
 0x3e6   : > { %v6768_v21 = vpack.c.bf16 %v5354_v23, %v5342_v7  ;;  %v5371_v40 = vsub.f32 %v9825_v17, %v10721_v3  ;;  %v10081_v13 = vsub.f32 %v4580_v39, %v4621_v32  ;;  %v11001_v2 = vand.u32 4294901760, %v9902_v22 }
 0x3e7   : > { %v4718_v55 = vsub.f32 %v9636_v53, %v11000_v41  ;;  %v4725_v16 = vand.u32 4294901760, %v4724_v1  ;;  %v11003_v51 = vand.u32 4294901760, %v9692_v35  ;;  %v10090_v20 = vsub.f32 %v4582_v27, %v5268_v49 }
 0x3e8   : > { %v10085_v7 = vpack.c.bf16 %v4621_v32, %v11001_v2  ;;  %v11004_v11 = vand.u32 4294901760, %v9912_v14  ;;  %v5360_v34 = vand.u32 4294901760, %v5359_v46  ;;  %v5372_v9 = vand.u32 4294901760, %v5371_v40  ;;  %v11006_v32 = vld [vmem:[#allocation37_spill] sm:$0xff] }
 0x3e9   : > { %v4730_v23 = vsub.f32 %v9692_v35, %v11003_v51  ;;  %v6674_v39 = vpack.c.bf16 %v4725_v16, %v4713_v43  ;;  %v4719_v41 = vand.u32 4294901760, %v4718_v55  ;;  %v11007_v2 = vand.u32 4294901760, %v11006_v32  ;;  %v11008_v51 = vld [vmem:[#allocation26_spill] sm:$0xff]  ;;  %v11011_v16 = vld [vmem:[#allocation23_spill] sm:$0xff] }
 0x3ea   : > { %11002 = vst [vmem:[#allocation15_spill] sm:$0xff] %v10085_v7  ;;  %v10094_v3 = vpack.c.bf16 %v5268_v49, %v11004_v11  ;;  %6667 = vmatprep.subr.bf16.mxu0 %v10085_v7  ;;  %v6770_v27 = vpack.c.bf16 %v5372_v9, %v5360_v34  ;;  %v11009_v14 = vand.u32 4294901760, %v11008_v51  ;;  %v11010_v49 = vld [vmem:[#allocation20_spill] sm:$0xff]  ;;  %v10729_v40 = vand.u32 4294901760, %v9877_v8 }
 0x3eb   : > { %v4731_v22 = vand.u32 4294901760, %v4730_v23  ;;  %v5365_v1 = vsub.f32 %v11006_v32, %v11007_v2  ;;  %6669 = vmatpush1.bf16.msra.mxu0 %v10042_v10  ;;  %v10728_v46 = vand.u32 4294901760, %v11010_v49  ;;  %v10738_v23 = vand.u32 4294901760, %v11011_v16 }
 0x3ec   : > { %11005 = vst [vmem:[#allocation16_spill] sm:$0xff] %v10094_v3  ;;  %6763 = vmatprep.subr.bf16.mxu1 %v10094_v3  ;;  %v5377_v11 = vsub.f32 %v11008_v51, %v11009_v14  ;;  %6671 = vmatprep.subr.bf16.mxu0 %v6670_v19  ;;  %v10741_v2 = vand.u32 4294901760, %v9896_v45  ;;  %v4748_v34 = vsub.f32 %v9877_v8, %v10729_v40  ;;  %v11012_v14 = vld [vmem:[#allocation38_spill] sm:$0xff]  ;;  %v11031_v54 = vand.u32 4294901760, %v9608_v47 }
 0x3ed   : > { %6765 = vmatpush1.bf16.msra.mxu1 %v10057_v38  ;;  %v6676_v43 = vpack.c.bf16 %v4731_v22, %v4719_v41  ;;  %v5366_v55 = vand.u32 4294901760, %v5365_v1  ;;  %v4736_v9 = vsub.f32 %v11010_v49, %v10728_v46  ;;  %v11013_v3 = vand.u32 4294901760, %v11012_v14  ;;  %v11014_v41 = vld [vmem:[#allocation40_spill] sm:$0xff]  ;;  %v11016_v46 = vld [vmem:[#allocation27_spill] sm:$0xff] }
 0x3ee   : > { %6767 = vmatprep.subr.bf16.mxu1 %v6766_v24  ;;  %v5378_v10 = vand.u32 4294901760, %v5377_v11  ;;  %4679 = vmatmul.mubr.f32.vlgmr.msra.gmra.mrb[32].mxu0 %v11014_v41  ;;  %v5383_v22 = vsub.f32 %v11011_v16, %v10738_v23  ;;  %v5395_v24 = vsub.f32 %v9896_v45, %v10741_v2  ;;  %v11015_v1 = vand.u32 4294901760, %v9843_v52 }
 0x3ef   : > { %v4742_v19 = vsub.f32 %v11012_v14, %v11013_v3  ;;  %v11017_v40 = vand.u32 4294901760, %v11016_v46  ;;  %6673 = vmatpush1.bf16.msra.mxu0 %v6672_v61  ;;  %v4737_v7 = vand.u32 4294901760, %v4736_v9  ;;  %v4749_v15 = vand.u32 4294901760, %v4748_v34 }
 0x3f0   : > { %v4754_v11 = vsub.f32 %v9843_v52, %v11015_v1  ;;  %5326 = vmatmul.mubr.f32.vlgmr.msra.gmra.mrb[32].mxu1 %v11014_v41  ;;  %v6772_v3 = vpack.c.bf16 %v5378_v10, %v5366_v55  ;;  %6675 = vmatprep.subr.bf16.mxu0 %v6674_v39  ;;  %v5384_v23 = vand.u32 4294901760, %v5383_v22  ;;  %v5396_v60 = vand.u32 4294901760, %v5395_v24 }
 0x3f1   : > { %v5389_v38 = vsub.f32 %v11016_v46, %v11017_v40  ;;  %v4743_v59 = vand.u32 4294901760, %v4742_v19  ;;  %6769 = vmatpush1.bf16.msra.mxu1 %v6768_v21  ;;  %v6678_v33 = vpack.c.bf16 %v4749_v15, %v4737_v7  ;;  %v11018_v1 = vand.u32 4294901760, %v9856_v57 }
 0x3f2   : > { %v4755_v2 = vand.u32 4294901760, %v4754_v11  ;;  %6771 = vmatprep.subr.bf16.mxu1 %v6770_v27  ;;  %v10751_v61 = vand.u32 4294901760, %v9930_v12  ;;  %v10750_v40 = vand.u32 4294901760, %v10081_v13  ;;  %v11019_v10 = vmov 0.0  }
 0x3f3   : > { %v5390_v25 = vand.u32 4294901760, %v5389_v38  ;;  %v5401_v30 = vsub.f32 %v9856_v57, %v11018_v1  ;;  %4829 = vmatprep.mubr.f32.mxu0 %v11019_v10  ;;  %v6774_v55 = vpack.c.bf16 %v5396_v60, %v5384_v23  ;;  %v10749_v21 = vand.u32 4294901760, %v9949_v62  ;;  %5476 = vmatprep.mubr.f32.mxu1 %v11019_v10 }
 0x3f4   : > { %v6680_v9 = vpack.c.bf16 %v4755_v2, %v4743_v59  ;;  %v10748_v39 = vand.u32 4294901760, %v10090_v20  ;;  %6677 = vmatpush1.bf16.msra.mxu0 %v6676_v43  ;;  %v4760_v38 = vsub.f32 %v9930_v12, %v10751_v61  ;;  %v4772_v7 = vsub.f32 %v10081_v13, %v10750_v40 }
 0x3f5   : > { %v5402_v15 = vand.u32 4294901760, %v5401_v30  ;;  %v11020_v27 = vand.u32 4294901760, %v9882_v4  ;;  %6773 = vmatpush1.bf16.msra.mxu1 %v6772_v3  ;;  %6679 = vmatprep.subr.bf16.mxu0 %v6678_v33  ;;  %v5407_v59 = vsub.f32 %v9949_v62, %v10749_v21  ;;  %v11021_v43 = vand.u32 4294901760, %v10035_v18 }
 0x3f6   : > { %v5419_v30 = vsub.f32 %v10090_v20, %v10748_v39  ;;  %6775 = vmatprep.subr.bf16.mxu1 %v6774_v55  ;;  %v4761_v34 = vand.u32 4294901760, %v4760_v38  ;;  %v4773_v19 = vand.u32 4294901760, %v4772_v7  ;;  %v11022_v11 = vand.u32 4294901760, %v9918_v37 }
 0x3f7   : > { %v4766_v60 = vsub.f32 %v9882_v4, %v11020_v27  ;;  %v4778_v23 = vsub.f32 %v10035_v18, %v11021_v43  ;;  %v6776_v2 = vpack.c.bf16 %v5402_v15, %v5390_v25  ;;  %v5408_v22 = vand.u32 4294901760, %v5407_v59 }
 0x3f8   : > { %v5420_v24 = vand.u32 4294901760, %v5419_v30  ;;  %v5413_v3 = vsub.f32 %v9918_v37, %v11022_v11  ;;  %6681 = vmatpush1.bf16.msra.mxu0 %v6680_v9  ;;  %v6682_v1 = vpack.c.bf16 %v4773_v19, %v4761_v34  ;;  %v11023_v27 = vand.u32 4294901760, %v10053_v31 }
 0x3f9   : > { %v4767_v41 = vand.u32 4294901760, %v4766_v60  ;;  %v4779_v33 = vand.u32 4294901760, %v4778_v23  ;;  %v6686_v55 = vpack.c.bf16 %v9625_v36, %v9603_v42  ;;  %v6782_v25 = vpack.c.bf16 %v9676_v28, %v9614_v29  ;;  %6777 = vmatpush1.bf16.msra.mxu1 %v6776_v2 }
 0x3fa   : > { %v5425_v39 = vsub.f32 %v10053_v31, %v11023_v27  ;;  %v6778_v15 = vpack.c.bf16 %v5420_v24, %v5408_v22  ;;  %v5414_v7 = vand.u32 4294901760, %v5413_v3  ;;  %v6688_v60 = vpack.c.bf16 %v9573_v44, %v9551_v5  ;;  %6683 = vmatprep.subr.bf16.mxu0 %v6682_v1 }
 0x3fb   : > { %v6684_v38 = vpack.c.bf16 %v4779_v33, %v4767_v41  ;;  %v6784_v59 = vpack.c.bf16 %v9608_v47, %v9567_v56  ;;  %v6690_v30 = vpack.c.bf16 %v9765_v58, %v9685_v50  ;;  %v6786_v43 = vpack.c.bf16 %v9825_v17, %v9699_v0 }
 0x3fc   : > { %v5426_v9 = vand.u32 4294901760, %v5425_v39  ;;  %6779 = vmatprep.subr.bf16.mxu1 %v6778_v15  ;;  %v6692_v23 = vpack.c.bf16 %v9692_v35, %v9636_v53  ;;  %v6788_v2 = vpack.c.bf16 %v11008_v51, %v11006_v32  ;;  %v6694_v34 = vpack.c.bf16 %v9877_v8, %v11010_v49 }
 0x3fd   : > { %v6790_v39 = vpack.c.bf16 %v9896_v45, %v11011_v16  ;;  %6685 = vmatpush1.bf16.msra.mxu0 %v6684_v38  ;;  %v6696_v41 = vpack.c.bf16 %v9843_v52, %v11012_v14  ;;  %v6792_v22 = vpack.c.bf16 %v9856_v57, %v11016_v46  ;;  %v6698_v24 = vpack.c.bf16 %v10081_v13, %v9930_v12 }
 0x3fe   : > { %v6780_v19 = vpack.c.bf16 %v5426_v9, %v5414_v7  ;;  %6687 = vmatprep.subr.bf16.mxu0 %v6686_v55  ;;  %v6794_v33 = vpack.c.bf16 %v10090_v20, %v9949_v62  ;;  %v6700_v11 = vpack.c.bf16 %v10035_v18, %v9882_v4  ;;  %v6796_v3 = vpack.c.bf16 %v10053_v31, %v9918_v37 }
 0x3ff   : > { %v11024_v1 = vand.u32 4294901760, %v9603_v42  ;;  %v11025_v27 = vand.u32 4294901760, %v9625_v36  ;;  %v11026_v38 = vand.u32 4294901760, %v9614_v29  ;;  %v11027_v7 = vand.u32 4294901760, %v9676_v28  ;;  %v11034_v29 = vld [vmem:[#allocation35_spill] sm:$0xff] }
 0x400   : > { %6781 = vmatpush1.bf16.msra.mxu1 %v6780_v19  ;;  %v11028_v9 = vand.u32 4294901760, %v9551_v5  ;;  %v11029_v21 = vand.u32 4294901760, %v9573_v44  ;;  %v11030_v61 = vand.u32 4294901760, %v9567_v56  ;;  %v11032_v42 = vand.u32 4294901760, %v9685_v50  ;;  %4831 = vmatmul.mubr.f32.vlgmr.msra.gmra.mrb[32].mxu0 %v11034_v29 }
 0x401   : > { %v6718_v15 = vpack.c.bf16 %v11025_v27, %v11024_v1  ;;  %v6814_v55 = vpack.c.bf16 %v11027_v7, %v11026_v38  ;;  %v11033_v36 = vand.u32 4294901760, %v9765_v58  ;;  %6783 = vmatprep.subr.bf16.mxu1 %v6782_v25  ;;  %v11035_v28 = vand.u32 4294901760, %v9699_v0  ;;  %6689 = vmatpush1.bf16.msra.mxu0 %v6688_v60 }
 0x402   : > { %v6720_v40 = vpack.c.bf16 %v11029_v21, %v11028_v9  ;;  %v6816_v26 = vpack.c.bf16 %v11031_v54, %v11030_v61  ;;  %v11036_v5 = vand.u32 4294901760, %v9825_v17  ;;  %v11037_v44 = vand.u32 4294901760, %v9636_v53  ;;  %4933 = vmatprep.mubr.f32.mxu0 %v11019_v10  ;;  %6691 = vmatprep.subr.bf16.mxu0 %v6690_v30 }
 0x403   : > { %v6722_v19 = vpack.c.bf16 %v11033_v36, %v11032_v42  ;;  %v11038_v56 = vand.u32 4294901760, %v9692_v35  ;;  %v11039_v47 = vand.u32 4294901760, %v11006_v32  ;;  %v11040_v50 = vand.u32 4294901760, %v11008_v51  ;;  %5478 = vmatmul.mubr.f32.vlgmr.msra.gmra.mrb[32].mxu1 %v11034_v29 }
 0x404   : > { %v6818_v1 = vpack.c.bf16 %v11036_v5, %v11035_v28  ;;  %v11041_v58 = vand.u32 4294901760, %v11010_v49  ;;  %v11042_v0 = vand.u32 4294901760, %v9877_v8  ;;  %v11043_v17 = vand.u32 4294901760, %v11011_v16  ;;  %6785 = vmatpush1.bf16.msra.mxu1 %v6784_v59  ;;  %5580 = vmatprep.mubr.f32.mxu1 %v11019_v10  ;;  %v11064_v59 = vld [vmem:[#allocation30_spill] sm:$0xff] }
 0x405   : > { %v6724_v21 = vpack.c.bf16 %v11038_v56, %v11037_v44  ;;  %v6820_v54 = vpack.c.bf16 %v11040_v50, %v11039_v47  ;;  %v11044_v53 = vand.u32 4294901760, %v9896_v45  ;;  %v11045_v35 = vand.u32 4294901760, %v11012_v14  ;;  %6787 = vmatprep.subr.bf16.mxu1 %v6786_v43  ;;  %6693 = vmatpush1.bf16.msra.mxu0 %v6692_v23  ;;  %v11065_v43 = vld [vmem:[#allocation32_spill] sm:$0xff]  ;;  %v11066_v23 = vld [vmem:[#allocation15_spill] sm:$0xff] }
 0x406   : > { %v6726_v61 = vpack.c.bf16 %v11042_v0, %v11041_v58  ;;  %v11046_v32 = vand.u32 4294901760, %v9843_v52  ;;  %v11047_v51 = vand.u32 4294901760, %v11016_v46  ;;  %v11048_v49 = vand.u32 4294901760, %v9856_v57  ;;  %6695 = vmatprep.subr.bf16.mxu0 %v6694_v34  ;;  %v11068_v34 = vld [vmem:[#allocation16_spill] sm:$0xff] }
 0x407   : > { %v6822_v25 = vpack.c.bf16 %v11044_v53, %v11043_v17  ;;  %v11049_v8 = vand.u32 4294901760, %v9930_v12  ;;  %v11050_v16 = vand.u32 4294901760, %v10081_v13  ;;  %v11051_v45 = vand.u32 4294901760, %v9949_v62  ;;  %v11059_v62 = vld [vmem:[#allocation28_spill] sm:$0xff]  ;;  %v11063_v13 = vld [vmem:[#allocation31_spill] sm:$0xff] }
 0x408   : > { %v6728_v27 = vpack.c.bf16 %v11046_v32, %v11045_v35  ;;  %v6824_v60 = vpack.c.bf16 %v11048_v49, %v11047_v51  ;;  %v11052_v14 = vand.u32 4294901760, %v10090_v20  ;;  %v11053_v52 = vand.u32 4294901760, %v9882_v4  ;;  %6789 = vmatpush1.bf16.msra.mxu1 %v6788_v2  ;;  %v11057_v4 = vld [vmem:[#allocation36_spill] sm:$0xff]  ;;  %v11062_v20 = vld [vmem:[#allocation34_spill] sm:$0xff]  ;;  %v11067_v2 = vld [vmem:[#allocation9_spill] sm:$0xff] }
 0x409   : > { %v6730_v38 = vpack.c.bf16 %v11050_v16, %v11049_v8  ;;  %v11054_v46 = vand.u32 4294901760, %v10035_v18  ;;  %v11055_v57 = vand.u32 4294901760, %v9918_v37  ;;  %v11056_v12 = vand.u32 4294901760, %v10053_v31  ;;  %6791 = vmatprep.subr.bf16.mxu1 %v6790_v39  ;;  %6697 = vmatpush1.bf16.msra.mxu0 %v6696_v41  ;;  %v11058_v37 = vld [vmem:[#allocation21_spill] sm:$0xff]  ;;  %v11069_v39 = vld [vmem:[#allocation10_spill] sm:$0xff]  ;;  %v11070_v41 = vld [vmem:[#allocation11_spill] sm:$0xff] }
 0x40a   : > { %v6826_v7 = vpack.c.bf16 %v11052_v14, %v11051_v45  ;;  %6699 = vmatprep.subr.bf16.mxu0 %v6698_v24  ;;  %v11060_v18 = vld [vmem:[#allocation25_spill] sm:$0xff]  ;;  %v5955_v50 = vlaneseq  ;;  %vm6171_vm1 = vcmask 1040384   ;;  %vm6176_vm4 = vcmask 1041408  }
 0x40b   : > { %v6732_v30 = vpack.c.bf16 %v11054_v46, %v11053_v52  ;;  %v6828_v9 = vpack.c.bf16 %v11056_v12, %v11055_v57  ;;  %v11061_v31 = vld [vmem:[#allocation29_spill] sm:$0xff]  ;;  %v10334_v52 = vpop.permute.xlu1 %5947  ;;  %vm6181_vm5 = vcmask 1042432  }
 0x40c   : > { %6793 = vmatpush1.bf16.msra.mxu1 %v6792_v22  ;;  %v11071_v22 = vld [vmem:[#allocation39_spill] sm:$0xff]  ;;  %v5956_v58 = vshrl.u32 %v5955_v50, 7 }
 0x40d   : > { %6795 = vmatprep.subr.bf16.mxu1 %v6794_v33  ;;  %6701 = vmatpush1.bf16.msra.mxu0 %v6700_v11 }
 0x40e   : > { %6703 = vmatprep.subr.bf16.mxu0 %v9888_v6  ;;  %v10314_v53 = vsub.s32 1, %v5956_v58 }
 0x410   : > { %6797 = vmatpush1.bf16.msra.mxu1 %v6796_v3  ;;  %4936 = vmatmul.mubr.f32.vlgmr.msra.gmra.mrb[32].mxu0 %v11057_v4 }
 0x411   : > { %6799 = vmatprep.subr.bf16.mxu1 %v9925_v63  ;;  %6705 = vmatpush1.bf16.msra.mxu0 %v9937_v48 }
 0x412   : > { %5022 = vmatprep.mubr.f32.mxu0 %v11019_v10  ;;  %6707 = vmatprep.subr.bf16.mxu0 %v11058_v37 }
 0x413   : > { %5583 = vmatmul.mubr.f32.vlgmr.msra.gmra.mrb[32].mxu1 %v11057_v4 }
 0x414   : > { %6801 = vmatpush1.bf16.msra.mxu1 %v11059_v62  ;;  %5669 = vmatprep.mubr.f32.mxu1 %v11019_v10 }
 0x415   : > { %6803 = vmatprep.subr.bf16.mxu1 %v11060_v18  ;;  %6709 = vmatpush1.bf16.msra.mxu0 %v11061_v31 }
 0x416   : > { %6711 = vmatprep.subr.bf16.mxu0 %v11062_v20 }
 0x418   : > { %6805 = vmatpush1.bf16.msra.mxu1 %v11063_v13 }
 0x419   : > { %6807 = vmatprep.subr.bf16.mxu1 %v11064_v59  ;;  %6713 = vmatpush1.bf16.msra.mxu0 %v11065_v43 }
 0x41a   : > { %6715 = vmatprep.subr.bf16.mxu0 %v11066_v23 }
 0x41c   : > { %6809 = vmatpush1.bf16.msra.mxu1 %v11067_v2 }
 0x41d   : > { %6811 = vmatprep.subr.bf16.mxu1 %v11068_v34  ;;  %6717 = vmatpush1.bf16.msra.mxu0 %v11069_v39 }
 0x41e   : > { %6719 = vmatprep.subr.bf16.mxu0 %v6718_v15 }
 0x420   : > { %6813 = vmatpush1.bf16.msra.mxu1 %v11070_v41  ;;  %5026 = vmatmul.mubr.f32.vlgmr.msra.gmra.mrb[32].mxu0 %v11071_v22 }
 0x421   : > { %6815 = vmatprep.subr.bf16.mxu1 %v6814_v55  ;;  %6721 = vmatpush1.bf16.msra.mxu0 %v6720_v40 }
 0x422   : > { %5144 = vmatprep.mubr.f32.mxu0 %v11019_v10  ;;  %6723 = vmatprep.subr.bf16.mxu0 %v6722_v19 }
 0x423   : > { %5673 = vmatmul.mubr.f32.vlgmr.msra.gmra.mrb[32].mxu1 %v11071_v22 }
 0x424   : > { %6817 = vmatpush1.bf16.msra.mxu1 %v6816_v26  ;;  %5791 = vmatprep.mubr.f32.mxu1 %v11019_v10 }
 0x425   : > { %6819 = vmatprep.subr.bf16.mxu1 %v6818_v1  ;;  %6725 = vmatpush1.bf16.msra.mxu0 %v6724_v21 }
 0x426   : > { %6727 = vmatprep.subr.bf16.mxu0 %v6726_v61  ;;  %v10312_v61 = vsub.s32 2, %v5956_v58 }
 0x428   : > { %6821 = vmatpush1.bf16.msra.mxu1 %v6820_v54 }
 0x429   : > { %6823 = vmatprep.subr.bf16.mxu1 %v6822_v25  ;;  %6729 = vmatpush1.bf16.msra.mxu0 %v6728_v27  ;;  %v10316_v25 = vsub.s32 0, %v5956_v58 }
 0x42a   : > { %6731 = vmatprep.subr.bf16.mxu0 %v6730_v38 }
 0x42c   : > { %6825 = vmatpush1.bf16.msra.mxu1 %v6824_v60  ;;  %v10322_v60 = vsub.s32 3, %v5956_v58 }
 0x42d   : > { %6827 = vmatprep.subr.bf16.mxu1 %v6826_v7  ;;  %6733 = vmatpush1.bf16.msra.mxu0 %v6732_v30 }
 0x42e   : > { %6735 = vmatprep.subr.bf16.mxu0 %v9888_v6 }
 0x430   : > { %6829 = vmatpush1.bf16.msra.mxu1 %v6828_v9  ;;  %5146 = vmatmul.mubr.f32.vlgmr.msra.gmra.mrb[32].mxu0 %v11034_v29 }
 0x431   : > { %6831 = vmatprep.subr.bf16.mxu1 %v9925_v63  ;;  %6737 = vmatpush1.bf16.msra.mxu0 %v9937_v48  ;;  %v4588_v48 = vpop.permute.xlu0 %4587 }
 0x432   : > { %5232 = vmatprep.mubr.f32.mxu0 %v11019_v10  ;;  %6739 = vmatprep.subr.bf16.mxu0 %v11058_v37 }
 0x433   : > { %5793 = vmatmul.mubr.f32.vlgmr.msra.gmra.mrb[32].mxu1 %v11034_v29 }
 0x434   : > { %6833 = vmatpush1.bf16.msra.mxu1 %v11059_v62  ;;  %5879 = vmatprep.mubr.f32.mxu1 %v11019_v10 }
 0x435   : > { %6835 = vmatprep.subr.bf16.mxu1 %v11060_v18  ;;  %6741 = vmatpush1.bf16.msra.mxu0 %v11061_v31  ;;  %v10332_v7 = vpop.permute.xlu0 %5952 }
 0x436   : > { %6743 = vmatprep.subr.bf16.mxu0 %v11062_v20 }
 0x438   : > { %6837 = vmatpush1.bf16.msra.mxu1 %v11063_v13 }
 0x439   : > { %6839 = vmatprep.subr.bf16.mxu1 %v11064_v59  ;;  %6745 = vmatpush1.bf16.msra.mxu0 %v11065_v43 }
 0x43a   : > { %6747 = vmatprep.subr.bf16.mxu0 %v11066_v23 }
 0x43c   : > { %6841 = vmatpush1.bf16.msra.mxu1 %v11067_v2 }
 0x43d   : > { %6843 = vmatprep.subr.bf16.mxu1 %v11068_v34  ;;  %6749 = vmatpush1.bf16.msra.mxu0 %v11069_v39 }
 0x440   : > { %6845 = vmatpush1.bf16.msra.mxu1 %v11070_v41  ;;  %5234 = vmatmul.mubr.f32.vlgmr.msra.gmra.mrb[32].mxu0 %v11034_v29 }
 0x443   : > { %5881 = vmatmul.mubr.f32.vlgmr.msra.gmra.mrb[32].mxu1 %v11034_v29 }
 0x513   : > { %v5235_v6 = vpop.f32.mrb[32].mxu0 }
 0x514   : > { %v6910_v63 = vadd.f32 %v5235_v6, %v4588_v48  ;;  %v5237_v26 = vpop.f32.mrb[33].mxu0 }
 0x515   : > { %v6911_v10 = vadd.f32 %v5237_v26, %v4588_v48 }
 0x516   : > { %v5882_v40 = vpop.f32.mrb[32].mxu1  ;;  %v5887_v24 = vsub.f32 0.0, %v6910_v63 }
 0x517   : > { %v6912_v33 = vadd.f32 %v5882_v40, %v4588_v48  ;;  %v5884_v11 = vpop.f32.mrb[33].mxu1  ;;  %v5888_v3 = vsub.f32 0.0, %v6911_v10 }
 0x518   : > { %v6913_v15 = vadd.f32 %v5884_v11, %v4588_v48  ;;  %v5891_v55 = vmul.f32 1.442695, %v5887_v24 }
 0x519   : > { %v5889_v42 = vsub.f32 0.0, %v6912_v33  ;;  %v5893_v36 = vmul.f32 1.442695, %v5888_v3 }
 0x51a   : > { %v5890_v19 = vsub.f32 0.0, %v6913_v15  ;;  %7433 = vpow2.f32 %v5891_v55 }
 0x51b   : > { %v5895_v28 = vmul.f32 1.442695, %v5889_v42  ;;  %7435 = vpow2.f32 %v5893_v36 }
 0x51c   : > { %v5897_v29 = vmul.f32 1.442695, %v5890_v19 }
 0x51d   : > { %7437 = vpow2.f32 %v5895_v28 }
 0x51e   : > { %7439 = vpow2.f32 %v5897_v29 }
 0x524   : > { %v7434_v5 = vpop.eup %7433 }
 0x525   : > { %v7436_v1 = vpop.eup %7435  ;;  %v5899_v44 = vadd.f32 1.0, %v7434_v5 }
 0x526   : > { %v5900_v21 = vadd.f32 1.0, %v7436_v1 }
 0x527   : > { %v7438_v56 = vpop.eup %7437  ;;  %7441 = vrcp.f32 %v5899_v44 }
 0x528   : > { %v5901_v47 = vadd.f32 1.0, %v7438_v56  ;;  %7443 = vrcp.f32 %v5900_v21  ;;  %v7440_v54 = vpop.eup %7439 }
 0x529   : > { %v5902_v0 = vadd.f32 1.0, %v7440_v54 }
 0x52a   : > { %7445 = vrcp.f32 %v5901_v47 }
 0x52b   : > { %7447 = vrcp.f32 %v5902_v0 }
 0x531   : > { %v7442_v17 = vpop.eup %7441 }
 0x532   : > { %v7444_v35 = vpop.eup %7443  ;;  %v10318_v32 = vmul.f32 0.7, %v7442_v17  ;;  %v5919_v27 = vmul.f32 0.195, %v7442_v17  ;;  %v10320_v51 = vmul.f32 0.005, %v7442_v17 }
 0x533   : > { %v5920_v8 = vmul.f32 0.195, %v7444_v35  ;;  %v10326_v38 = vmul.f32 2.0, %v7442_v17  ;;  %v10330_v14 = vmul.f32 0.7, %v7444_v35  ;;  %v10342_v12 = vmul.f32 2.0, %v7444_v35 }
 0x534   : > { %v7446_v49 = vpop.eup %7445  ;;  %v10324_v16 = vadd.f32 0.005, %v5919_v27  ;;  %v6022_v45 = vrot.slane %v10320_v51, %v10312_v61  ;;  %v10338_v46 = vrot.slane %v10318_v32, %v10316_v25  ;;  %v10364_v22 = vmul.f32 0.005, %v7444_v35 }
 0x535   : > { %v5921_v30 = vmul.f32 0.195, %v7446_v49  ;;  %v10340_v57 = vmul.f32 0.005, %v7446_v49  ;;  %v10348_v62 = vmul.f32 0.7, %v7446_v49  ;;  %v7448_v24 = vpop.eup %7447  ;;  %v6062_v33 = vrot.slane %v10326_v38, %v10322_v60 }
 0x536   : > { %v5958_v9 = vrot.slane %v10324_v16, %v10314_v53  ;;  %v6035_v4 = vmul.f32 %v6022_v45, %v10334_v52  ;;  %v6039_v37 = vmul.f32 %v6022_v45, %v10332_v7  ;;  %v10352_v31 = vmul.f32 2.0, %v7446_v49 }
 0x537   : > { %v10350_v18 = vadd.f32 0.005, %v5921_v30  ;;  %v6030_v20 = vrot.slane %v10340_v57, %v10312_v61  ;;  %v10356_v13 = vadd.f32 0.005, %v5920_v8  ;;  %v6006_v36 = vrot.slane %v10348_v62, %v10316_v25 }
 0x538   : > { %v5971_v59 = vmul.f32 %v5958_v9, %v10334_v52  ;;  %v5975_v43 = vmul.f32 %v5958_v9, %v10332_v7  ;;  %v6043_v23 = vmul.f32 1.442695, %v6035_v4  ;;  %v6051_v2 = vmul.f32 1.442695, %v6039_v37 }
 0x539   : > { %v5966_v34 = vrot.slane %v10350_v18, %v10314_v53  ;;  %v6037_v39 = vmul.f32 %v6030_v20, %v10334_v52  ;;  %v6041_v41 = vmul.f32 %v6030_v20, %v10332_v7  ;;  %v5962_v63 = vrot.slane %v10356_v13, %v10314_v53 }
 0x53a   : > { %v5979_v48 = vmul.f32 1.442695, %v5971_v59  ;;  %v5987_v6 = vmul.f32 1.442695, %v5975_v43  ;;  %7449 = vpow2.f32 %v6043_v23  ;;  %v6026_v28 = vrot.slane %v10364_v22, %v10312_v61 }
 0x53b   : > { %7451 = vpow2.f32 %v6051_v2  ;;  %v5973_v26 = vmul.f32 %v5966_v34, %v10334_v52  ;;  %v5977_v40 = vmul.f32 %v5966_v34, %v10332_v7  ;;  %v6047_v10 = vmul.f32 1.442695, %v6037_v39 }
 0x53c   : > { %7453 = vpow2.f32 %v5979_v48  ;;  %v5972_v11 = vmul.f32 %v5962_v63, %v10334_v52  ;;  %v5976_v3 = vmul.f32 %v5962_v63, %v10332_v7  ;;  %v6055_v42 = vmul.f32 1.442695, %v6041_v41 }
 0x53d   : > { %7455 = vpow2.f32 %v5987_v6  ;;  %v5983_v15 = vmul.f32 1.442695, %v5973_v26  ;;  %v5991_v55 = vmul.f32 1.442695, %v5977_v40  ;;  %v6070_v29 = vrot.slane %v10352_v31, %v10322_v60 }
 0x53e   : > { %7457 = vpow2.f32 %v6047_v10  ;;  %v5981_v19 = vmul.f32 1.442695, %v5972_v11  ;;  %v5989_v5 = vmul.f32 1.442695, %v5976_v3  ;;  %v5922_v1 = vmul.f32 0.195, %v7448_v24 }
 0x53f   : > { %7459 = vpow2.f32 %v5983_v15  ;;  %v6036_v44 = vmul.f32 %v6026_v28, %v10334_v52  ;;  %v6040_v56 = vmul.f32 %v6026_v28, %v10332_v7  ;;  %v10382_v21 = vmul.f32 0.005, %v7448_v24 }
 0x540   : > { %7461 = vpow2.f32 %v5991_v55  ;;  %v10386_v47 = vrot.slane %v10330_v14, %v10316_v25  ;;  %v10388_v50 = vmul.f32 0.7, %v7448_v24  ;;  %v10390_v54 = vadd.f32 0.005, %v5922_v1 }
 0x541   : > { %7463 = vpow2.f32 %v6055_v42  ;;  %v6045_v58 = vmul.f32 1.442695, %v6036_v44  ;;  %v6053_v0 = vmul.f32 1.442695, %v6040_v56  ;;  %v6034_v17 = vrot.slane %v10382_v21, %v10312_v61 }
 0x542   : > { %7465 = vpow2.f32 %v5981_v19  ;;  %v10394_v35 = vmul.f32 2.0, %v7448_v24  ;;  %v5970_v27 = vrot.slane %v10390_v54, %v10314_v53  ;;  %v6103_v49 = vrot.slane %v10318_v32, 5 }
 0x543   : > { %7467 = vpow2.f32 %v5989_v5  ;;  %v6038_v45 = vmul.f32 %v6034_v17, %v10334_v52  ;;  %v6042_v30 = vmul.f32 %v6034_v17, %v10332_v7  ;;  %v6104_v9 = vrot.slane %v10330_v14, 5 }
 0x544   : > { %v7450_v8 = vpop.eup %7449  ;;  %7469 = vpow2.f32 %v6045_v58  ;;  %v5974_v61 = vmul.f32 %v5970_v27, %v10334_v52  ;;  %v5978_v37 = vmul.f32 %v5970_v27, %v10332_v7  ;;  %v6105_v2 = vrot.slane %v10348_v62, 5 }
 0x545   : > { %v7452_v4 = vpop.eup %7451  ;;  %7471 = vpow2.f32 %v6053_v0  ;;  %v6075_v20 = vmul.f32 %v7450_v8, %v6062_v33  ;;  %v6049_v43 = vmul.f32 1.442695, %v6038_v45  ;;  %v6057_v53 = vmul.f32 1.442695, %v6042_v30 }
 0x546   : > { %v7454_v59 = vpop.eup %7453  ;;  %v6079_v23 = vmul.f32 %v7452_v4, %v6062_v33  ;;  %v5985_v39 = vmul.f32 1.442695, %v5974_v61  ;;  %v5993_v41 = vmul.f32 1.442695, %v5978_v37  ;;  %v6106_v6 = vrot.slane %v10388_v50, 5 }
 0x547   : > { %v7456_v34 = vpop.eup %7455  ;;  %v6011_v48 = vmul.f32 %v7454_v59, %v10338_v46  ;;  %7473 = vpow2.f32 %v6049_v43  ;;  %v10409_v7 = vadd.f32 %v6103_v49, %v10326_v38  ;;  %v10412_v26 = vadd.f32 %v6104_v9, %v10342_v12 }
 0x548   : > { %v7458_v63 = vpop.eup %7457  ;;  %v6015_v52 = vmul.f32 %v7456_v34, %v10338_v46  ;;  %7475 = vpow2.f32 %v5985_v39  ;;  %v10415_v33 = vadd.f32 %v6105_v2, %v10352_v31  ;;  %v10418_v46 = vadd.f32 %v6106_v6, %v10394_v35 }
 0x549   : > { %v7460_v40 = vpop.eup %7459  ;;  %v6077_v10 = vmul.f32 %v7458_v63, %v6070_v29  ;;  %v6083_v24 = vadd.f32 %v6075_v20, %v6011_v48  ;;  %7477 = vpow2.f32 %v5993_v41  ;;  %v6119_v31 = vrot.slane %v10409_v7, 3 }
 0x54a   : > { %v7462_v11 = vpop.eup %7461  ;;  %v6013_v3 = vmul.f32 %v7460_v40, %v6006_v36  ;;  %v6087_v15 = vadd.f32 %v6079_v23, %v6015_v52  ;;  %7479 = vpow2.f32 %v6057_v53  ;;  %v6120_v42 = vrot.slane %v10412_v26, 3 }
 0x54b   : > { %v7464_v55 = vpop.eup %7463  ;;  %v6017_v38 = vmul.f32 %v7462_v11, %v6006_v36  ;;  %6091 = vst [vmem:[%s10422_s17] sm:$0xff] %v6083_v24  ;;  %v6121_v1 = vrot.slane %v10415_v33, 3  ;;  %v6122_v36 = vrot.slane %v10418_v46, 3  ;;  %v6066_v56 = vrot.slane %v10342_v12, %v10322_v60 }
 0x54c   : > { %v7466_v19 = vpop.eup %7465  ;;  %v6081_v28 = vmul.f32 %v7464_v55, %v6070_v29  ;;  %v6085_v5 = vadd.f32 %v6077_v10, %v6013_v3  ;;  %6095 = vst [vmem:[%s10422_s17 + $0x20] sm:$0xff] %v6087_v15  ;;  %7481 = vrcp.f32 %v6119_v31  ;;  %v6010_v30 = vrot.slane %v10388_v50, %v10316_v25 }
 0x54d   : > { %v7468_v44 = vpop.eup %7467  ;;  %v6012_v58 = vmul.f32 %v7466_v19, %v10386_v47  ;;  %7483 = vrcp.f32 %v6120_v42  ;;  %v6139_v6 = vrot.slane %v10320_v51, 2  ;;  %v6140_v63 = vrot.slane %v10364_v22, 2 }
 0x54e   : > { %v7470_v0 = vpop.eup %7469  ;;  %v6016_v17 = vmul.f32 %v7468_v44, %v10386_v47  ;;  %v6089_v27 = vadd.f32 %v6081_v28, %v6017_v38  ;;  %6093 = vst [vmem:[%s10422_s17 + $0x10] sm:$0xff] %v6085_v5  ;;  %7485 = vrcp.f32 %v6121_v1  ;;  %v6074_v47 = vrot.slane %v10394_v35, %v10322_v60 }
 0x54f   : > { %v7472_v29 = vpop.eup %7471  ;;  %v6076_v49 = vmul.f32 %v7470_v0, %v6066_v56  ;;  %7487 = vrcp.f32 %v6122_v36 }
 0x550   : > { %v6080_v8 = vmul.f32 %v7472_v29, %v6066_v56  ;;  %6097 = vst [vmem:[%s10422_s17 + $0x30] sm:$0xff] %v6089_v27 }
 0x551   : > { %v6084_v12 = vadd.f32 %v6076_v49, %v6012_v58  ;;  %v7474_v45 = vpop.eup %7473 }
 0x552   : > { %v6088_v9 = vadd.f32 %v6080_v8, %v6016_v17  ;;  %v7476_v4 = vpop.eup %7475  ;;  %v6078_v20 = vmul.f32 %v7474_v45, %v6074_v47 }
 0x553   : > { %6092 = vst [vmem:[%s10422_s17 + $0x8] sm:$0xff] %v6084_v12  ;;  %v7478_v61 = vpop.eup %7477  ;;  %v6014_v37 = vmul.f32 %v7476_v4, %v6010_v30 }
 0x554   : > { %6096 = vst [vmem:[%s10422_s17 + $0x28] sm:$0xff] %v6088_v9  ;;  %v7480_v59 = vpop.eup %7479  ;;  %v6018_v43 = vmul.f32 %v7478_v61, %v6010_v30 }
 0x555   : > { %v6082_v25 = vmul.f32 %v7480_v59, %v6074_v47  ;;  %v6086_v53 = vadd.f32 %v6078_v20, %v6014_v37 }
 0x556   : > { %v7482_v23 = vpop.eup %7481 }
 0x557   : > { %v7484_v60 = vpop.eup %7483  ;;  %v6090_v35 = vadd.f32 %v6082_v25, %v6018_v43  ;;  %6094 = vst [vmem:[%s10422_s17 + $0x18] sm:$0xff] %v6086_v53  ;;  %v6128_v2 = vmul.f32 %v7482_v23, %v10318_v32 }
 0x558   : > { %v7486_v34 = vpop.eup %7485  ;;  %v6130_v39 = vmul.f32 %v7484_v60, %v10330_v14 }
 0x559   : > { %v7488_v41 = vpop.eup %7487  ;;  %6098 = vst [vmem:[%s10422_s17 + $0x38] sm:$0xff] %v6090_v35  ;;  %v6132_v48 = vmul.f32 %v7486_v34, %v10348_v62  ;;  %v6151_v52 = vrot.slane %v6128_v2, 7 }
 0x55a   : > { %7502 = shalt.err (!%p7499_p5)
}
 0x55b   : > { %s7503_s17 = scalar_lea.hbm %s10449_s25, 1024  ;;  %s7507_s14 = scalar_lea.hbm %s10564_s8, 2048 }
 0x55c   : > { %p7504_p7 = scmp.ne.s32.totalorder %s10449_s25, %s7503_s17  ;;  %p7508_p12 = scmp.lt.u32.totalorder %s10449_s25, %s10564_s8 }
 0x55d   : > { %p7509_p13 = scmp.lt.u32.totalorder %s7507_s14, %s7503_s17  ;;  %p7511_p1 = scmp.lt.u32.totalorder %s7503_s17, %s10449_s25 }
 0x55e   : > { %p7505_p10 = pnand %p7504_p7, %p7681_p6 }
 0x55f   : > { %p7510_p0 = por %p7509_p13, %p7508_p12 }
 0x560   : > { %p7506_p11 = pneg %p7505_p10 }
 0x561   : > { %p7512_p2 = por %p7511_p1, %p7510_p0 }
 0x563   : > { %p7513_p3 = pnand %p7512_p2, %p7506_p11 }
 0x565   : > { %7516 = shalt.err (!%p7513_p3)
}
 0x566   : > { %s7588_s29 = smov 512   ;;  %s7589_s21 = smov 1024   ;;  %v6134_v32 = vmul.f32 %v7488_v41, %v10388_v50  ;;  %v6141_v51 = vrot.slane %v10340_v57, 2  ;;  %v6152_v14 = vrot.slane %v6130_v39, 7  ;;  %v6163_v62 = vrot.slane %v10324_v16, 7 }
 0x567   : > { %s7590_s27 = smov 32   ;;  %s11072_s22 = scalar_lea.sflag [#allocation4], %s7700_s28  ;;  %v6142_v22 = vrot.slane %v10382_v21, 2  ;;  %v6153_v40 = vrot.slane %v6132_v48, 7  ;;  %v6164_v10 = vrot.slane %v10356_v13, 7  ;;  %v6172_v24 = vsel %vm6171_vm1, %v6139_v6, %v6151_v52 }
 0x568   : > { %7254 = dma.vmem_to_hbm [thread:$0]  (%p7681_p6), %s10444_s23, 1024, %s10449_s25, %s11072_s22, %s7588_s29, %s7589_s21, %s7590_s27   ;;  %v6154_v11 = vrot.slane %v6134_v32, 7  ;;  %v6165_v3 = vrot.slane %v10350_v18, 7  ;;  %v6173_v15 = vsel %vm6171_vm1, %v6140_v63, %v6152_v14  ;;  %v6177_v50 = vsel %vm6176_vm4, %v6172_v24, %v6163_v62 }
 0x569   : > { %v6166_v57 = vrot.slane %v10390_v54, 7  ;;  %v6174_v16 = vsel %vm6171_vm1, %v6141_v51, %v6153_v40  ;;  %v6178_v55 = vsel %vm6176_vm4, %v6173_v15, %v6164_v10  ;;  %v6182_v21 = vsel %vm6181_vm5, %v6177_v50, %v10409_v7  ;;  %s6413_s23 = sshll.u32 %s7663_s13, 8  ;;  %s11073_s25 = sshll.u32 %s7700_s28, 4 }
 0x56a   : > { %v6175_v13 = vsel %vm6171_vm1, %v6142_v22, %v6154_v11  ;;  %v6179_v38 = vsel %vm6176_vm4, %v6174_v16, %v6165_v3  ;;  %v6183_v18 = vsel %vm6181_vm5, %v6178_v55, %v10412_v26  ;;  %s375_s26 = scalar_lea.vmem [#allocation5], %s11073_s25  ;;  %s10512_s14 = scalar_lea.hbm %s10565_s9, %s6413_s23 }
 0x56b   : > { %s6232_s27 = sshll.u32 %s375_s26, 4  ;;  %v6180_v54 = vsel %vm6176_vm4, %v6175_v13, %v6166_v57  ;;  %v6184_v31 = vsel %vm6181_vm5, %v6179_v38, %v10415_v33  ;;  %v6190_v42 = vcombine.low %v6182_v21, %v6183_v18  ;;  %s6202_s13 = scalar_lea.sflag [#allocation6], %s7700_s28  ;;  %s10514_s27 = int_to_ptr.vmem [resolvable:$true] %s6232_s27 }
 0x56c   : > { %v6185_v7 = vsel %vm6181_vm5, %v6180_v54, %v10418_v46  ;;  %s7517_s16 = scalar_lea.vmem %s10514_s27, 256  ;;  %s7591_s29 = smov [#allocation5]  }
 0x56d   : > { %v6191_v19 = vcombine.low %v6184_v31, %v6185_v7  ;;  %6194 = vst [vmem:[%s375_s26] sm:$0xff] %v6190_v42  ;;  %p7518_p4 = scmp.ne.s32.totalorder %s10514_s27, %s7517_s16  ;;  %s7521_s21 = sshll.u32 %s7591_s29, 4  ;;  %s7522_s21 = int_to_ptr.vmem [resolvable:$false] %s7521_s21 }
 0x56e   : > { %s7523_s22 = scalar_lea.vmem %s7522_s21, 512  ;;  %p7524_p10 = scmp.lt.s32.totalorder %s10514_s27, %s7522_s21 }
 0x56f   : > { %6195 = vst [vmem:[%s375_s26 + $0x8] sm:$0xff] %v6191_v19  ;;  %p7519_p5 = pnand %p7518_p4, %p7681_p6  ;;  %p7525_p11 = scmp.lt.s32.totalorder %s7523_s22, %s7517_s16 }
 0x571   : > { %p7520_p7 = pneg %p7519_p5  ;;  %p7526_p12 = por %p7525_p11, %p7524_p10 }
 0x573   : > { %p7527_p13 = pnand %p7526_p12, %p7520_p7 }
 0x575   : > { %7530 = shalt.err (!%p7527_p13)
}
 0x576   : > { %s7531_s28 = scalar_lea.hbm %s10512_s14, 256  ;;  %s7535_s26 = scalar_lea.hbm %s10565_s9, 512 }
 0x577   : > { %p7532_p0 = scmp.ne.s32.totalorder %s10512_s14, %s7531_s28  ;;  %p7536_p3 = scmp.lt.u32.totalorder %s10512_s14, %s10565_s9 }
 0x578   : > { %p7537_p4 = scmp.lt.u32.totalorder %s7535_s26, %s7531_s28  ;;  %p7539_p7 = scmp.lt.u32.totalorder %s7531_s28, %s10512_s14 }
 0x579   : > { %p7533_p1 = pnand %p7532_p0, %p7681_p6 }
 0x57a   : > { %p7538_p5 = por %p7537_p4, %p7536_p3 }
 0x57b   : > { %p7534_p2 = pneg %p7533_p1 }
 0x57c   : > { %p7540_p10 = por %p7539_p7, %p7538_p5 }
 0x57e   : > { %p7541_p11 = pnand %p7540_p10, %p7534_p2 }
 0x580   : > { %7544 = shalt.err (!%p7541_p11)
}
 0x581   : > { %7255 = dma.vmem_to_hbm [thread:$0]  (%p7681_p6), %s10514_s27, 256, %s10512_s14, %s6202_s13  }
 0x582 PF: > { %s6244_s16 = sand.u32 1, %s7571_s30   ;;  %p7259_p12 = pnand %p6331_p9, %p7685_p8 }
 0x583   : > { %s6245_s29 = scalar_lea.sflag [#allocation4], %s6244_s16 }
 0x584   : > { %7562 = dma.done.wait (!%p7259_p12), %s6245_s29, 1024  }
 0x585   : > { %7564 = vsyncadd (!%p7259_p12), %s6245_s29, 4294966272  ;;  %s6254_s21 = scalar_lea.sflag [#allocation6], %s6244_s16 }
 0x586   : > { %7566 = dma.done.wait (!%p7259_p12), %s6254_s21, 256  }
 0x587   : > { %7568 = vsyncadd (!%p7259_p12), %s6254_s21, 4294967040  ;;  %p23_p6 = scmp.ge.s32.totalorder %s7667_s15, 4   ;;  %s11074_s30 = smov %s7575_s10 }
 0x588   : > { %s11075_s10 = smov %s7579_s11  ;;  %s11076_s11 = smov %s7679_s18 }
 0x589   : > { %s11077_s12 = smov %s7667_s15  ;;  %25 = sbr.rel (!%p23_p6) target bundleno = 5 (0x5), region = 132 }
 0x590   :  { %6259 = vsyncpa [#allocation4], 1 }
 0x591   :  { %6261 = vsyncpa [#allocation4 + $0x1], 1 }
 0x592   :  { %6262 = vsyncpa [#allocation6], 1 }
 0x593   :  { %6264 = vsyncpa [#allocation6 + $0x1], 1 }

</bundles_post_ra>
